<compile_context>
chip_gen: v5e
topology: v5e:2x2
jax: 0.10.0
libtpu: 0.0.40
codegen_flags: <defaults>
</compile_context>

<pallas_src>
import functools

import jax
import jax.numpy as jnp
from jax.experimental import pallas as pl
from jax.experimental.pallas import tpu as pltpu


def _layernorm(x, w, b, eps=1e-5):
    # torch.nn.LayerNorm over last dim, biased variance, eps inside sqrt.
    mu = jnp.mean(x, axis=-1, keepdims=True)
    xc = x - mu
    var = jnp.mean(xc * xc, axis=-1, keepdims=True)
    return xc * jax.lax.rsqrt(var + eps) * w + b


def fused_encoder_kernel(
    x_ref,                # (N, B, E)   seq-first, module's native layout
    wqkv_ref, bqkv_ref,   # (3H, E, d), (3H, 1, d)  (q third pre-scaled)
    wo_ref, bo_ref,       # (H, d, E), (1, E)
    ln1w_ref, ln1b_ref,   # (1, E)
    w1_ref, b1_ref,       # (E, F), (1, F)
    w2_ref, b2_ref,       # (F, E), (1, E)
    ln2w_ref, ln2b_ref,   # (1, E)
    out_ref,              # (N, B, E)
    *, num_layers, num_heads,
):
    N, B, E = x_ref.shape
    H = num_heads

    # Load weights once; they stay resident in VMEM across all layers/batches.
    wqkv = wqkv_ref[...]
    bqkv = bqkv_ref[...]
    wo = wo_ref[...]
    bo = bo_ref[...]
    ln1w, ln1b = ln1w_ref[...], ln1b_ref[...]
    w1, b1 = w1_ref[...], b1_ref[...]
    w2, b2 = w2_ref[...], b2_ref[...]
    ln2w, ln2b = ln2w_ref[...], ln2b_ref[...]

    x_all = x_ref[...].astype(jnp.float32)   # (N, B, E)

    outs = []
    for b_idx in range(B):                   # static loop, B is tiny
        xb = x_all[:, b_idx, :]              # (N, E)
        for _ in range(num_layers):          # layers share weights (deepcopy init)
            # --- fused, head-batched Q/K/V projection (single einsum) ---
            xg = jnp.broadcast_to(xb, (3 * H, N, E))
            qkv = jnp.einsum("gne,ged->gnd", xg, wqkv,
                             preferred_element_type=jnp.float32) + bqkv  # (3H, N, d)
            qh = qkv[:H]            # (H, N, d); 1/sqrt(d) already folded in
            kh = qkv[H:2 * H]
            vh = qkv[2 * H:]

            # --- head-batched attention (no per-head loop, no lane concat) ---
            s = jnp.einsum("hnd,hmd->hnm", qh, kh,
                           preferred_element_type=jnp.float32)           # (H, N, N)
            s = s - jnp.max(s, axis=-1, keepdims=True)
            e = jnp.exp(s)
            p = e * pl.reciprocal(jnp.sum(e, axis=-1, keepdims=True), approx=True)
            oh = jnp.einsum("hnm,hmd->hnd", p, vh,
                            preferred_element_type=jnp.float32)          # (H, N, d)

            # out_proj per head, summed: concat(heads) @ Wo == sum_h head_h @ Wo[h]
            attn = jnp.sum(
                jnp.einsum("hnd,hde->hne", oh, wo,
                           preferred_element_type=jnp.float32),
                axis=0) + bo                                             # (N, E)

            # --- residual + LayerNorm 1 ---
            x1 = _layernorm(xb + attn, ln1w, ln1b)

            # --- feed-forward (Linear -> ReLU -> Linear) ---
            h1 = jnp.maximum(
                jnp.dot(x1, w1, preferred_element_type=jnp.float32) + b1, 0.0)
            ff = jnp.dot(h1, w2, preferred_element_type=jnp.float32) + b2

            # --- residual + LayerNorm 2 ---
            xb = _layernorm(x1 + ff, ln2w, ln2b)
        outs.append(xb)

    out_ref[...] = jnp.stack(outs, axis=1).astype(out_ref.dtype)


def transformer_encoder_as_gnn(x_nbe, fused, num_layers, num_heads):
    """x_nbe: (N, B, E) -- batch_first=False, same convention as the module."""
    N, B, E = x_nbe.shape

    ordered = [
        fused["wqkv_h"], fused["bqkv_h"], fused["wo_h"], fused["bo"],
        fused["ln1_w"], fused["ln1_b"],
        fused["w1"], fused["b1"], fused["w2"], fused["b2"],
        fused["ln2_w"], fused["ln2_b"],
    ]

    def full_spec(shape):
        nd = len(shape)
        return pl.BlockSpec(shape, lambda i, _nd=nd: (0,) * _nd)

    kernel = functools.partial(
        fused_encoder_kernel, num_layers=num_layers, num_heads=num_heads)

    return pl.pallas_call(
        kernel,
        out_shape=jax.ShapeDtypeStruct((N, B, E), x_nbe.dtype),
        grid=(1,),
        in_specs=[full_spec(x_nbe.shape)] + [full_spec(a.shape) for a in ordered],
        out_specs=full_spec((N, B, E)),
        compiler_params=pltpu.CompilerParams(
            dimension_semantics=("arbitrary",)),
    )(x_nbe, *ordered)


def init_params(key, embed_dim, feedforward_dim):
    E, F = embed_dim, feedforward_dim
    keys = jax.random.split(key, 6)
    lim_e = 1.0 / (E ** 0.5)
    lim_f = 1.0 / (F ** 0.5)

    def u(k, shape, lim):
        return jax.random.uniform(k, shape, jnp.float32, -lim, lim)

    # NOTE: weights here are stored (in, out) and used as x @ W; a real torch
    # state_dict stores nn.Linear weights as (out, in) and needs a transpose.
    return {
        "wq": u(keys[0], (E, E), lim_e), "bq": jnp.zeros((1, E), jnp.float32),
        "wk": u(keys[1], (E, E), lim_e), "bk": jnp.zeros((1, E), jnp.float32),
        "wv": u(keys[2], (E, E), lim_e), "bv": jnp.zeros((1, E), jnp.float32),
        "wo": u(keys[3], (E, E), lim_e), "bo": jnp.zeros((1, E), jnp.float32),
        "ln1_w": jnp.ones((1, E), jnp.float32),
        "ln1_b": jnp.zeros((1, E), jnp.float32),
        "w1": u(keys[4], (E, F), lim_e), "b1": jnp.zeros((1, F), jnp.float32),
        "w2": u(keys[5], (F, E), lim_f), "b2": jnp.zeros((1, E), jnp.float32),
        "ln2_w": jnp.ones((1, E), jnp.float32),
        "ln2_b": jnp.zeros((1, E), jnp.float32),
    }


def fuse_params(params, num_heads):
    """One-time, host-side repack into the layout the kernel consumes.

    * Q/K/V weights are split per head and stacked on a leading batch axis:
      (3H, E, d).  The 1/sqrt(head_dim) attention scale is folded into the Q
      third so the kernel never scales scores.
    * out_proj weight is reshaped to (H, d, E) so concat(heads)@Wo can be done
      as a head-batched matmul + sum (no lane-axis concatenate in the kernel).
    """
    E = params["wq"].shape[0]
    H = num_heads
    d = E // H
    scale = d ** (-0.5)

    def heads(w, b, s=1.0):
        wh = jnp.transpose((w * s).reshape(E, H, d), (1, 0, 2))   # (H, E, d)
        bh = jnp.transpose((b * s).reshape(1, H, d), (1, 0, 2))   # (H, 1, d)
        return wh, bh

    wq_h, bq_h = heads(params["wq"], params["bq"], scale)
    wk_h, bk_h = heads(params["wk"], params["bk"])
    wv_h, bv_h = heads(params["wv"], params["bv"])

    return {
        "wqkv_h": jnp.concatenate([wq_h, wk_h, wv_h], axis=0),    # (3H, E, d)
        "bqkv_h": jnp.concatenate([bq_h, bk_h, bv_h], axis=0),    # (3H, 1, d)
        "wo_h": params["wo"].reshape(H, d, E),                    # (H, d, E)
        "bo": params["bo"],
        "ln1_w": params["ln1_w"], "ln1_b": params["ln1_b"],
        "w1": params["w1"], "b1": params["b1"],
        "w2": params["w2"], "b2": params["b2"],
        "ln2_w": params["ln2_w"], "ln2_b": params["ln2_b"],
    }


if __name__ == "__main__":
    # seq N=8, batch B=2, embed E=32, heads=4, feedforward=64, layers=2.
    N, B, E = 8, 2, 32
    NUM_HEADS = 4
    FF_DIM = 64
    NUM_LAYERS = 2

    key = jax.random.PRNGKey(0)
    k_x, k_p = jax.random.split(key)
    x = jax.random.normal(k_x, (N, B, E), dtype=jnp.float32)  # (seq, batch, embed)

    params = init_params(k_p, E, FF_DIM)
    fused = fuse_params(params, NUM_HEADS)   # one-time repack, outside hot path

    out = transformer_encoder_as_gnn(x, fused, NUM_LAYERS, NUM_HEADS)
    out = jax.block_until_ready(out)
    assert out.shape == (N, B, E), out.shape
    assert bool(jnp.all(jnp.isfinite(out)))
    print("KERNEL_OK")
</pallas_src>

<mosaic_0001>
module attributes {stable_mosaic.version = 11 : i64} {
  func.func @fused_encoder_kernel(%arg0: i32, %arg1: memref<8x2x32xf32, #tpu.memory_space<vmem>>, %arg2: memref<12x32x8xf32, #tpu.memory_space<vmem>>, %arg3: memref<12x1x8xf32, #tpu.memory_space<vmem>>, %arg4: memref<4x8x32xf32, #tpu.memory_space<vmem>>, %arg5: memref<1x32xf32, #tpu.memory_space<vmem>>, %arg6: memref<1x32xf32, #tpu.memory_space<vmem>>, %arg7: memref<1x32xf32, #tpu.memory_space<vmem>>, %arg8: memref<32x64xf32, #tpu.memory_space<vmem>>, %arg9: memref<1x64xf32, #tpu.memory_space<vmem>>, %arg10: memref<64x32xf32, #tpu.memory_space<vmem>>, %arg11: memref<1x32xf32, #tpu.memory_space<vmem>>, %arg12: memref<1x32xf32, #tpu.memory_space<vmem>>, %arg13: memref<1x32xf32, #tpu.memory_space<vmem>>, %arg14: memref<8x2x32xf32, #tpu.memory_space<vmem>>) attributes {dimension_semantics = [#tpu.dimension_semantics<arbitrary>], iteration_bounds = array<i64: 1>, scalar_prefetch = 0 : i64, scratch_operands = 0 : i64, tpu.core_type = #tpu.core_type<tc>, window_params = [{pipeline_mode = #tpu.pipeline_mode<synchronous>, transform_indices = @transform_0, window_bounds = array<i64: 8, 2, 32>}, {pipeline_mode = #tpu.pipeline_mode<synchronous>, transform_indices = @transform_1, window_bounds = array<i64: 12, 32, 8>}, {pipeline_mode = #tpu.pipeline_mode<synchronous>, transform_indices = @transform_2, window_bounds = array<i64: 12, 1, 8>}, {pipeline_mode = #tpu.pipeline_mode<synchronous>, transform_indices = @transform_3, window_bounds = array<i64: 4, 8, 32>}, {pipeline_mode = #tpu.pipeline_mode<synchronous>, transform_indices = @transform_4, window_bounds = array<i64: 1, 32>}, {pipeline_mode = #tpu.pipeline_mode<synchronous>, transform_indices = @transform_5, window_bounds = array<i64: 1, 32>}, {pipeline_mode = #tpu.pipeline_mode<synchronous>, transform_indices = @transform_6, window_bounds = array<i64: 1, 32>}, {pipeline_mode = #tpu.pipeline_mode<synchronous>, transform_indices = @transform_7, window_bounds = array<i64: 32, 64>}, {pipeline_mode = #tpu.pipeline_mode<synchronous>, transform_indices = @transform_8, window_bounds = array<i64: 1, 64>}, {pipeline_mode = #tpu.pipeline_mode<synchronous>, transform_indices = @transform_9, window_bounds = array<i64: 64, 32>}, {pipeline_mode = #tpu.pipeline_mode<synchronous>, transform_indices = @transform_10, window_bounds = array<i64: 1, 32>}, {pipeline_mode = #tpu.pipeline_mode<synchronous>, transform_indices = @transform_11, window_bounds = array<i64: 1, 32>}, {pipeline_mode = #tpu.pipeline_mode<synchronous>, transform_indices = @transform_12, window_bounds = array<i64: 1, 32>}, {pipeline_mode = #tpu.pipeline_mode<synchronous>, transform_indices = @transform_13, window_bounds = array<i64: 8, 2, 32>}]} {
    %c0 = arith.constant 0 : index
    %c0_0 = arith.constant 0 : index
    %c0_1 = arith.constant 0 : index
    %0 = vector.load %arg2[%c0, %c0_0, %c0_1] : memref<12x32x8xf32, #tpu.memory_space<vmem>>, vector<12x32x8xf32>
    %c0_2 = arith.constant 0 : index
    %c0_3 = arith.constant 0 : index
    %c0_4 = arith.constant 0 : index
    %1 = vector.load %arg3[%c0_2, %c0_3, %c0_4] : memref<12x1x8xf32, #tpu.memory_space<vmem>>, vector<12x1x8xf32>
    %c0_5 = arith.constant 0 : index
    %c0_6 = arith.constant 0 : index
    %c0_7 = arith.constant 0 : index
    %2 = vector.load %arg4[%c0_5, %c0_6, %c0_7] : memref<4x8x32xf32, #tpu.memory_space<vmem>>, vector<4x8x32xf32>
    %c0_8 = arith.constant 0 : index
    %c0_9 = arith.constant 0 : index
    %3 = vector.load %arg5[%c0_8, %c0_9] : memref<1x32xf32, #tpu.memory_space<vmem>>, vector<1x32xf32>
    %c0_10 = arith.constant 0 : index
    %c0_11 = arith.constant 0 : index
    %4 = vector.load %arg6[%c0_10, %c0_11] : memref<1x32xf32, #tpu.memory_space<vmem>>, vector<1x32xf32>
    %c0_12 = arith.constant 0 : index
    %c0_13 = arith.constant 0 : index
    %5 = vector.load %arg7[%c0_12, %c0_13] : memref<1x32xf32, #tpu.memory_space<vmem>>, vector<1x32xf32>
    %c0_14 = arith.constant 0 : index
    %c0_15 = arith.constant 0 : index
    %6 = vector.load %arg8[%c0_14, %c0_15] : memref<32x64xf32, #tpu.memory_space<vmem>>, vector<32x64xf32>
    %c0_16 = arith.constant 0 : index
    %c0_17 = arith.constant 0 : index
    %7 = vector.load %arg9[%c0_16, %c0_17] : memref<1x64xf32, #tpu.memory_space<vmem>>, vector<1x64xf32>
    %c0_18 = arith.constant 0 : index
    %c0_19 = arith.constant 0 : index
    %8 = vector.load %arg10[%c0_18, %c0_19] : memref<64x32xf32, #tpu.memory_space<vmem>>, vector<64x32xf32>
    %c0_20 = arith.constant 0 : index
    %c0_21 = arith.constant 0 : index
    %9 = vector.load %arg11[%c0_20, %c0_21] : memref<1x32xf32, #tpu.memory_space<vmem>>, vector<1x32xf32>
    %c0_22 = arith.constant 0 : index
    %c0_23 = arith.constant 0 : index
    %10 = vector.load %arg12[%c0_22, %c0_23] : memref<1x32xf32, #tpu.memory_space<vmem>>, vector<1x32xf32>
    %c0_24 = arith.constant 0 : index
    %c0_25 = arith.constant 0 : index
    %11 = vector.load %arg13[%c0_24, %c0_25] : memref<1x32xf32, #tpu.memory_space<vmem>>, vector<1x32xf32>
    %c0_26 = arith.constant 0 : index
    %c0_27 = arith.constant 0 : index
    %c0_28 = arith.constant 0 : index
    %12 = vector.load %arg1[%c0_26, %c0_27, %c0_28] : memref<8x2x32xf32, #tpu.memory_space<vmem>>, vector<8x2x32xf32>
    %13 = vector.extract_strided_slice %12 {offsets = [0, 0, 0], sizes = [8, 1, 32], strides = [1, 1, 1]} : vector<8x2x32xf32> to vector<8x1x32xf32>
    %14 = vector.shape_cast %13 : vector<8x1x32xf32> to vector<8x32xf32>
    %15 = vector.shape_cast %14 : vector<8x32xf32> to vector<1x8x32xf32>
    %16 = vector.broadcast %15 : vector<1x8x32xf32> to vector<12x8x32xf32>
    "tpu.trace_start"() <{level = 10 : i32, message = "gne,ged->gnd"}> : () -> ()
    %cst = arith.constant dense<0.000000e+00> : vector<12x8x8xf32>
    %17 = tpu.matmul %16, %0, %cst {dimension_numbers = #tpu.dot_dimension_numbers<[2], [1], [1], [2], [0, 0, 0, 1, 1, 2], [0], [0]>} : vector<12x8x32xf32>, vector<12x32x8xf32>, vector<12x8x8xf32> -> vector<12x8x8xf32>
    "tpu.trace_stop"() : () -> ()
    %18 = vector.broadcast %1 : vector<12x1x8xf32> to vector<12x8x8xf32>
    %19 = arith.addf %17, %18 : vector<12x8x8xf32>
    %20 = vector.extract_strided_slice %19 {offsets = [0, 0, 0], sizes = [4, 8, 8], strides = [1, 1, 1]} : vector<12x8x8xf32> to vector<4x8x8xf32>
    %21 = vector.extract_strided_slice %19 {offsets = [4, 0, 0], sizes = [4, 8, 8], strides = [1, 1, 1]} : vector<12x8x8xf32> to vector<4x8x8xf32>
    %22 = vector.extract_strided_slice %19 {offsets = [8, 0, 0], sizes = [4, 8, 8], strides = [1, 1, 1]} : vector<12x8x8xf32> to vector<4x8x8xf32>
    "tpu.trace_start"() <{level = 10 : i32, message = "hnd,hmd->hnm"}> : () -> ()
    %cst_29 = arith.constant dense<0.000000e+00> : vector<4x8x8xf32>
    %23 = tpu.matmul %20, %21, %cst_29 {dimension_numbers = #tpu.dot_dimension_numbers<[2], [2], [1], [1], [0, 0, 0, 1, 1, 1], [0], [0]>} : vector<4x8x8xf32>, vector<4x8x8xf32>, vector<4x8x8xf32> -> vector<4x8x8xf32>
    "tpu.trace_stop"() : () -> ()
    %cst_30 = arith.constant dense<0xFF800000> : vector<4x8xf32>
    %24 = vector.multi_reduction <maximumf>, %23, %cst_30 [2] : vector<4x8x8xf32> to vector<4x8xf32>
    %25 = vector.shape_cast %24 : vector<4x8xf32> to vector<4x8x1xf32>
    %26 = vector.broadcast %25 : vector<4x8x1xf32> to vector<4x8x8xf32>
    %27 = arith.subf %23, %26 : vector<4x8x8xf32>
    %28 = math.exp %27 : vector<4x8x8xf32>
    %cst_31 = arith.constant dense<0.000000e+00> : vector<4x8xf32>
    %29 = vector.multi_reduction <add>, %28, %cst_31 [2] : vector<4x8x8xf32> to vector<4x8xf32>
    %30 = vector.shape_cast %29 : vector<4x8xf32> to vector<4x8x1xf32>
    %31 = tpu.reciprocal %30 {approx = true} : vector<4x8x1xf32> -> vector<4x8x1xf32>
    %32 = vector.broadcast %31 : vector<4x8x1xf32> to vector<4x8x8xf32>
    %33 = arith.mulf %28, %32 : vector<4x8x8xf32>
    "tpu.trace_start"() <{level = 10 : i32, message = "hnm,hmd->hnd"}> : () -> ()
    %cst_32 = arith.constant dense<0.000000e+00> : vector<4x8x8xf32>
    %34 = tpu.matmul %33, %22, %cst_32 {dimension_numbers = #tpu.dot_dimension_numbers<[2], [1], [1], [2], [0, 0, 0, 1, 1, 2], [0], [0]>} : vector<4x8x8xf32>, vector<4x8x8xf32>, vector<4x8x8xf32> -> vector<4x8x8xf32>
    "tpu.trace_stop"() : () -> ()
    "tpu.trace_start"() <{level = 10 : i32, message = "hnd,hde->hne"}> : () -> ()
    %cst_33 = arith.constant dense<0.000000e+00> : vector<4x8x32xf32>
    %35 = tpu.matmul %34, %2, %cst_33 {dimension_numbers = #tpu.dot_dimension_numbers<[2], [1], [1], [2], [0, 0, 0, 1, 1, 2], [0], [0]>} : vector<4x8x8xf32>, vector<4x8x32xf32>, vector<4x8x32xf32> -> vector<4x8x32xf32>
    "tpu.trace_stop"() : () -> ()
    %cst_34 = arith.constant dense<0.000000e+00> : vector<8x32xf32>
    %36 = vector.multi_reduction <add>, %35, %cst_34 [0] : vector<4x8x32xf32> to vector<8x32xf32>
    %37 = vector.broadcast %3 : vector<1x32xf32> to vector<8x32xf32>
    %38 = arith.addf %36, %37 : vector<8x32xf32>
    %39 = arith.addf %14, %38 : vector<8x32xf32>
    %cst_35 = arith.constant dense<0.000000e+00> : vector<8xf32>
    %40 = vector.multi_reduction <add>, %39, %cst_35 [1] : vector<8x32xf32> to vector<8xf32>
    %41 = vector.shape_cast %40 : vector<8xf32> to vector<8x1xf32>
    %cst_36 = arith.constant 3.200000e+01 : f32
    %42 = vector.broadcast %cst_36 : f32 to vector<8x1xf32>
    %43 = arith.divf %41, %42 : vector<8x1xf32>
    %44 = vector.broadcast %43 : vector<8x1xf32> to vector<8x32xf32>
    %45 = arith.subf %39, %44 : vector<8x32xf32>
    %46 = arith.mulf %45, %45 : vector<8x32xf32>
    %cst_37 = arith.constant dense<0.000000e+00> : vector<8xf32>
    %47 = vector.multi_reduction <add>, %46, %cst_37 [1] : vector<8x32xf32> to vector<8xf32>
    %48 = vector.shape_cast %47 : vector<8xf32> to vector<8x1xf32>
    %cst_38 = arith.constant 3.200000e+01 : f32
    %49 = vector.broadcast %cst_38 : f32 to vector<8x1xf32>
    %50 = arith.divf %48, %49 : vector<8x1xf32>
    %cst_39 = arith.constant 9.99999974E-6 : f32
    %51 = vector.broadcast %cst_39 : f32 to vector<8x1xf32>
    %52 = arith.addf %50, %51 : vector<8x1xf32>
    %53 = math.rsqrt %52 : vector<8x1xf32>
    %54 = vector.broadcast %53 : vector<8x1xf32> to vector<8x32xf32>
    %55 = arith.mulf %45, %54 : vector<8x32xf32>
    %56 = vector.broadcast %4 : vector<1x32xf32> to vector<8x32xf32>
    %57 = arith.mulf %55, %56 : vector<8x32xf32>
    %58 = vector.broadcast %5 : vector<1x32xf32> to vector<8x32xf32>
    %59 = arith.addf %57, %58 : vector<8x32xf32>
    %cst_40 = arith.constant dense<0.000000e+00> : vector<8x64xf32>
    %60 = tpu.matmul %59, %6, %cst_40 {dimension_numbers = #tpu.dot_dimension_numbers<[1], [0], [0], [1], [0, 0, 1, 1], [], []>} : vector<8x32xf32>, vector<32x64xf32>, vector<8x64xf32> -> vector<8x64xf32>
    %61 = vector.broadcast %7 : vector<1x64xf32> to vector<8x64xf32>
    %62 = arith.addf %60, %61 : vector<8x64xf32>
    %cst_41 = arith.constant 0.000000e+00 : f32
    %63 = vector.broadcast %cst_41 : f32 to vector<8x64xf32>
    %64 = arith.maximumf %62, %63 : vector<8x64xf32>
    %cst_42 = arith.constant dense<0.000000e+00> : vector<8x32xf32>
    %65 = tpu.matmul %64, %8, %cst_42 {dimension_numbers = #tpu.dot_dimension_numbers<[1], [0], [0], [1], [0, 0, 1, 1], [], []>} : vector<8x64xf32>, vector<64x32xf32>, vector<8x32xf32> -> vector<8x32xf32>
    %66 = vector.broadcast %9 : vector<1x32xf32> to vector<8x32xf32>
    %67 = arith.addf %65, %66 : vector<8x32xf32>
    %68 = arith.addf %59, %67 : vector<8x32xf32>
    %cst_43 = arith.constant dense<0.000000e+00> : vector<8xf32>
    %69 = vector.multi_reduction <add>, %68, %cst_43 [1] : vector<8x32xf32> to vector<8xf32>
    %70 = vector.shape_cast %69 : vector<8xf32> to vector<8x1xf32>
    %cst_44 = arith.constant 3.200000e+01 : f32
    %71 = vector.broadcast %cst_44 : f32 to vector<8x1xf32>
    %72 = arith.divf %70, %71 : vector<8x1xf32>
    %73 = vector.broadcast %72 : vector<8x1xf32> to vector<8x32xf32>
    %74 = arith.subf %68, %73 : vector<8x32xf32>
    %75 = arith.mulf %74, %74 : vector<8x32xf32>
    %cst_45 = arith.constant dense<0.000000e+00> : vector<8xf32>
    %76 = vector.multi_reduction <add>, %75, %cst_45 [1] : vector<8x32xf32> to vector<8xf32>
    %77 = vector.shape_cast %76 : vector<8xf32> to vector<8x1xf32>
    %cst_46 = arith.constant 3.200000e+01 : f32
    %78 = vector.broadcast %cst_46 : f32 to vector<8x1xf32>
    %79 = arith.divf %77, %78 : vector<8x1xf32>
    %cst_47 = arith.constant 9.99999974E-6 : f32
    %80 = vector.broadcast %cst_47 : f32 to vector<8x1xf32>
    %81 = arith.addf %79, %80 : vector<8x1xf32>
    %82 = math.rsqrt %81 : vector<8x1xf32>
    %83 = vector.broadcast %82 : vector<8x1xf32> to vector<8x32xf32>
    %84 = arith.mulf %74, %83 : vector<8x32xf32>
    %85 = vector.broadcast %10 : vector<1x32xf32> to vector<8x32xf32>
    %86 = arith.mulf %84, %85 : vector<8x32xf32>
    %87 = vector.broadcast %11 : vector<1x32xf32> to vector<8x32xf32>
    %88 = arith.addf %86, %87 : vector<8x32xf32>
    %89 = vector.shape_cast %88 : vector<8x32xf32> to vector<1x8x32xf32>
    %90 = vector.broadcast %89 : vector<1x8x32xf32> to vector<12x8x32xf32>
    "tpu.trace_start"() <{level = 10 : i32, message = "gne,ged->gnd"}> : () -> ()
    %cst_48 = arith.constant dense<0.000000e+00> : vector<12x8x8xf32>
    %91 = tpu.matmul %90, %0, %cst_48 {dimension_numbers = #tpu.dot_dimension_numbers<[2], [1], [1], [2], [0, 0, 0, 1, 1, 2], [0], [0]>} : vector<12x8x32xf32>, vector<12x32x8xf32>, vector<12x8x8xf32> -> vector<12x8x8xf32>
    "tpu.trace_stop"() : () -> ()
    %92 = vector.broadcast %1 : vector<12x1x8xf32> to vector<12x8x8xf32>
    %93 = arith.addf %91, %92 : vector<12x8x8xf32>
    %94 = vector.extract_strided_slice %93 {offsets = [0, 0, 0], sizes = [4, 8, 8], strides = [1, 1, 1]} : vector<12x8x8xf32> to vector<4x8x8xf32>
    %95 = vector.extract_strided_slice %93 {offsets = [4, 0, 0], sizes = [4, 8, 8], strides = [1, 1, 1]} : vector<12x8x8xf32> to vector<4x8x8xf32>
    %96 = vector.extract_strided_slice %93 {offsets = [8, 0, 0], sizes = [4, 8, 8], strides = [1, 1, 1]} : vector<12x8x8xf32> to vector<4x8x8xf32>
    "tpu.trace_start"() <{level = 10 : i32, message = "hnd,hmd->hnm"}> : () -> ()
    %cst_49 = arith.constant dense<0.000000e+00> : vector<4x8x8xf32>
    %97 = tpu.matmul %94, %95, %cst_49 {dimension_numbers = #tpu.dot_dimension_numbers<[2], [2], [1], [1], [0, 0, 0, 1, 1, 1], [0], [0]>} : vector<4x8x8xf32>, vector<4x8x8xf32>, vector<4x8x8xf32> -> vector<4x8x8xf32>
    "tpu.trace_stop"() : () -> ()
    %cst_50 = arith.constant dense<0xFF800000> : vector<4x8xf32>
    %98 = vector.multi_reduction <maximumf>, %97, %cst_50 [2] : vector<4x8x8xf32> to vector<4x8xf32>
    %99 = vector.shape_cast %98 : vector<4x8xf32> to vector<4x8x1xf32>
    %100 = vector.broadcast %99 : vector<4x8x1xf32> to vector<4x8x8xf32>
    %101 = arith.subf %97, %100 : vector<4x8x8xf32>
    %102 = math.exp %101 : vector<4x8x8xf32>
    %cst_51 = arith.constant dense<0.000000e+00> : vector<4x8xf32>
    %103 = vector.multi_reduction <add>, %102, %cst_51 [2] : vector<4x8x8xf32> to vector<4x8xf32>
    %104 = vector.shape_cast %103 : vector<4x8xf32> to vector<4x8x1xf32>
    %105 = tpu.reciprocal %104 {approx = true} : vector<4x8x1xf32> -> vector<4x8x1xf32>
    %106 = vector.broadcast %105 : vector<4x8x1xf32> to vector<4x8x8xf32>
    %107 = arith.mulf %102, %106 : vector<4x8x8xf32>
    "tpu.trace_start"() <{level = 10 : i32, message = "hnm,hmd->hnd"}> : () -> ()
    %cst_52 = arith.constant dense<0.000000e+00> : vector<4x8x8xf32>
    %108 = tpu.matmul %107, %96, %cst_52 {dimension_numbers = #tpu.dot_dimension_numbers<[2], [1], [1], [2], [0, 0, 0, 1, 1, 2], [0], [0]>} : vector<4x8x8xf32>, vector<4x8x8xf32>, vector<4x8x8xf32> -> vector<4x8x8xf32>
    "tpu.trace_stop"() : () -> ()
    "tpu.trace_start"() <{level = 10 : i32, message = "hnd,hde->hne"}> : () -> ()
    %cst_53 = arith.constant dense<0.000000e+00> : vector<4x8x32xf32>
    %109 = tpu.matmul %108, %2, %cst_53 {dimension_numbers = #tpu.dot_dimension_numbers<[2], [1], [1], [2], [0, 0, 0, 1, 1, 2], [0], [0]>} : vector<4x8x8xf32>, vector<4x8x32xf32>, vector<4x8x32xf32> -> vector<4x8x32xf32>
    "tpu.trace_stop"() : () -> ()
    %cst_54 = arith.constant dense<0.000000e+00> : vector<8x32xf32>
    %110 = vector.multi_reduction <add>, %109, %cst_54 [0] : vector<4x8x32xf32> to vector<8x32xf32>
    %111 = vector.broadcast %3 : vector<1x32xf32> to vector<8x32xf32>
    %112 = arith.addf %110, %111 : vector<8x32xf32>
    %113 = arith.addf %88, %112 : vector<8x32xf32>
    %cst_55 = arith.constant dense<0.000000e+00> : vector<8xf32>
    %114 = vector.multi_reduction <add>, %113, %cst_55 [1] : vector<8x32xf32> to vector<8xf32>
    %115 = vector.shape_cast %114 : vector<8xf32> to vector<8x1xf32>
    %cst_56 = arith.constant 3.200000e+01 : f32
    %116 = vector.broadcast %cst_56 : f32 to vector<8x1xf32>
    %117 = arith.divf %115, %116 : vector<8x1xf32>
    %118 = vector.broadcast %117 : vector<8x1xf32> to vector<8x32xf32>
    %119 = arith.subf %113, %118 : vector<8x32xf32>
    %120 = arith.mulf %119, %119 : vector<8x32xf32>
    %cst_57 = arith.constant dense<0.000000e+00> : vector<8xf32>
    %121 = vector.multi_reduction <add>, %120, %cst_57 [1] : vector<8x32xf32> to vector<8xf32>
    %122 = vector.shape_cast %121 : vector<8xf32> to vector<8x1xf32>
    %cst_58 = arith.constant 3.200000e+01 : f32
    %123 = vector.broadcast %cst_58 : f32 to vector<8x1xf32>
    %124 = arith.divf %122, %123 : vector<8x1xf32>
    %cst_59 = arith.constant 9.99999974E-6 : f32
    %125 = vector.broadcast %cst_59 : f32 to vector<8x1xf32>
    %126 = arith.addf %124, %125 : vector<8x1xf32>
    %127 = math.rsqrt %126 : vector<8x1xf32>
    %128 = vector.broadcast %127 : vector<8x1xf32> to vector<8x32xf32>
    %129 = arith.mulf %119, %128 : vector<8x32xf32>
    %130 = vector.broadcast %4 : vector<1x32xf32> to vector<8x32xf32>
    %131 = arith.mulf %129, %130 : vector<8x32xf32>
    %132 = vector.broadcast %5 : vector<1x32xf32> to vector<8x32xf32>
    %133 = arith.addf %131, %132 : vector<8x32xf32>
    %cst_60 = arith.constant dense<0.000000e+00> : vector<8x64xf32>
    %134 = tpu.matmul %133, %6, %cst_60 {dimension_numbers = #tpu.dot_dimension_numbers<[1], [0], [0], [1], [0, 0, 1, 1], [], []>} : vector<8x32xf32>, vector<32x64xf32>, vector<8x64xf32> -> vector<8x64xf32>
    %135 = vector.broadcast %7 : vector<1x64xf32> to vector<8x64xf32>
    %136 = arith.addf %134, %135 : vector<8x64xf32>
    %cst_61 = arith.constant 0.000000e+00 : f32
    %137 = vector.broadcast %cst_61 : f32 to vector<8x64xf32>
    %138 = arith.maximumf %136, %137 : vector<8x64xf32>
    %cst_62 = arith.constant dense<0.000000e+00> : vector<8x32xf32>
    %139 = tpu.matmul %138, %8, %cst_62 {dimension_numbers = #tpu.dot_dimension_numbers<[1], [0], [0], [1], [0, 0, 1, 1], [], []>} : vector<8x64xf32>, vector<64x32xf32>, vector<8x32xf32> -> vector<8x32xf32>
    %140 = vector.broadcast %9 : vector<1x32xf32> to vector<8x32xf32>
    %141 = arith.addf %139, %140 : vector<8x32xf32>
    %142 = arith.addf %133, %141 : vector<8x32xf32>
    %cst_63 = arith.constant dense<0.000000e+00> : vector<8xf32>
    %143 = vector.multi_reduction <add>, %142, %cst_63 [1] : vector<8x32xf32> to vector<8xf32>
    %144 = vector.shape_cast %143 : vector<8xf32> to vector<8x1xf32>
    %cst_64 = arith.constant 3.200000e+01 : f32
    %145 = vector.broadcast %cst_64 : f32 to vector<8x1xf32>
    %146 = arith.divf %144, %145 : vector<8x1xf32>
    %147 = vector.broadcast %146 : vector<8x1xf32> to vector<8x32xf32>
    %148 = arith.subf %142, %147 : vector<8x32xf32>
    %149 = arith.mulf %148, %148 : vector<8x32xf32>
    %cst_65 = arith.constant dense<0.000000e+00> : vector<8xf32>
    %150 = vector.multi_reduction <add>, %149, %cst_65 [1] : vector<8x32xf32> to vector<8xf32>
    %151 = vector.shape_cast %150 : vector<8xf32> to vector<8x1xf32>
    %cst_66 = arith.constant 3.200000e+01 : f32
    %152 = vector.broadcast %cst_66 : f32 to vector<8x1xf32>
    %153 = arith.divf %151, %152 : vector<8x1xf32>
    %cst_67 = arith.constant 9.99999974E-6 : f32
    %154 = vector.broadcast %cst_67 : f32 to vector<8x1xf32>
    %155 = arith.addf %153, %154 : vector<8x1xf32>
    %156 = math.rsqrt %155 : vector<8x1xf32>
    %157 = vector.broadcast %156 : vector<8x1xf32> to vector<8x32xf32>
    %158 = arith.mulf %148, %157 : vector<8x32xf32>
    %159 = vector.broadcast %10 : vector<1x32xf32> to vector<8x32xf32>
    %160 = arith.mulf %158, %159 : vector<8x32xf32>
    %161 = vector.broadcast %11 : vector<1x32xf32> to vector<8x32xf32>
    %162 = arith.addf %160, %161 : vector<8x32xf32>
    %163 = vector.extract_strided_slice %12 {offsets = [0, 1, 0], sizes = [8, 1, 32], strides = [1, 1, 1]} : vector<8x2x32xf32> to vector<8x1x32xf32>
    %164 = vector.shape_cast %163 : vector<8x1x32xf32> to vector<8x32xf32>
    %165 = vector.shape_cast %164 : vector<8x32xf32> to vector<1x8x32xf32>
    %166 = vector.broadcast %165 : vector<1x8x32xf32> to vector<12x8x32xf32>
    "tpu.trace_start"() <{level = 10 : i32, message = "gne,ged->gnd"}> : () -> ()
    %cst_68 = arith.constant dense<0.000000e+00> : vector<12x8x8xf32>
    %167 = tpu.matmul %166, %0, %cst_68 {dimension_numbers = #tpu.dot_dimension_numbers<[2], [1], [1], [2], [0, 0, 0, 1, 1, 2], [0], [0]>} : vector<12x8x32xf32>, vector<12x32x8xf32>, vector<12x8x8xf32> -> vector<12x8x8xf32>
    "tpu.trace_stop"() : () -> ()
    %168 = vector.broadcast %1 : vector<12x1x8xf32> to vector<12x8x8xf32>
    %169 = arith.addf %167, %168 : vector<12x8x8xf32>
    %170 = vector.extract_strided_slice %169 {offsets = [0, 0, 0], sizes = [4, 8, 8], strides = [1, 1, 1]} : vector<12x8x8xf32> to vector<4x8x8xf32>
    %171 = vector.extract_strided_slice %169 {offsets = [4, 0, 0], sizes = [4, 8, 8], strides = [1, 1, 1]} : vector<12x8x8xf32> to vector<4x8x8xf32>
    %172 = vector.extract_strided_slice %169 {offsets = [8, 0, 0], sizes = [4, 8, 8], strides = [1, 1, 1]} : vector<12x8x8xf32> to vector<4x8x8xf32>
    "tpu.trace_start"() <{level = 10 : i32, message = "hnd,hmd->hnm"}> : () -> ()
    %cst_69 = arith.constant dense<0.000000e+00> : vector<4x8x8xf32>
    %173 = tpu.matmul %170, %171, %cst_69 {dimension_numbers = #tpu.dot_dimension_numbers<[2], [2], [1], [1], [0, 0, 0, 1, 1, 1], [0], [0]>} : vector<4x8x8xf32>, vector<4x8x8xf32>, vector<4x8x8xf32> -> vector<4x8x8xf32>
    "tpu.trace_stop"() : () -> ()
    %cst_70 = arith.constant dense<0xFF800000> : vector<4x8xf32>
    %174 = vector.multi_reduction <maximumf>, %173, %cst_70 [2] : vector<4x8x8xf32> to vector<4x8xf32>
    %175 = vector.shape_cast %174 : vector<4x8xf32> to vector<4x8x1xf32>
    %176 = vector.broadcast %175 : vector<4x8x1xf32> to vector<4x8x8xf32>
    %177 = arith.subf %173, %176 : vector<4x8x8xf32>
    %178 = math.exp %177 : vector<4x8x8xf32>
    %cst_71 = arith.constant dense<0.000000e+00> : vector<4x8xf32>
    %179 = vector.multi_reduction <add>, %178, %cst_71 [2] : vector<4x8x8xf32> to vector<4x8xf32>
    %180 = vector.shape_cast %179 : vector<4x8xf32> to vector<4x8x1xf32>
    %181 = tpu.reciprocal %180 {approx = true} : vector<4x8x1xf32> -> vector<4x8x1xf32>
    %182 = vector.broadcast %181 : vector<4x8x1xf32> to vector<4x8x8xf32>
    %183 = arith.mulf %178, %182 : vector<4x8x8xf32>
    "tpu.trace_start"() <{level = 10 : i32, message = "hnm,hmd->hnd"}> : () -> ()
    %cst_72 = arith.constant dense<0.000000e+00> : vector<4x8x8xf32>
    %184 = tpu.matmul %183, %172, %cst_72 {dimension_numbers = #tpu.dot_dimension_numbers<[2], [1], [1], [2], [0, 0, 0, 1, 1, 2], [0], [0]>} : vector<4x8x8xf32>, vector<4x8x8xf32>, vector<4x8x8xf32> -> vector<4x8x8xf32>
    "tpu.trace_stop"() : () -> ()
    "tpu.trace_start"() <{level = 10 : i32, message = "hnd,hde->hne"}> : () -> ()
    %cst_73 = arith.constant dense<0.000000e+00> : vector<4x8x32xf32>
    %185 = tpu.matmul %184, %2, %cst_73 {dimension_numbers = #tpu.dot_dimension_numbers<[2], [1], [1], [2], [0, 0, 0, 1, 1, 2], [0], [0]>} : vector<4x8x8xf32>, vector<4x8x32xf32>, vector<4x8x32xf32> -> vector<4x8x32xf32>
    "tpu.trace_stop"() : () -> ()
    %cst_74 = arith.constant dense<0.000000e+00> : vector<8x32xf32>
    %186 = vector.multi_reduction <add>, %185, %cst_74 [0] : vector<4x8x32xf32> to vector<8x32xf32>
    %187 = vector.broadcast %3 : vector<1x32xf32> to vector<8x32xf32>
    %188 = arith.addf %186, %187 : vector<8x32xf32>
    %189 = arith.addf %164, %188 : vector<8x32xf32>
    %cst_75 = arith.constant dense<0.000000e+00> : vector<8xf32>
    %190 = vector.multi_reduction <add>, %189, %cst_75 [1] : vector<8x32xf32> to vector<8xf32>
    %191 = vector.shape_cast %190 : vector<8xf32> to vector<8x1xf32>
    %cst_76 = arith.constant 3.200000e+01 : f32
    %192 = vector.broadcast %cst_76 : f32 to vector<8x1xf32>
    %193 = arith.divf %191, %192 : vector<8x1xf32>
    %194 = vector.broadcast %193 : vector<8x1xf32> to vector<8x32xf32>
    %195 = arith.subf %189, %194 : vector<8x32xf32>
    %196 = arith.mulf %195, %195 : vector<8x32xf32>
    %cst_77 = arith.constant dense<0.000000e+00> : vector<8xf32>
    %197 = vector.multi_reduction <add>, %196, %cst_77 [1] : vector<8x32xf32> to vector<8xf32>
    %198 = vector.shape_cast %197 : vector<8xf32> to vector<8x1xf32>
    %cst_78 = arith.constant 3.200000e+01 : f32
    %199 = vector.broadcast %cst_78 : f32 to vector<8x1xf32>
    %200 = arith.divf %198, %199 : vector<8x1xf32>
    %cst_79 = arith.constant 9.99999974E-6 : f32
    %201 = vector.broadcast %cst_79 : f32 to vector<8x1xf32>
    %202 = arith.addf %200, %201 : vector<8x1xf32>
    %203 = math.rsqrt %202 : vector<8x1xf32>
    %204 = vector.broadcast %203 : vector<8x1xf32> to vector<8x32xf32>
    %205 = arith.mulf %195, %204 : vector<8x32xf32>
    %206 = vector.broadcast %4 : vector<1x32xf32> to vector<8x32xf32>
    %207 = arith.mulf %205, %206 : vector<8x32xf32>
    %208 = vector.broadcast %5 : vector<1x32xf32> to vector<8x32xf32>
    %209 = arith.addf %207, %208 : vector<8x32xf32>
    %cst_80 = arith.constant dense<0.000000e+00> : vector<8x64xf32>
    %210 = tpu.matmul %209, %6, %cst_80 {dimension_numbers = #tpu.dot_dimension_numbers<[1], [0], [0], [1], [0, 0, 1, 1], [], []>} : vector<8x32xf32>, vector<32x64xf32>, vector<8x64xf32> -> vector<8x64xf32>
    %211 = vector.broadcast %7 : vector<1x64xf32> to vector<8x64xf32>
    %212 = arith.addf %210, %211 : vector<8x64xf32>
    %cst_81 = arith.constant 0.000000e+00 : f32
    %213 = vector.broadcast %cst_81 : f32 to vector<8x64xf32>
    %214 = arith.maximumf %212, %213 : vector<8x64xf32>
    %cst_82 = arith.constant dense<0.000000e+00> : vector<8x32xf32>
    %215 = tpu.matmul %214, %8, %cst_82 {dimension_numbers = #tpu.dot_dimension_numbers<[1], [0], [0], [1], [0, 0, 1, 1], [], []>} : vector<8x64xf32>, vector<64x32xf32>, vector<8x32xf32> -> vector<8x32xf32>
    %216 = vector.broadcast %9 : vector<1x32xf32> to vector<8x32xf32>
    %217 = arith.addf %215, %216 : vector<8x32xf32>
    %218 = arith.addf %209, %217 : vector<8x32xf32>
    %cst_83 = arith.constant dense<0.000000e+00> : vector<8xf32>
    %219 = vector.multi_reduction <add>, %218, %cst_83 [1] : vector<8x32xf32> to vector<8xf32>
    %220 = vector.shape_cast %219 : vector<8xf32> to vector<8x1xf32>
    %cst_84 = arith.constant 3.200000e+01 : f32
    %221 = vector.broadcast %cst_84 : f32 to vector<8x1xf32>
    %222 = arith.divf %220, %221 : vector<8x1xf32>
    %223 = vector.broadcast %222 : vector<8x1xf32> to vector<8x32xf32>
    %224 = arith.subf %218, %223 : vector<8x32xf32>
    %225 = arith.mulf %224, %224 : vector<8x32xf32>
    %cst_85 = arith.constant dense<0.000000e+00> : vector<8xf32>
    %226 = vector.multi_reduction <add>, %225, %cst_85 [1] : vector<8x32xf32> to vector<8xf32>
    %227 = vector.shape_cast %226 : vector<8xf32> to vector<8x1xf32>
    %cst_86 = arith.constant 3.200000e+01 : f32
    %228 = vector.broadcast %cst_86 : f32 to vector<8x1xf32>
    %229 = arith.divf %227, %228 : vector<8x1xf32>
    %cst_87 = arith.constant 9.99999974E-6 : f32
    %230 = vector.broadcast %cst_87 : f32 to vector<8x1xf32>
    %231 = arith.addf %229, %230 : vector<8x1xf32>
    %232 = math.rsqrt %231 : vector<8x1xf32>
    %233 = vector.broadcast %232 : vector<8x1xf32> to vector<8x32xf32>
    %234 = arith.mulf %224, %233 : vector<8x32xf32>
    %235 = vector.broadcast %10 : vector<1x32xf32> to vector<8x32xf32>
    %236 = arith.mulf %234, %235 : vector<8x32xf32>
    %237 = vector.broadcast %11 : vector<1x32xf32> to vector<8x32xf32>
    %238 = arith.addf %236, %237 : vector<8x32xf32>
    %239 = vector.shape_cast %238 : vector<8x32xf32> to vector<1x8x32xf32>
    %240 = vector.broadcast %239 : vector<1x8x32xf32> to vector<12x8x32xf32>
    "tpu.trace_start"() <{level = 10 : i32, message = "gne,ged->gnd"}> : () -> ()
    %cst_88 = arith.constant dense<0.000000e+00> : vector<12x8x8xf32>
    %241 = tpu.matmul %240, %0, %cst_88 {dimension_numbers = #tpu.dot_dimension_numbers<[2], [1], [1], [2], [0, 0, 0, 1, 1, 2], [0], [0]>} : vector<12x8x32xf32>, vector<12x32x8xf32>, vector<12x8x8xf32> -> vector<12x8x8xf32>
    "tpu.trace_stop"() : () -> ()
    %242 = vector.broadcast %1 : vector<12x1x8xf32> to vector<12x8x8xf32>
    %243 = arith.addf %241, %242 : vector<12x8x8xf32>
    %244 = vector.extract_strided_slice %243 {offsets = [0, 0, 0], sizes = [4, 8, 8], strides = [1, 1, 1]} : vector<12x8x8xf32> to vector<4x8x8xf32>
    %245 = vector.extract_strided_slice %243 {offsets = [4, 0, 0], sizes = [4, 8, 8], strides = [1, 1, 1]} : vector<12x8x8xf32> to vector<4x8x8xf32>
    %246 = vector.extract_strided_slice %243 {offsets = [8, 0, 0], sizes = [4, 8, 8], strides = [1, 1, 1]} : vector<12x8x8xf32> to vector<4x8x8xf32>
    "tpu.trace_start"() <{level = 10 : i32, message = "hnd,hmd->hnm"}> : () -> ()
    %cst_89 = arith.constant dense<0.000000e+00> : vector<4x8x8xf32>
    %247 = tpu.matmul %244, %245, %cst_89 {dimension_numbers = #tpu.dot_dimension_numbers<[2], [2], [1], [1], [0, 0, 0, 1, 1, 1], [0], [0]>} : vector<4x8x8xf32>, vector<4x8x8xf32>, vector<4x8x8xf32> -> vector<4x8x8xf32>
    "tpu.trace_stop"() : () -> ()
    %cst_90 = arith.constant dense<0xFF800000> : vector<4x8xf32>
    %248 = vector.multi_reduction <maximumf>, %247, %cst_90 [2] : vector<4x8x8xf32> to vector<4x8xf32>
    %249 = vector.shape_cast %248 : vector<4x8xf32> to vector<4x8x1xf32>
    %250 = vector.broadcast %249 : vector<4x8x1xf32> to vector<4x8x8xf32>
    %251 = arith.subf %247, %250 : vector<4x8x8xf32>
    %252 = math.exp %251 : vector<4x8x8xf32>
    %cst_91 = arith.constant dense<0.000000e+00> : vector<4x8xf32>
    %253 = vector.multi_reduction <add>, %252, %cst_91 [2] : vector<4x8x8xf32> to vector<4x8xf32>
    %254 = vector.shape_cast %253 : vector<4x8xf32> to vector<4x8x1xf32>
    %255 = tpu.reciprocal %254 {approx = true} : vector<4x8x1xf32> -> vector<4x8x1xf32>
    %256 = vector.broadcast %255 : vector<4x8x1xf32> to vector<4x8x8xf32>
    %257 = arith.mulf %252, %256 : vector<4x8x8xf32>
    "tpu.trace_start"() <{level = 10 : i32, message = "hnm,hmd->hnd"}> : () -> ()
    %cst_92 = arith.constant dense<0.000000e+00> : vector<4x8x8xf32>
    %258 = tpu.matmul %257, %246, %cst_92 {dimension_numbers = #tpu.dot_dimension_numbers<[2], [1], [1], [2], [0, 0, 0, 1, 1, 2], [0], [0]>} : vector<4x8x8xf32>, vector<4x8x8xf32>, vector<4x8x8xf32> -> vector<4x8x8xf32>
    "tpu.trace_stop"() : () -> ()
    "tpu.trace_start"() <{level = 10 : i32, message = "hnd,hde->hne"}> : () -> ()
    %cst_93 = arith.constant dense<0.000000e+00> : vector<4x8x32xf32>
    %259 = tpu.matmul %258, %2, %cst_93 {dimension_numbers = #tpu.dot_dimension_numbers<[2], [1], [1], [2], [0, 0, 0, 1, 1, 2], [0], [0]>} : vector<4x8x8xf32>, vector<4x8x32xf32>, vector<4x8x32xf32> -> vector<4x8x32xf32>
    "tpu.trace_stop"() : () -> ()
    %cst_94 = arith.constant dense<0.000000e+00> : vector<8x32xf32>
    %260 = vector.multi_reduction <add>, %259, %cst_94 [0] : vector<4x8x32xf32> to vector<8x32xf32>
    %261 = vector.broadcast %3 : vector<1x32xf32> to vector<8x32xf32>
    %262 = arith.addf %260, %261 : vector<8x32xf32>
    %263 = arith.addf %238, %262 : vector<8x32xf32>
    %cst_95 = arith.constant dense<0.000000e+00> : vector<8xf32>
    %264 = vector.multi_reduction <add>, %263, %cst_95 [1] : vector<8x32xf32> to vector<8xf32>
    %265 = vector.shape_cast %264 : vector<8xf32> to vector<8x1xf32>
    %cst_96 = arith.constant 3.200000e+01 : f32
    %266 = vector.broadcast %cst_96 : f32 to vector<8x1xf32>
    %267 = arith.divf %265, %266 : vector<8x1xf32>
    %268 = vector.broadcast %267 : vector<8x1xf32> to vector<8x32xf32>
    %269 = arith.subf %263, %268 : vector<8x32xf32>
    %270 = arith.mulf %269, %269 : vector<8x32xf32>
    %cst_97 = arith.constant dense<0.000000e+00> : vector<8xf32>
    %271 = vector.multi_reduction <add>, %270, %cst_97 [1] : vector<8x32xf32> to vector<8xf32>
    %272 = vector.shape_cast %271 : vector<8xf32> to vector<8x1xf32>
    %cst_98 = arith.constant 3.200000e+01 : f32
    %273 = vector.broadcast %cst_98 : f32 to vector<8x1xf32>
    %274 = arith.divf %272, %273 : vector<8x1xf32>
    %cst_99 = arith.constant 9.99999974E-6 : f32
    %275 = vector.broadcast %cst_99 : f32 to vector<8x1xf32>
    %276 = arith.addf %274, %275 : vector<8x1xf32>
    %277 = math.rsqrt %276 : vector<8x1xf32>
    %278 = vector.broadcast %277 : vector<8x1xf32> to vector<8x32xf32>
    %279 = arith.mulf %269, %278 : vector<8x32xf32>
    %280 = vector.broadcast %4 : vector<1x32xf32> to vector<8x32xf32>
    %281 = arith.mulf %279, %280 : vector<8x32xf32>
    %282 = vector.broadcast %5 : vector<1x32xf32> to vector<8x32xf32>
    %283 = arith.addf %281, %282 : vector<8x32xf32>
    %cst_100 = arith.constant dense<0.000000e+00> : vector<8x64xf32>
    %284 = tpu.matmul %283, %6, %cst_100 {dimension_numbers = #tpu.dot_dimension_numbers<[1], [0], [0], [1], [0, 0, 1, 1], [], []>} : vector<8x32xf32>, vector<32x64xf32>, vector<8x64xf32> -> vector<8x64xf32>
    %285 = vector.broadcast %7 : vector<1x64xf32> to vector<8x64xf32>
    %286 = arith.addf %284, %285 : vector<8x64xf32>
    %cst_101 = arith.constant 0.000000e+00 : f32
    %287 = vector.broadcast %cst_101 : f32 to vector<8x64xf32>
    %288 = arith.maximumf %286, %287 : vector<8x64xf32>
    %cst_102 = arith.constant dense<0.000000e+00> : vector<8x32xf32>
    %289 = tpu.matmul %288, %8, %cst_102 {dimension_numbers = #tpu.dot_dimension_numbers<[1], [0], [0], [1], [0, 0, 1, 1], [], []>} : vector<8x64xf32>, vector<64x32xf32>, vector<8x32xf32> -> vector<8x32xf32>
    %290 = vector.broadcast %9 : vector<1x32xf32> to vector<8x32xf32>
    %291 = arith.addf %289, %290 : vector<8x32xf32>
    %292 = arith.addf %283, %291 : vector<8x32xf32>
    %cst_103 = arith.constant dense<0.000000e+00> : vector<8xf32>
    %293 = vector.multi_reduction <add>, %292, %cst_103 [1] : vector<8x32xf32> to vector<8xf32>
    %294 = vector.shape_cast %293 : vector<8xf32> to vector<8x1xf32>
    %cst_104 = arith.constant 3.200000e+01 : f32
    %295 = vector.broadcast %cst_104 : f32 to vector<8x1xf32>
    %296 = arith.divf %294, %295 : vector<8x1xf32>
    %297 = vector.broadcast %296 : vector<8x1xf32> to vector<8x32xf32>
    %298 = arith.subf %292, %297 : vector<8x32xf32>
    %299 = arith.mulf %298, %298 : vector<8x32xf32>
    %cst_105 = arith.constant dense<0.000000e+00> : vector<8xf32>
    %300 = vector.multi_reduction <add>, %299, %cst_105 [1] : vector<8x32xf32> to vector<8xf32>
    %301 = vector.shape_cast %300 : vector<8xf32> to vector<8x1xf32>
    %cst_106 = arith.constant 3.200000e+01 : f32
    %302 = vector.broadcast %cst_106 : f32 to vector<8x1xf32>
    %303 = arith.divf %301, %302 : vector<8x1xf32>
    %cst_107 = arith.constant 9.99999974E-6 : f32
    %304 = vector.broadcast %cst_107 : f32 to vector<8x1xf32>
    %305 = arith.addf %303, %304 : vector<8x1xf32>
    %306 = math.rsqrt %305 : vector<8x1xf32>
    %307 = vector.broadcast %306 : vector<8x1xf32> to vector<8x32xf32>
    %308 = arith.mulf %298, %307 : vector<8x32xf32>
    %309 = vector.broadcast %10 : vector<1x32xf32> to vector<8x32xf32>
    %310 = arith.mulf %308, %309 : vector<8x32xf32>
    %311 = vector.broadcast %11 : vector<1x32xf32> to vector<8x32xf32>
    %312 = arith.addf %310, %311 : vector<8x32xf32>
    %313 = vector.shape_cast %162 : vector<8x32xf32> to vector<8x1x32xf32>
    %314 = vector.shape_cast %312 : vector<8x32xf32> to vector<8x1x32xf32>
    %315 = tpu.concatenate %313, %314 in 1 : vector<8x1x32xf32>, vector<8x1x32xf32> -> vector<8x2x32xf32>
    %c0_108 = arith.constant 0 : index
    %c0_109 = arith.constant 0 : index
    %c0_110 = arith.constant 0 : index
    %316 = vector.load %arg14[%c0_108, %c0_109, %c0_110] : memref<8x2x32xf32, #tpu.memory_space<vmem>>, vector<8x2x32xf32>
    tpu.vector_store %arg14[%c0_108, %c0_109, %c0_110], %315 {strides = array<i32>} : memref<8x2x32xf32, #tpu.memory_space<vmem>>, vector<8x2x32xf32>,
    return
  }
  func.func @transform_0(%arg0: i32) -> (i32, i32, i32) {
    %c0_i32 = arith.constant 0 : i32
    %c0_i32_0 = arith.constant 0 : i32
    %c0_i32_1 = arith.constant 0 : i32
    %c0_i32_2 = arith.constant 0 : i32
    return %c0_i32, %c0_i32_0, %c0_i32_1 : i32, i32, i32
  }
  func.func @transform_1(%arg0: i32) -> (i32, i32, i32) {
    %c0_i32 = arith.constant 0 : i32
    %c0_i32_0 = arith.constant 0 : i32
    %c0_i32_1 = arith.constant 0 : i32
    %c0_i32_2 = arith.constant 0 : i32
    return %c0_i32, %c0_i32_0, %c0_i32_1 : i32, i32, i32
  }
  func.func @transform_2(%arg0: i32) -> (i32, i32, i32) {
    %c0_i32 = arith.constant 0 : i32
    %c0_i32_0 = arith.constant 0 : i32
    %c0_i32_1 = arith.constant 0 : i32
    %c0_i32_2 = arith.constant 0 : i32
    return %c0_i32, %c0_i32_0, %c0_i32_1 : i32, i32, i32
  }
  func.func @transform_3(%arg0: i32) -> (i32, i32, i32) {
    %c0_i32 = arith.constant 0 : i32
    %c0_i32_0 = arith.constant 0 : i32
    %c0_i32_1 = arith.constant 0 : i32
    %c0_i32_2 = arith.constant 0 : i32
    return %c0_i32, %c0_i32_0, %c0_i32_1 : i32, i32, i32
  }
  func.func @transform_4(%arg0: i32) -> (i32, i32) {
    %c0_i32 = arith.constant 0 : i32
    %c0_i32_0 = arith.constant 0 : i32
    %c0_i32_1 = arith.constant 0 : i32
    return %c0_i32, %c0_i32_0 : i32, i32
  }
  func.func @transform_5(%arg0: i32) -> (i32, i32) {
    %c0_i32 = arith.constant 0 : i32
    %c0_i32_0 = arith.constant 0 : i32
    %c0_i32_1 = arith.constant 0 : i32
    return %c0_i32, %c0_i32_0 : i32, i32
  }
  func.func @transform_6(%arg0: i32) -> (i32, i32) {
    %c0_i32 = arith.constant 0 : i32
    %c0_i32_0 = arith.constant 0 : i32
    %c0_i32_1 = arith.constant 0 : i32
    return %c0_i32, %c0_i32_0 : i32, i32
  }
  func.func @transform_7(%arg0: i32) -> (i32, i32) {
    %c0_i32 = arith.constant 0 : i32
    %c0_i32_0 = arith.constant 0 : i32
    %c0_i32_1 = arith.constant 0 : i32
    return %c0_i32, %c0_i32_0 : i32, i32
  }
  func.func @transform_8(%arg0: i32) -> (i32, i32) {
    %c0_i32 = arith.constant 0 : i32
    %c0_i32_0 = arith.constant 0 : i32
    %c0_i32_1 = arith.constant 0 : i32
    return %c0_i32, %c0_i32_0 : i32, i32
  }
  func.func @transform_9(%arg0: i32) -> (i32, i32) {
    %c0_i32 = arith.constant 0 : i32
    %c0_i32_0 = arith.constant 0 : i32
    %c0_i32_1 = arith.constant 0 : i32
    return %c0_i32, %c0_i32_0 : i32, i32
  }
  func.func @transform_10(%arg0: i32) -> (i32, i32) {
    %c0_i32 = arith.constant 0 : i32
    %c0_i32_0 = arith.constant 0 : i32
    %c0_i32_1 = arith.constant 0 : i32
    return %c0_i32, %c0_i32_0 : i32, i32
  }
  func.func @transform_11(%arg0: i32) -> (i32, i32) {
    %c0_i32 = arith.constant 0 : i32
    %c0_i32_0 = arith.constant 0 : i32
    %c0_i32_1 = arith.constant 0 : i32
    return %c0_i32, %c0_i32_0 : i32, i32
  }
  func.func @transform_12(%arg0: i32) -> (i32, i32) {
    %c0_i32 = arith.constant 0 : i32
    %c0_i32_0 = arith.constant 0 : i32
    %c0_i32_1 = arith.constant 0 : i32
    return %c0_i32, %c0_i32_0 : i32, i32
  }
  func.func @transform_13(%arg0: i32) -> (i32, i32, i32) {
    %c0_i32 = arith.constant 0 : i32
    %c0_i32_0 = arith.constant 0 : i32
    %c0_i32_1 = arith.constant 0 : i32
    %c0_i32_2 = arith.constant 0 : i32
    return %c0_i32, %c0_i32_0, %c0_i32_1 : i32, i32, i32
  }
}

</mosaic_0001>

<bundles_post_ra>
// kernel: tpu_custom_call.1
= control target key start
LH: loop header
LB: loop body
LE: loop exit
PB: predicated region body
PF: predicated region fallthrough
CT: control target
= control target key end

     0   :  { %vm181_vm0 = vcmask 1041409   ;;  %vm184_vm1 = vcmask 1042434   ;;  %vm187_vm2 = vcmask 1043459   ;;  %vm190_vm3 = vcmask 1044484   ;;  %s6891_s0 = inlined_call_operand.vmem [shape: f32[8,2,32], index: 0, kind: input, shape index: {}]   ;;  %s6892_s1 = inlined_call_operand.vmem [shape: f32[12,32,8], index: 1, kind: input, shape index: {}]   ;;  %s6893_s2 = inlined_call_operand.vmem [shape: f32[12,1,8], index: 2, kind: input, shape index: {}]   ;;  %s6894_s3 = inlined_call_operand.vmem [shape: f32[4,8,32], index: 3, kind: input, shape index: {}]   ;;  %s6895_s4 = inlined_call_operand.vmem [shape: f32[1,32], index: 4, kind: input, shape index: {}]   ;;  %s6896_s5 = inlined_call_operand.vmem [shape: f32[1,32], index: 5, kind: input, shape index: {}]   ;;  %s6897_s6 = inlined_call_operand.vmem [shape: f32[1,32], index: 6, kind: input, shape index: {}]   ;;  %s6898_s7 = inlined_call_operand.vmem [shape: f32[32,64], index: 7, kind: input, shape index: {}]   ;;  %s6899_s8 = inlined_call_operand.vmem [shape: f32[1,64], index: 8, kind: input, shape index: {}]   ;;  %s6900_s9 = inlined_call_operand.vmem [shape: f32[64,32], index: 9, kind: input, shape index: {}]   ;;  %s6901_s10 = inlined_call_operand.vmem [shape: f32[1,32], index: 10, kind: input, shape index: {}]   ;;  %s6902_s11 = inlined_call_operand.vmem [shape: f32[1,32], index: 11, kind: input, shape index: {}]   ;;  %s6903_s12 = inlined_call_operand.vmem [shape: f32[1,32], index: 12, kind: input, shape index: {}]   ;;  %s6904_s13 = inlined_call_operand.hbm [shape: f32[8,2,32], index: 13, kind: output, shape index: {}]  }
   0x1   :  { %v4754_v0 = vld [vmem:[%s6892_s1 + $0x18] sm:$0xff]  ;;  %v4771_v3 = vld [vmem:[%s6892_s1 + $0x10] sm:$0xff]  ;;  %v4787_v6 = vld [vmem:[%s6892_s1 + $0x8] sm:$0xff]  ;;  %vm193_vm4 = vcmask 1045509   ;;  %vm196_vm5 = vcmask 1046534   ;;  %vm199_vm6 = vcmask 1047559  }
   0x2   :  { %v4759_v1 = vld [vmem:[%s6892_s1 + $0x58] sm:$0xff]  ;;  %216 = vmatpush.msra.mxu0 %v4754_v0  ;;  %v4776_v4 = vld [vmem:[%s6892_s1 + $0x50] sm:$0xff]  ;;  %v4792_v7 = vld [vmem:[%s6892_s1 + $0x48] sm:$0xff]  ;;  %vm201_vm7 = vcmask 261120  }
   0x3   :  { %v4764_v2 = vld [vmem:[%s6892_s1 + $0xd8] sm:$0xff]  ;;  %256 = vmatpush.msra.mxu3 %v4759_v1  ;;  %v4781_v5 = vld [vmem:[%s6892_s1 + $0xd0] sm:$0xff]  ;;  %v4797_v8 = vld [vmem:[%s6892_s1 + $0xc8] sm:$0xff] }
   0x4   :  { %336 = vmatpush.msra.mxu2 %v4764_v2  ;;  %217 = vmatpush.msra.mxu0 %v4771_v3  ;;  %v4804_v9 = vld [vmem:[%s6892_s1] sm:$0xff]  ;;  %v4842_v16 = vld [vmem:[%s6891_s0 + $0x8] sm:$0x3]  ;;  %v4847_v17 = vld [vmem:[%s6891_s0 + $0xa] sm:$0x3] }
   0x5   :  { %257 = vmatpush.msra.mxu3 %v4776_v4  ;;  %v4809_v10 = vld [vmem:[%s6892_s1 + $0x40] sm:$0xff]  ;;  %v4853_v18 = vld [vmem:[%s6891_s0 + $0xc] sm:$0x3]  ;;  %v4862_v21 = vld [vmem:[%s6891_s0 + $0xe] sm:$0x3]  ;;  %v189_v23 = vrot.slane %v4842_v16, 4 }
   0x6   :  { %v4814_v11 = vld [vmem:[%s6892_s1 + $0xc0] sm:$0xff]  ;;  %337 = vmatpush.msra.mxu2 %v4781_v5  ;;  %218 = vmatpush.msra.mxu0 %v4787_v6  ;;  %v4869_v24 = vld [vmem:[%s6892_s1 + $0x38] sm:$0xff]  ;;  %v192_v27 = vrot.slane %v4847_v17, 3  ;;  %v4889_v29 = vld [vmem:[%s6892_s1 + $0x30] sm:$0xff]  ;;  %v195_v32 = vrot.slane %v4853_v18, 2  ;;  %v198_v36 = vrot.slane %v4862_v21, 1 }
   0x7   :  { %v4820_v12 = vld [vmem:[%s6891_s0] sm:$0x3]  ;;  %v4825_v13 = vld [vmem:[%s6891_s0 + $0x2] sm:$0x3]  ;;  %v4830_v14 = vld [vmem:[%s6891_s0 + $0x4] sm:$0x3]  ;;  %258 = vmatpush.msra.mxu3 %v4792_v7  ;;  %236 = vmatpush.msra.mxu1 %v4869_v24 }
   0x8   :  { %v4837_v15 = vld [vmem:[%s6891_s0 + $0x6] sm:$0x3]  ;;  %338 = vmatpush.msra.mxu2 %v4797_v8  ;;  %v180_v19 = vrot.slane %v4825_v13, 7  ;;  %v183_v20 = vrot.slane %v4830_v14, 6  ;;  %219 = vmatpush.msra.mxu0 %v4804_v9  ;;  %v4874_v25 = vld [vmem:[%s6892_s1 + $0x78] sm:$0xff]  ;;  %v4894_v30 = vld [vmem:[%s6892_s1 + $0x70] sm:$0xff] }
   0x9   :  { %259 = vmatpush.msra.mxu3 %v4809_v10  ;;  %v186_v22 = vrot.slane %v4837_v15, 5  ;;  %v4884_v28 = vld [vmem:[%s6892_s1 + $0x98] sm:$0xff]  ;;  %v4903_v33 = vld [vmem:[%s6892_s1 + $0x90] sm:$0xff]  ;;  %v4908_v34 = vld [vmem:[%s6892_s1 + $0x28] sm:$0xff]  ;;  %237 = vmatpush.msra.mxu1 %v4889_v29 }
   0xa   :  { %339 = vmatpush.msra.mxu2 %v4814_v11  ;;  %v182_v26 = vsel %vm181_vm0, %v180_v19, %v4820_v12  ;;  %296 = vmatpush.msrb.mxu0 %v4884_v28  ;;  %v4916_v37 = vld [vmem:[%s6892_s1 + $0x68] sm:$0xff]  ;;  %v4929_v40 = vld [vmem:[%s6892_s1 + $0x20] sm:$0xff]  ;;  %v4953_v46 = vld [vmem:[%s6892_s1 + $0xb8] sm:$0xff] }
   0xb   :  { %v185_v31 = vsel %vm184_vm1, %v183_v20, %v182_v26  ;;  %276 = vmatpush.msrb.mxu3 %v4874_v25  ;;  %v4921_v38 = vld [vmem:[%s6892_s1 + $0x88] sm:$0xff]  ;;  %238 = vmatpush.msra.mxu1 %v4908_v34  ;;  %v4939_v43 = vld [vmem:[%s6892_s1 + $0x60] sm:$0xff]  ;;  %v76_v47 = vld [vmem:[%s6892_s1 + $0xf8] sm:$0xff] }
   0xc   :  { %v188_v35 = vsel %vm187_vm2, %v186_v22, %v185_v31  ;;  %297 = vmatpush.msrb.mxu0 %v4903_v33  ;;  %v4944_v44 = vld [vmem:[%s6892_s1 + $0x80] sm:$0xff]  ;;  %v4961_v48 = vld [vmem:[%s6892_s1 + $0x158] sm:$0xff]  ;;  %v4970_v49 = vld [vmem:[%s6892_s1 + $0xb0] sm:$0xff] }
   0xd   :  { %v191_v39 = vsel %vm190_vm3, %v189_v23, %v188_v35  ;;  %277 = vmatpush.msrb.mxu3 %v4894_v30  ;;  %239 = vmatpush.msra.mxu1 %v4929_v40  ;;  %v75_v50 = vld [vmem:[%s6892_s1 + $0xf0] sm:$0xff]  ;;  %v80_v51 = vld [vmem:[%s6892_s1 + $0x118] sm:$0xff]  ;;  %v4992_v53 = vld [vmem:[%s6892_s1 + $0xa8] sm:$0xff] }
   0xe   :  { %v194_v41 = vsel %vm193_vm4, %v192_v27, %v191_v39  ;;  %298 = vmatpush.msrb.mxu0 %v4921_v38  ;;  %v4984_v52 = vld [vmem:[%s6892_s1 + $0x150] sm:$0xff]  ;;  %v74_v54 = vld [vmem:[%s6892_s1 + $0xe8] sm:$0xff]  ;;  %v5001_v55 = vld [vmem:[%s6892_s1 + $0xa0] sm:$0xff]  ;;  %416 = vmatpush.msrb.mxu2 %v4961_v48 }
   0xf   :  { %v197_v42 = vsel %vm196_vm5, %v195_v32, %v194_v41  ;;  %278 = vmatpush.msrb.mxu3 %v4916_v37  ;;  %316 = vmatpush.msrb.mxu1 %v4953_v46  ;;  %v73_v56 = vld [vmem:[%s6892_s1 + $0xe0] sm:$0xff] }
  0x10   :  { %v4947_v45 = vsel %vm199_vm6, %v198_v36, %v197_v42  ;;  %299 = vmatpush.msrb.mxu0 %v4944_v44  ;;  %417 = vmatpush.msrb.mxu2 %v4984_v52 }
  0x11   :  { %4300 = vmatmul.msk.f32.vlgmr.msra.gmra.mxu0 %vm201_vm7, %v4947_v45  ;;  %4302 = vmatmul.msk.f32.vlgmr.msra.gmra.mxu3 %vm201_vm7, %v4947_v45 }
  0x12   :  { %4306 = vmatmul.msk.f32.vlgmr.msra.gmra.mxu2 %vm201_vm7, %v4947_v45  ;;  %279 = vmatpush.msrb.mxu3 %v4939_v43 }
  0x13   :  { %4301 = vmatmul.msk.f32.vlgmr.msra.gmra.mxu1 %vm201_vm7, %v4947_v45  ;;  %376 = vmatpush.msra.mxu0 %v80_v51 }
  0x14   :  { %356 = vmatpush.msra.mxu3 %v76_v47  ;;  %317 = vmatpush.msrb.mxu1 %v4970_v49 }
  0x16   :  { %357 = vmatpush.msra.mxu3 %v75_v50 }
  0x17   :  { %18 = vsyncpa [#allocation3], 0  ;;  %318 = vmatpush.msrb.mxu1 %v4992_v53  ;;  %v79_v57 = vld [vmem:[%s6892_s1 + $0x110] sm:$0xff]  ;;  %v5025_v58 = vld [vmem:[%s6892_s1 + $0x148] sm:$0xff]  ;;  %vm6932_vm8 = vcmask 64512   ;;  %vm1013_vm13 = vcmask 523264  }
  0x18   :  { %358 = vmatpush.msra.mxu3 %v74_v54  ;;  %v78_v59 = vld [vmem:[%s6892_s1 + $0x108] sm:$0xff]  ;;  %377 = vmatpush.msra.mxu0 %v79_v57  ;;  %v5034_v60 = vld [vmem:[%s6892_s1 + $0x140] sm:$0xff]  ;;  %v5047_v62 = vld [vmem:[%s6892_s1 + $0x138] sm:$0xff]  ;;  %s4288_s30 = sshll.u32 %s6904_s13, 4  ;;  %s4679_s13 = smov 32   ;;  %s4289_s30 = int_to_ptr.hbm [resolvable:$true] %s4288_s30 }
  0x19   :  { %4303 = vmatmul.msk.f32.vlgmr.msrb.gmra.mxu3 %vm201_vm7, %v4947_v45  ;;  %4304 = vmatmul.msk.f32.vlgmr.msrb.gmra.mxu0 %vm201_vm7, %v4947_v45  ;;  %v77_v61 = vld [vmem:[%s6892_s1 + $0x100] sm:$0xff]  ;;  %v5053_v63 = vld [vmem:[%s6892_s1 + $0x130] sm:$0xff]  ;;  %v5059_v19 = vld [vmem:[%s6892_s1 + $0x128] sm:$0xff]  ;;  %s4680_s14 = smov 2  }
  0x1a   :  { %319 = vmatpush.msrb.mxu1 %v5001_v55  ;;  %359 = vmatpush.msra.mxu3 %v73_v56  ;;  %v5065_v20 = vld [vmem:[%s6892_s1 + $0x120] sm:$0xff]  ;;  %v5070_v22 = vld [vmem:[%s6892_s1 + $0x178] sm:$0xff]  ;;  %v5079_v23 = vld [vmem:[%s6892_s1 + $0x170] sm:$0xff] }
  0x1b   :  { %4305 = vmatmul.msk.f32.vlgmr.msrb.gmra.mxu1 %vm201_vm7, %v4947_v45  ;;  %418 = vmatpush.msrb.mxu2 %v5025_v58  ;;  %v5084_v26 = vld [vmem:[%s6892_s1 + $0x168] sm:$0xff]  ;;  %v5090_v27 = vld [vmem:[%s6892_s1 + $0x160] sm:$0xff] }
  0x1c   :  { %378 = vmatpush.msra.mxu0 %v78_v59  ;;  %396 = vmatpush.msra.mxu1 %v5047_v62  ;;  %6934 = vst [vmem:[#allocation5_spill] sm:$0xff] %v5084_v26  ;;  %v5099_v35 = vld [vmem:[%s6893_s2 + $0x6] ss:$0 sm:$0xff]  ;;  %v4428_v36 = vld [vmem:[%s6893_s2 + $0x4] ss:$0 sm:$0xff] }
  0x1d   :  { %419 = vmatpush.msrb.mxu2 %v5034_v60  ;;  %436 = vmatpush.msrb.mxu3 %v5070_v22  ;;  %6935 = vst [vmem:[#allocation6_spill] sm:$0xff] %v5090_v27  ;;  %v4424_v39 = vld [vmem:[%s6893_s2] ss:$0 sm:$0xff]  ;;  %v5110_v42 = vld [vmem:[%s6893_s2 + $0x2] ss:$0 sm:$0xff] }
  0x1e   :  { %4310 = vmatmul.msk.f32.vlgmr.msrb.gmra.mxu2 %vm201_vm7, %v4947_v45  ;;  %379 = vmatpush.msra.mxu0 %v77_v61  ;;  %6936 = vst [vmem:[#allocation7_spill] sm:$0xff] %v5099_v35  ;;  %v5115_v47 = vld [vmem:[%s6893_s2 + $0x5] ss:$0 sm:$0xff]  ;;  %v5121_v51 = vld [vmem:[%s6893_s2 + $0x1] ss:$0 sm:$0xff] }
  0x1f   :  { %397 = vmatpush.msra.mxu1 %v5053_v63  ;;  %437 = vmatpush.msrb.mxu3 %v5079_v23  ;;  %6937 = vst [vmem:[#allocation8_spill] sm:$0xff] %v5110_v42 }
  0x20   :  { %6938 = vst [vmem:[#allocation9_spill] sm:$0xff] %v5115_v47 }
  0x21   :  { %4307 = vmatmul.msk.f32.vlgmr.msra.gmra.mxu3 %vm201_vm7, %v4947_v45  ;;  %4308 = vmatmul.msk.f32.vlgmr.msra.gmra.mxu0 %vm201_vm7, %v4947_v45  ;;  %6939 = vst [vmem:[#allocation10_spill] sm:$0xff] %v5121_v51 }
  0x22   :  { %398 = vmatpush.msra.mxu1 %v5059_v19  ;;  %438 = vmatpush.msrb.mxu3 %v5084_v26 }
  0x24   :  { %399 = vmatpush.msra.mxu1 %v5065_v20  ;;  %439 = vmatpush.msrb.mxu3 %v5090_v27 }
  0x25   :  { %4309 = vmatmul.msk.f32.vlgmr.msra.gmra.mxu1 %vm201_vm7, %v4947_v45 }
  0x29   :  { %4311 = vmatmul.msk.f32.vlgmr.msrb.gmra.mxu3 %vm201_vm7, %v4947_v45 }
  0x8e   :  { %v221_v31 = vpop.f32.mrf.mxu0 }
  0x8f   :  { %v222_v57 = vadd.f32 %v4424_v39, %v221_v31  ;;  %v5135_v31 = vld [vmem:[%s6893_s2 + $0x7] ss:$0 sm:$0xff] }
  0x90   :  { %v241_v32 = vpop.f32.mrf.mxu1  ;;  %6940 = vst [vmem:[#allocation11_spill] sm:$0xff] %v5135_v31 }
  0x91   :  { %v242_v26 = vadd.f32 %v5121_v51, %v241_v32 }
  0x94   :  { %v261_v41 = vpop.f32.mrf.mxu3 }
  0x95   :  { %v341_v45 = vpop.f32.mrf.mxu2  ;;  %v262_v61 = vadd.f32 %v5110_v42, %v261_v41 }
  0x96   :  { %v342_v50 = vadd.f32 %v5099_v35, %v341_v45  ;;  %v301_v54 = vpop.f32.mrf.mxu0 }
  0x97   :  { %v302_v56 = vadd.f32 %v4428_v36, %v301_v54  ;;  %v4429_v36 = vld [vmem:[%s6893_s2 + $0x3] ss:$0 sm:$0xff]  ;;  %v5152_v54 = vld [vmem:[%s6893_s2 + $0xa] ss:$0 sm:$0xff] }
  0x98   :  { %4316 = vmatpush.xpose.msk.msra.mxu2 %vm6932_vm8, %v342_v50  ;;  %v321_v59 = vpop.f32.mrf.mxu1  ;;  %6942 = vst [vmem:[#allocation13_spill] sm:$0xff] %v5152_v54 }
  0x99   :  { %4312 = vmatpush.xpose.msk.msrb.mxu0 %vm6932_vm8, %v302_v56  ;;  %v322_v27 = vadd.f32 %v5115_v47, %v321_v59  ;;  %v5158_v59 = vld [vmem:[%s6893_s2 + $0x9] ss:$0 sm:$0xff] }
  0x9a   :  { %6943 = vst [vmem:[#allocation14_spill] sm:$0xff] %v5158_v59 }
  0x9b   :  { %4317 = vmatmul.msk.f32.vlgmr.msra.gmra.mxu2 %vm6932_vm8, %v262_v61  ;;  %4314 = vmatpush.xpose.msk.msrb.mxu1 %vm6932_vm8, %v322_v27 }
  0x9c   :  { %v281_v45 = vpop.f32.mrf.mxu3  ;;  %4313 = vmatmul.msk.f32.vlgmr.msrb.gmra.mxu0 %vm6932_vm8, %v222_v57 }
  0x9d   :  { %v282_v27 = vadd.f32 %v4429_v36, %v281_v45  ;;  %v5164_v36 = vld [vmem:[%s6893_s2 + $0xb] ss:$0 sm:$0xff] }
  0x9e   :  { %4315 = vmatmul.msk.f32.vlgmr.msrb.gmra.mxu1 %vm6932_vm8, %v242_v26  ;;  %v5146_v26 = vld [vmem:[%s6893_s2 + $0x8] ss:$0 sm:$0xff]  ;;  %v381_v41 = vpop.f32.mrf.mxu0  ;;  %6944 = vst [vmem:[#allocation15_spill] sm:$0xff] %v5164_v36 }
  0x9f   :  { %6941 = vst [vmem:[#allocation12_spill] sm:$0xff] %v5146_v26  ;;  %v382_v50 = vadd.f32 %v5146_v26, %v381_v41 }
  0xa1   :  { %611 = vmatpush.msra.mxu0 %v382_v50  ;;  %v421_v56 = vpop.f32.mrf.mxu2 }
  0xa2   :  { %v422_v57 = vadd.f32 %v5152_v54, %v421_v56  ;;  %v401_v61 = vpop.f32.mrf.mxu1 }
  0xa3   :  { %v402_v45 = vadd.f32 %v5158_v59, %v401_v61 }
  0xa4   :  { %v361_v39 = vpop.f32.mrf.mxu3  ;;  %657 = vmatpush.msrb.mxu2 %v422_v57 }
  0xa5   :  { %v362_v32 = vadd.f32 %v5135_v31, %v361_v39  ;;  %634 = vmatpush.msra.mxu1 %v402_v45 }
  0xa7   :  { %4318 = vmatpush.xpose.msk.msra.mxu3 %vm6932_vm8, %v362_v32 }
  0xaa   :  { %4319 = vmatmul.msk.f32.vlgmr.msra.gmra.mxu3 %vm6932_vm8, %v282_v27 }
  0xac   :  { %v441_v39 = vpop.f32.mrf.mxu3 }
  0xad   :  { %v442_v32 = vadd.f32 %v5164_v36, %v441_v39 }
  0xaf   :  { %680 = vmatpush.msrb.mxu3 %v442_v32 }
 0x119   :  { %v468_v27 = vpop.f32.mrf.mxu0 }
 0x11a   :  { %v549_v41 = vsel %vm6932_vm8, %v468_v27, -inf }
 0x11b   :  { %550 = vmax.xlane.f32.xlu1 %v549_v41  ;;  %v494_v50 = vpop.f32.mrf.mxu1 }
 0x11c   :  { %v552_v61 = vsel %vm6932_vm8, %v494_v50, -inf }
 0x11e   :  { %v520_v56 = vpop.f32.mrf.mxu2 }
 0x11f   :  { %v555_v57 = vsel %vm6932_vm8, %v520_v56, -inf }
 0x120   :  { %556 = vmax.xlane.f32.xlu0 %v555_v57 }
 0x123   :  { %553 = vmax.xlane.f32.xlu1 %v552_v61 }
 0x12d   :  { %v546_v45 = vpop.f32.mrf.mxu3 }
 0x12e   :  { %v558_v26 = vsel %vm6932_vm8, %v546_v45, -inf }
 0x12f   :  { %559 = vmax.xlane.f32.xlu0 %v558_v26 }
 0x18e   :  { %v551_v31 = vpop.xlane.xlu1 %550 }
 0x18f   :  { %v561_v59 = vsub.f32 %v468_v27, %v551_v31 }
 0x191   :  { %v565_v39 = vmul.f32 1.442695, %v561_v59 }
 0x193   :  { %4443 = vpow2.f32 %v565_v39  ;;  %v557_v32 = vpop.xlane.xlu0 %556 }
 0x194   :  { %v563_v36 = vsub.f32 %v520_v56, %v557_v32 }
 0x196   :  { %v569_v51 = vmul.f32 1.442695, %v563_v36  ;;  %v554_v41 = vpop.xlane.xlu1 %553 }
 0x197   :  { %v562_v54 = vsub.f32 %v494_v50, %v554_v41 }
 0x198   :  { %4445 = vpow2.f32 %v569_v51 }
 0x199   :  { %v4444_v47 = vpop.eup %4443  ;;  %v567_v42 = vmul.f32 1.442695, %v562_v54 }
 0x19a   :  { %v573_v57 = vsel %vm6932_vm8, %v4444_v47, 0.0 }
 0x19b   :  { %4447 = vpow2.f32 %v567_v42  ;;  %574 = vadd.xlane.f32.xlu0 %v573_v57 }
 0x19e   :  { %v4446_v61 = vpop.eup %4445 }
 0x19f   :  { %v579_v35 = vsel %vm6932_vm8, %v4446_v61, 0.0 }
 0x1a0   :  { %580 = vadd.xlane.f32.xlu2 %v579_v35 }
 0x1a1   :  { %v4448_v26 = vpop.eup %4447 }
 0x1a2   :  { %v560_v31 = vpop.xlane.xlu0 %559  ;;  %v576_v59 = vsel %vm6932_vm8, %v4448_v26, 0.0 }
 0x1a3   :  { %v564_v27 = vsub.f32 %v546_v45, %v560_v31  ;;  %577 = vadd.xlane.f32.xlu1 %v576_v59 }
 0x1a5   :  { %v571_v36 = vmul.f32 1.442695, %v564_v27 }
 0x1a7   :  { %4449 = vpow2.f32 %v571_v36  ;;  %v5200_v36 = vld [vmem:[%s6894_s3 + $0x18] sm:$0xff] }
 0x1a8   :  { %772 = vmatpush.msra.mxu3 %v5200_v36 }
 0x1ad   :  { %v4450_v50 = vpop.eup %4449 }
 0x1ae   :  { %v582_v51 = vsel %vm6932_vm8, %v4450_v50, 0.0 }
 0x1af   :  { %583 = vadd.xlane.f32.xlu2 %v582_v51 }
 0x20e   :  { %v575_v54 = vpop.xlane.xlu0 %574 }
 0x20f   :  { %4451 = vrcp.f32 %v575_v54 }
 0x213   :  { %v581_v42 = vpop.xlane.xlu2 %580 }
 0x214   :  { %4453 = vrcp.f32 %v581_v42 }
 0x215   :  { %v4452_v56 = vpop.eup %4451 }
 0x216   :  { %v589_v39 = vmul.f32 %v4452_v56, %v4444_v47  ;;  %v578_v32 = vpop.xlane.xlu1 %577  ;;  %v5182_v47 = vld [vmem:[%s6894_s3] sm:$0xff] }
 0x217   :  { %4455 = vrcp.f32 %v578_v32  ;;  %703 = vmatpush.msrb.mxu0 %v5182_v47 }
 0x218   :  { %4320 = vmatmul.msk.f32.vlgmr.msra.gmra.mxu0 %vm6932_vm8, %v589_v39 }
 0x21a   :  { %v4454_v35 = vpop.eup %4453 }
 0x21b   :  { %v591_v41 = vmul.f32 %v4454_v35, %v4446_v61  ;;  %v5188_v61 = vld [vmem:[%s6894_s3 + $0x8] sm:$0xff] }
 0x21c   :  { %726 = vmatpush.msrb.mxu1 %v5188_v61 }
 0x21d   :  { %v4456_v45 = vpop.eup %4455  ;;  %4322 = vmatmul.msk.f32.vlgmr.msrb.gmra.mxu2 %vm6932_vm8, %v591_v41 }
 0x21e   :  { %v590_v57 = vmul.f32 %v4456_v45, %v4448_v26  ;;  %v5194_v26 = vld [vmem:[%s6894_s3 + $0x10] sm:$0xff] }
 0x21f   :  { %749 = vmatpush.msra.mxu2 %v5194_v26 }
 0x220   :  { %4321 = vmatmul.msk.f32.vlgmr.msra.gmra.mxu1 %vm6932_vm8, %v590_v57 }
 0x221   :  { %1240 = vmatpush.msrb.mxu2 %v4754_v0 }
 0x222   :  { %v584_v31 = vpop.xlane.xlu2 %583 }
 0x223   :  { %4457 = vrcp.f32 %v584_v31  ;;  %1241 = vmatpush.msrb.mxu2 %v4771_v3 }
 0x225   :  { %1242 = vmatpush.msrb.mxu2 %v4787_v6 }
 0x227   :  { %1243 = vmatpush.msrb.mxu2 %v4804_v9 }
 0x229   :  { %v4458_v59 = vpop.eup %4457 }
 0x22a   :  { %v592_v27 = vmul.f32 %v4458_v59, %v4450_v50 }
 0x22c   :  { %4323 = vmatmul.msk.f32.vlgmr.msrb.gmra.mxu3 %vm6932_vm8, %v592_v27 }
 0x22d   :  { %1260 = vmatpush.msrb.mxu3 %v4869_v24 }
 0x22f   :  { %1261 = vmatpush.msrb.mxu3 %v4889_v29 }
 0x231   :  { %1262 = vmatpush.msrb.mxu3 %v4908_v34 }
 0x233   :  { %1263 = vmatpush.msrb.mxu3 %v4929_v40 }
 0x295   :  { %v613_v50 = vpop.f32.mrf.mxu0 }
 0x296   :  { %4324 = vmatmul.msk.f32.vlgmr.msrb.gmra.mxu0 %vm6932_vm8, %v613_v50 }
 0x29d   :  { %v636_v0 = vpop.f32.mrf.mxu1 }
 0x29e   :  { %4325 = vmatmul.msk.f32.vlgmr.msrb.gmra.mxu1 %vm6932_vm8, %v636_v0 }
 0x2a0   :  { %v659_v51 = vpop.f32.mrf.mxu2 }
 0x2a1   :  { %4326 = vmatmul.msk.f32.vlgmr.msra.gmra.mxu2 %vm6932_vm8, %v659_v51 }
 0x2a2   :  { %1300 = vmatpush.msra.mxu2 %v4874_v25 }
 0x2a4   :  { %1301 = vmatpush.msra.mxu2 %v4894_v30 }
 0x2a6   :  { %1302 = vmatpush.msra.mxu2 %v4916_v37 }
 0x2a8   :  { %1303 = vmatpush.msra.mxu2 %v4939_v43 }
 0x2af   :  { %v682_v3 = vpop.f32.mrf.mxu3 }
 0x2b0   :  { %4327 = vmatmul.msk.f32.vlgmr.msra.gmra.mxu3 %vm6932_vm8, %v682_v3 }
 0x2b1   :  { %1320 = vmatpush.msra.mxu3 %v4884_v28  ;;  %v4436_v28 = vld [vmem:[%s6895_s4] ss:$0 sm:$0xff] }
 0x2b3   :  { %1321 = vmatpush.msra.mxu3 %v4903_v33 }
 0x2b5   :  { %1322 = vmatpush.msra.mxu3 %v4921_v38 }
 0x2b7   :  { %1323 = vmatpush.msra.mxu3 %v4944_v44 }
 0x313   :  { %v705_v9 = vpop.f32.mrf.mxu0 }
 0x314   :  { %v777_v29 = vsel %vm201_vm7, %v705_v9, 0.0 }
 0x31b   :  { %v728_v6 = vpop.f32.mrf.mxu1 }
 0x31c   :  { %v778_v25 = vsel %vm201_vm7, %v728_v6, 0.0 }
 0x31d   :  { %v779_v34 = vadd.f32 %v778_v25, %v777_v29 }
 0x324   :  { %v751_v24 = vpop.f32.mrf.mxu2 }
 0x325   :  { %v780_v30 = vsel %vm201_vm7, %v751_v24, 0.0 }
 0x326   :  { %v781_v37 = vadd.f32 %v780_v30, %v779_v34  ;;  %v4677_v30 = vmov 32.0  }
 0x327   :  { %4459 = vrcp.f32 %v4677_v30 }
 0x32d   :  { %v4460_v34 = vpop.eup %4459 }
 0x32e   :  { %vm843_vm9 = vweird.f32 %v4460_v34 }
 0x333   :  { %v774_v40 = vpop.f32.mrf.mxu3 }
 0x334   :  { %v782_v33 = vsel %vm201_vm7, %v774_v40, 0.0 }
 0x335   :  { %v783_v38 = vadd.f32 %v782_v33, %v781_v37  ;;  %v839_v37 = vmul.f32 32.0, %v4460_v34 }
 0x337   :  { %v787_v43 = vadd.f32 %v4436_v28, %v783_v38  ;;  %v840_v40 = vsub.f32 1.0, %v839_v37 }
 0x339   :  { %v789_v44 = vrot.slane %v787_v43, 1  ;;  %v790_v54 = vrot.slane %v787_v43, 2  ;;  %v791_v42 = vrot.slane %v787_v43, 3  ;;  %v792_v56 = vrot.slane %v787_v43, 4 }
 0x33a   :  { %v793_v39 = vrot.slane %v787_v43, 5  ;;  %v794_v32 = vrot.slane %v787_v43, 6  ;;  %v795_v35 = vrot.slane %v787_v43, 7  ;;  %v804_v59 = vadd.f32 %v787_v43, %v4820_v12 }
 0x33b   :  { %v805_v41 = vadd.f32 %v789_v44, %v4825_v13  ;;  %v806_v45 = vadd.f32 %v790_v54, %v4830_v14  ;;  %v807_v57 = vadd.f32 %v791_v42, %v4837_v15  ;;  %v808_v31 = vadd.f32 %v792_v56, %v4842_v16 }
 0x33c   :  { %v809_v27 = vadd.f32 %v793_v39, %v4847_v17  ;;  %v810_v51 = vadd.f32 %v794_v32, %v4853_v18  ;;  %v811_v3 = vadd.f32 %v795_v35, %v4862_v21  ;;  %v841_v28 = vmul.f32 %v4460_v34, %v840_v40 }
 0x33d   :  { %v820_v50 = vrot.slane %v805_v41, 7  ;;  %v822_v0 = vrot.slane %v806_v45, 6  ;;  %v824_v9 = vrot.slane %v807_v57, 5  ;;  %v826_v14 = vrot.slane %v808_v31, 4 }
 0x33e   :  { %v828_v24 = vrot.slane %v809_v27, 3  ;;  %v830_v12 = vrot.slane %v810_v51, 2  ;;  %v832_v25 = vrot.slane %v811_v3, 1  ;;  %v842_v33 = vadd.f32 %v4460_v34, %v841_v28 }
 0x33f   :  { %v821_v6 = vsel %vm181_vm0, %v820_v50, %v804_v59 }
 0x340   :  { %v823_v13 = vsel %vm184_vm1, %v822_v0, %v821_v6  ;;  %v5246_v38 = vsel %vm843_vm9, %v4460_v34, %v842_v33 }
 0x341   :  { %v825_v15 = vsel %vm187_vm2, %v824_v9, %v823_v13 }
 0x342   :  { %v827_v16 = vsel %vm190_vm3, %v826_v14, %v825_v15 }
 0x343   :  { %v829_v17 = vsel %vm193_vm4, %v828_v24, %v827_v16 }
 0x344   :  { %v831_v29 = vsel %vm196_vm5, %v830_v12, %v829_v17 }
 0x345   :  { %v833_v18 = vsel %vm199_vm6, %v832_v25, %v831_v29 }
 0x346   :  { %v835_v21 = vsel %vm201_vm7, %v833_v18, 0.0 }
 0x347   :  { %836 = vadd.xlane.f32.xlu2 %v835_v21 }
 0x3ba   :  { %v837_v43 = vpop.xlane.xlu2 %836 }
 0x3bb   :  { %v845_v44 = vmul.f32 %v5246_v38, %v837_v43 }
 0x3bd   :  { %v847_v54 = vrot.slane %v845_v44, 1  ;;  %v848_v42 = vrot.slane %v845_v44, 2  ;;  %v849_v56 = vrot.slane %v845_v44, 3  ;;  %v850_v39 = vrot.slane %v845_v44, 4 }
 0x3be   :  { %v851_v32 = vrot.slane %v845_v44, 5  ;;  %v852_v35 = vrot.slane %v845_v44, 6  ;;  %v853_v50 = vrot.slane %v845_v44, 7  ;;  %v5249_v0 = vsub.f32 %v804_v59, %v845_v44 }
 0x3bf   :  { %v5251_v6 = vsub.f32 %v805_v41, %v847_v54  ;;  %v5253_v9 = vsub.f32 %v806_v45, %v848_v42  ;;  %v5255_v13 = vsub.f32 %v807_v57, %v849_v56  ;;  %v5257_v14 = vsub.f32 %v808_v31, %v850_v39  ;;  %v5292_v42 = vld [vmem:[%s6898_s7 + $0x18] sm:$0xff]  ;;  %v5297_v56 = vld [vmem:[%s6898_s7 + $0x10] sm:$0xff]  ;;  %v5303_v39 = vld [vmem:[%s6898_s7 + $0x8] sm:$0xff] }
 0x3c0   :  { %v5259_v15 = vsub.f32 %v809_v27, %v851_v32  ;;  %v5261_v24 = vsub.f32 %v810_v51, %v852_v35  ;;  %v5263_v16 = vsub.f32 %v811_v3, %v853_v50  ;;  %v870_v57 = vmul.f32 %v5249_v0, %v5249_v0  ;;  %1001 = vmatpush.msra.mxu0 %v5292_v42  ;;  %v5309_v32 = vld [vmem:[%s6898_s7] sm:$0xff] }
 0x3c1   :  { %v871_v12 = vmul.f32 %v5251_v6, %v5251_v6  ;;  %v872_v59 = vmul.f32 %v5253_v9, %v5253_v9  ;;  %v873_v41 = vmul.f32 %v5255_v13, %v5255_v13  ;;  %v874_v45 = vmul.f32 %v5257_v14, %v5257_v14 }
 0x3c2   :  { %v875_v31 = vmul.f32 %v5259_v15, %v5259_v15  ;;  %v876_v3 = vmul.f32 %v5261_v24, %v5261_v24  ;;  %v877_v17 = vmul.f32 %v5263_v16, %v5263_v16  ;;  %1002 = vmatpush.msra.mxu0 %v5297_v56 }
 0x3c3   :  { %v886_v27 = vrot.slane %v871_v12, 7  ;;  %v888_v51 = vrot.slane %v872_v59, 6  ;;  %v890_v29 = vrot.slane %v873_v41, 5  ;;  %v892_v21 = vrot.slane %v874_v45, 4  ;;  %v5321_v59 = vld [vmem:[%s6900_s9 + $0x38] sm:$0xff]  ;;  %v5326_v41 = vld [vmem:[%s6900_s9 + $0x30] sm:$0xff] }
 0x3c4   :  { %v894_v34 = vrot.slane %v875_v31, 3  ;;  %v896_v40 = vrot.slane %v876_v3, 2  ;;  %v898_v33 = vrot.slane %v877_v17, 1  ;;  %1003 = vmatpush.msra.mxu0 %v5303_v39  ;;  %1025 = vmatpush.msra.mxu1 %v5321_v59  ;;  %v4437_v17 = vld [vmem:[%s6896_s5] ss:$0 sm:$0xff] }
 0x3c5   :  { %v887_v25 = vsel %vm181_vm0, %v886_v27, %v870_v57  ;;  %v5344_v57 = vld [vmem:[%s6900_s9 + $0x18] sm:$0xff] }
 0x3c6   :  { %v889_v18 = vsel %vm184_vm1, %v888_v51, %v887_v25  ;;  %1004 = vmatpush.msra.mxu0 %v5309_v32  ;;  %1026 = vmatpush.msra.mxu1 %v5326_v41 }
 0x3c7   :  { %v891_v30 = vsel %vm187_vm2, %v890_v29, %v889_v18 }
 0x3c8   :  { %v893_v37 = vsel %vm190_vm3, %v892_v21, %v891_v30  ;;  %1280 = vmatpush.msrb.mxu0 %v4759_v1  ;;  %v5332_v1 = vld [vmem:[%s6900_s9 + $0x28] sm:$0xff] }
 0x3c9   :  { %v895_v28 = vsel %vm193_vm4, %v894_v34, %v893_v37  ;;  %1027 = vmatpush.msra.mxu1 %v5332_v1 }
 0x3ca   :  { %v897_v43 = vsel %vm196_vm5, %v896_v40, %v895_v28  ;;  %1281 = vmatpush.msrb.mxu0 %v4776_v4 }
 0x3cb   :  { %v899_v44 = vsel %vm199_vm6, %v898_v33, %v897_v43 }
 0x3cc   :  { %v901_v54 = vsel %vm201_vm7, %v899_v44, 0.0  ;;  %1282 = vmatpush.msrb.mxu0 %v4792_v7 }
 0x3cd   :  { %902 = vadd.xlane.f32.xlu0 %v901_v54 }
 0x3ce   :  { %1283 = vmatpush.msrb.mxu0 %v4809_v10  ;;  %v5338_v10 = vld [vmem:[%s6900_s9 + $0x20] sm:$0xff] }
 0x3cf   :  { %1028 = vmatpush.msra.mxu1 %v5338_v10 }
 0x3d1   :  { %1029 = vmatpush.msra.mxu1 %v5344_v57 }
 0x440   :  { %v903_v35 = vpop.xlane.xlu0 %902 }
 0x441   :  { %v904_v50 = vmul.f32 %v903_v35, %v5246_v38 }
 0x443   :  { %v905_v12 = vadd.f32 1e-05, %v904_v50 }
 0x445   :  { %4461 = vrsqrt.f32 %v905_v12  ;;  %vm912_vm11 = vweird.f32 %v905_v12 }
 0x44b   :  { %v4462_v4 = vpop.eup %4461 }
 0x44c   :  { %v907_v7 = vmul.f32 %v4462_v4, %v905_v12  ;;  %vm913_vm10 = vweird.f32 %v4462_v4 }
 0x44d   :  { %vm914_vm12 = vmor %vm912_vm11, %vm913_vm10 }
 0x44e   :  { %v908_v45 = vmul.f32 %v4462_v4, %v907_v7 }
 0x450   :  { %v909_v31 = vmul.f32 0.5, %v908_v45 }
 0x452   :  { %v910_v27 = vsub.f32 1.5, %v909_v31 }
 0x454   :  { %v911_v51 = vmul.f32 %v4462_v4, %v910_v27 }
 0x456   :  { %v915_v3 = vsel %vm914_vm12, %v4462_v4, %v911_v51 }
 0x457   :  { %v917_v25 = vrot.slane %v915_v3, 1  ;;  %v918_v29 = vrot.slane %v915_v3, 2  ;;  %v919_v18 = vrot.slane %v915_v3, 3  ;;  %v920_v21 = vrot.slane %v915_v3, 4 }
 0x458   :  { %v932_v30 = vmul.f32 %v915_v3, %v5249_v0  ;;  %v921_v34 = vrot.slane %v915_v3, 5  ;;  %v922_v37 = vrot.slane %v915_v3, 6  ;;  %v923_v40 = vrot.slane %v915_v3, 7 }
 0x459   :  { %v933_v28 = vmul.f32 %v917_v25, %v5251_v6  ;;  %v934_v33 = vmul.f32 %v918_v29, %v5253_v9  ;;  %v935_v43 = vmul.f32 %v919_v18, %v5255_v13  ;;  %v936_v44 = vmul.f32 %v920_v21, %v5257_v14  ;;  %v4438_v6 = vld [vmem:[%s6897_s6] ss:$0 sm:$0xff] }
 0x45a   :  { %v937_v54 = vmul.f32 %v921_v34, %v5259_v15  ;;  %v938_v35 = vmul.f32 %v922_v37, %v5261_v24  ;;  %v939_v50 = vmul.f32 %v923_v40, %v5263_v16  ;;  %v943_v12 = vmul.f32 %v4437_v17, %v932_v30 }
 0x45b   :  { %v944_v4 = vmul.f32 %v4437_v17, %v933_v28  ;;  %v945_v0 = vmul.f32 %v4437_v17, %v934_v33  ;;  %v946_v7 = vmul.f32 %v4437_v17, %v935_v43  ;;  %v947_v45 = vmul.f32 %v4437_v17, %v936_v44 }
 0x45c   :  { %v948_v9 = vmul.f32 %v4437_v17, %v937_v54  ;;  %v949_v31 = vmul.f32 %v4437_v17, %v938_v35  ;;  %v950_v13 = vmul.f32 %v4437_v17, %v939_v50  ;;  %v954_v3 = vadd.f32 %v4438_v6, %v943_v12  ;;  %v5377_v50 = vld [vmem:[%s6900_s9 + $0x10] sm:$0xff]  ;;  %v5383_v12 = vld [vmem:[%s6900_s9 + $0x8] sm:$0xff] }
 0x45d   :  { %v955_v27 = vadd.f32 %v4438_v6, %v944_v4  ;;  %v956_v14 = vadd.f32 %v4438_v6, %v945_v0  ;;  %v957_v51 = vadd.f32 %v4438_v6, %v946_v7  ;;  %v958_v15 = vadd.f32 %v4438_v6, %v947_v45  ;;  %1030 = vmatpush.msra.mxu1 %v5377_v50 }
 0x45e   :  { %v959_v24 = vadd.f32 %v4438_v6, %v948_v9  ;;  %v960_v29 = vadd.f32 %v4438_v6, %v949_v31  ;;  %v961_v18 = vadd.f32 %v4438_v6, %v950_v13 }
 0x45f   :  { %v973_v25 = vrot.slane %v955_v27, 7  ;;  %v975_v16 = vrot.slane %v956_v14, 6  ;;  %v977_v30 = vrot.slane %v957_v51, 5  ;;  %v979_v37 = vrot.slane %v958_v15, 4  ;;  %1031 = vmatpush.msra.mxu1 %v5383_v12 }
 0x460   :  { %v981_v28 = vrot.slane %v959_v24, 3  ;;  %v983_v33 = vrot.slane %v960_v29, 2  ;;  %v985_v44 = vrot.slane %v961_v18, 1 }
 0x461   :  { %v974_v21 = vsel %vm181_vm0, %v973_v25, %v954_v3 }
 0x462   :  { %v976_v34 = vsel %vm184_vm1, %v975_v16, %v974_v21 }
 0x463   :  { %v978_v40 = vsel %vm187_vm2, %v977_v30, %v976_v34 }
 0x464   :  { %v980_v17 = vsel %vm190_vm3, %v979_v37, %v978_v40 }
 0x465   :  { %v982_v43 = vsel %vm193_vm4, %v981_v28, %v980_v17 }
 0x466   :  { %v984_v54 = vsel %vm196_vm5, %v983_v33, %v982_v43 }
 0x467   :  { %v986_v35 = vsel %vm199_vm6, %v985_v44, %v984_v54 }
 0x468   :  { %4328 = vmatmul.msk.f32.vlgmr.msra.gmra.mxu0 %vm201_vm7, %v986_v35 }
 0x469   :  { %1340 = vmatpush.msra.mxu0 %v4953_v46  ;;  %v5389_v46 = vld [vmem:[%s6900_s9] sm:$0xff] }
 0x46a   :  { %1032 = vmatpush.msra.mxu1 %v5389_v46 }
 0x46b   :  { %1341 = vmatpush.msra.mxu0 %v4970_v49  ;;  %v4439_v49 = vld [vmem:[%s6899_s8] ss:$0 sm:$0xff] }
 0x46c   :  { %1360 = vmatpush.msrb.mxu1 %v4764_v2  ;;  %v4440_v2 = vld [vmem:[%s6901_s10] ss:$0 sm:$0xff] }
 0x46d   :  { %1342 = vmatpush.msra.mxu0 %v4992_v53 }
 0x46e   :  { %1361 = vmatpush.msrb.mxu1 %v4781_v5 }
 0x46f   :  { %1343 = vmatpush.msra.mxu0 %v5001_v55 }
 0x470   :  { %1362 = vmatpush.msrb.mxu1 %v4797_v8 }
 0x472   :  { %1363 = vmatpush.msrb.mxu1 %v4814_v11 }
 0x4e5   :  { %v1006_v53 = vpop.f32.mrf.mxu0 }
 0x4e6   :  { %v1007_v55 = vadd.f32 %v4439_v49, %v1006_v53 }
 0x4e8   :  { %v1009_v4 = vmax.f32 %v1007_v55, 0.0 }
 0x4ea   :  { %4329 = vmatmul.msk.f32.vlgmr.msra.gmra.mxu1 %vm1013_vm13, %v1009_v4 }
 0x4eb   :  { %1440 = vmatpush.msra.mxu1 %v4961_v48 }
 0x4ed   :  { %1441 = vmatpush.msra.mxu1 %v4984_v52 }
 0x4ef   :  { %1442 = vmatpush.msra.mxu1 %v5025_v58 }
 0x4f1   :  { %1443 = vmatpush.msra.mxu1 %v5034_v60 }
 0x567   :  { %v1034_v5 = vpop.f32.mrf.mxu1 }
 0x568   :  { %v1035_v8 = vadd.f32 %v4440_v2, %v1034_v5 }
 0x56a   :  { %v1038_v11 = vrot.slane %v1035_v8, 1  ;;  %v1039_v0 = vrot.slane %v1035_v8, 2  ;;  %v1040_v7 = vrot.slane %v1035_v8, 3  ;;  %v1041_v45 = vrot.slane %v1035_v8, 4 }
 0x56b   :  { %v1042_v6 = vrot.slane %v1035_v8, 5  ;;  %v1043_v9 = vrot.slane %v1035_v8, 6  ;;  %v1044_v31 = vrot.slane %v1035_v8, 7  ;;  %v1053_v58 = vadd.f32 %v1035_v8, %v954_v3 }
 0x56c   :  { %v1054_v48 = vadd.f32 %v1038_v11, %v955_v27  ;;  %v1055_v13 = vadd.f32 %v1039_v0, %v956_v14  ;;  %v1056_v52 = vadd.f32 %v1040_v7, %v957_v51  ;;  %v1057_v25 = vadd.f32 %v1041_v45, %v958_v15 }
 0x56d   :  { %v1058_v16 = vadd.f32 %v1042_v6, %v959_v24  ;;  %v1059_v30 = vadd.f32 %v1043_v9, %v960_v29  ;;  %v1060_v34 = vadd.f32 %v1044_v31, %v961_v18 }
 0x56e   :  { %v1069_v60 = vrot.slane %v1054_v48, 7  ;;  %v1071_v21 = vrot.slane %v1055_v13, 6  ;;  %v1073_v40 = vrot.slane %v1056_v52, 5  ;;  %v1075_v17 = vrot.slane %v1057_v25, 4 }
 0x56f   :  { %v1077_v43 = vrot.slane %v1058_v16, 3  ;;  %v1079_v14 = vrot.slane %v1059_v30, 2  ;;  %v1081_v15 = vrot.slane %v1060_v34, 1 }
 0x570   :  { %v1070_v37 = vsel %vm181_vm0, %v1069_v60, %v1053_v58 }
 0x571   :  { %v1072_v28 = vsel %vm184_vm1, %v1071_v21, %v1070_v37 }
 0x572   :  { %v1074_v33 = vsel %vm187_vm2, %v1073_v40, %v1072_v28 }
 0x573   :  { %v1076_v27 = vsel %vm190_vm3, %v1075_v17, %v1074_v33 }
 0x574   :  { %v1078_v51 = vsel %vm193_vm4, %v1077_v43, %v1076_v27 }
 0x575   :  { %v1080_v3 = vsel %vm196_vm5, %v1079_v14, %v1078_v51 }
 0x576   :  { %v1082_v24 = vsel %vm199_vm6, %v1081_v15, %v1080_v3 }
 0x577   :  { %v1084_v29 = vsel %vm201_vm7, %v1082_v24, 0.0 }
 0x578   :  { %1085 = vadd.xlane.f32.xlu1 %v1084_v29 }
 0x5eb   :  { %v1086_v18 = vpop.xlane.xlu1 %1085 }
 0x5ec   :  { %v1087_v44 = vmul.f32 %v1086_v18, %v5246_v38 }
 0x5ee   :  { %v1089_v54 = vrot.slane %v1087_v44, 1  ;;  %v1090_v35 = vrot.slane %v1087_v44, 2  ;;  %v1091_v49 = vrot.slane %v1087_v44, 3  ;;  %v1092_v53 = vrot.slane %v1087_v44, 4 }
 0x5ef   :  { %v1093_v55 = vrot.slane %v1087_v44, 5  ;;  %v1094_v4 = vrot.slane %v1087_v44, 6  ;;  %v1095_v2 = vrot.slane %v1087_v44, 7  ;;  %v1104_v5 = vsub.f32 %v1053_v58, %v1087_v44 }
 0x5f0   :  { %v1105_v8 = vsub.f32 %v1054_v48, %v1089_v54  ;;  %v1106_v11 = vsub.f32 %v1055_v13, %v1090_v35  ;;  %v1107_v0 = vsub.f32 %v1056_v52, %v1091_v49  ;;  %v1108_v7 = vsub.f32 %v1057_v25, %v1092_v53 }
 0x5f1   :  { %v1109_v45 = vsub.f32 %v1058_v16, %v1093_v55  ;;  %v1110_v6 = vsub.f32 %v1059_v30, %v1094_v4  ;;  %v1111_v9 = vsub.f32 %v1060_v34, %v1095_v2  ;;  %v1112_v40 = vmul.f32 %v1104_v5, %v1104_v5  ;;  %v4441_v2 = vld [vmem:[%s6902_s11] ss:$0 sm:$0xff] }
 0x5f2   :  { %v1113_v31 = vmul.f32 %v1105_v8, %v1105_v8  ;;  %v1114_v60 = vmul.f32 %v1106_v11, %v1106_v11  ;;  %v1115_v21 = vmul.f32 %v1107_v0, %v1107_v0  ;;  %v1116_v37 = vmul.f32 %v1108_v7, %v1108_v7 }
 0x5f3   :  { %v1117_v28 = vmul.f32 %v1109_v45, %v1109_v45  ;;  %v1118_v43 = vmul.f32 %v1110_v6, %v1110_v6  ;;  %v1119_v27 = vmul.f32 %v1111_v9, %v1111_v9 }
 0x5f4   :  { %v1128_v17 = vrot.slane %v1113_v31, 7  ;;  %v1130_v33 = vrot.slane %v1114_v60, 6  ;;  %v1132_v58 = vrot.slane %v1115_v21, 5  ;;  %v1134_v13 = vrot.slane %v1116_v37, 4 }
 0x5f5   :  { %v1136_v25 = vrot.slane %v1117_v28, 3  ;;  %v1138_v30 = vrot.slane %v1118_v43, 2  ;;  %v1140_v51 = vrot.slane %v1119_v27, 1 }
 0x5f6   :  { %v1129_v14 = vsel %vm181_vm0, %v1128_v17, %v1112_v40 }
 0x5f7   :  { %v1131_v48 = vsel %vm184_vm1, %v1130_v33, %v1129_v14 }
 0x5f8   :  { %v1133_v52 = vsel %vm187_vm2, %v1132_v58, %v1131_v48 }
 0x5f9   :  { %v1135_v16 = vsel %vm190_vm3, %v1134_v13, %v1133_v52 }
 0x5fa   :  { %v1137_v34 = vsel %vm193_vm4, %v1136_v25, %v1135_v16 }
 0x5fb   :  { %v1139_v15 = vsel %vm196_vm5, %v1138_v30, %v1137_v34  ;;  %v4442_v30 = vld [vmem:[%s6903_s12] ss:$0 sm:$0xff] }
 0x5fc   :  { %v1141_v3 = vsel %vm199_vm6, %v1140_v51, %v1139_v15 }
 0x5fd   :  { %v1143_v24 = vsel %vm201_vm7, %v1141_v3, 0.0 }
 0x5fe   :  { %1144 = vadd.xlane.f32.xlu2 %v1143_v24 }
 0x671   :  { %v1145_v29 = vpop.xlane.xlu2 %1144 }
 0x672   :  { %v1146_v18 = vmul.f32 %v1145_v29, %v5246_v38 }
 0x674   :  { %v1147_v44 = vadd.f32 1e-05, %v1146_v18 }
 0x676   :  { %4463 = vrsqrt.f32 %v1147_v44  ;;  %vm1154_vm15 = vweird.f32 %v1147_v44 }
 0x67c   :  { %v4464_v54 = vpop.eup %4463 }
 0x67d   :  { %v1149_v35 = vmul.f32 %v4464_v54, %v1147_v44  ;;  %vm1155_vm14 = vweird.f32 %v4464_v54 }
 0x67e   :  { %vm1156_vm9 = vmor %vm1154_vm15, %vm1155_vm14  ;;  %vm2845_vm14 = vcmask 253952   ;;  %vm6933_vm15 = vcmask 261121  }
 0x67f   :  { %v1150_v49 = vmul.f32 %v4464_v54, %v1149_v35 }
 0x681   :  { %v1151_v53 = vmul.f32 0.5, %v1150_v49 }
 0x683   :  { %v1152_v55 = vsub.f32 1.5, %v1151_v53 }
 0x685   :  { %v1153_v4 = vmul.f32 %v4464_v54, %v1152_v55 }
 0x687   :  { %v1157_v31 = vsel %vm1156_vm9, %v4464_v54, %v1153_v4 }
 0x688   :  { %v1159_v60 = vrot.slane %v1157_v31, 1  ;;  %v1160_v21 = vrot.slane %v1157_v31, 2  ;;  %v1161_v37 = vrot.slane %v1157_v31, 3  ;;  %v1162_v40 = vrot.slane %v1157_v31, 4 }
 0x689   :  { %v1163_v28 = vrot.slane %v1157_v31, 5  ;;  %v1164_v17 = vrot.slane %v1157_v31, 6  ;;  %v1165_v33 = vrot.slane %v1157_v31, 7  ;;  %v1174_v43 = vmul.f32 %v1157_v31, %v1104_v5 }
 0x68a   :  { %v1175_v27 = vmul.f32 %v1159_v60, %v1105_v8  ;;  %v1176_v14 = vmul.f32 %v1160_v21, %v1106_v11  ;;  %v1177_v58 = vmul.f32 %v1161_v37, %v1107_v0  ;;  %v1178_v48 = vmul.f32 %v1162_v40, %v1108_v7 }
 0x68b   :  { %v1179_v13 = vmul.f32 %v1163_v28, %v1109_v45  ;;  %v1180_v52 = vmul.f32 %v1164_v17, %v1110_v6  ;;  %v1181_v25 = vmul.f32 %v1165_v33, %v1111_v9  ;;  %v1185_v16 = vmul.f32 %v4441_v2, %v1174_v43  ;;  %v5469_v17 = vld [vmem:[%s6892_s1 + $0xf8] sm:$0xff]  ;;  %v5482_v43 = vld [vmem:[%s6892_s1 + $0xf0] sm:$0xff] }
 0x68c   :  { %v1186_v34 = vmul.f32 %v4441_v2, %v1175_v27  ;;  %v1187_v51 = vmul.f32 %v4441_v2, %v1176_v14  ;;  %v1188_v15 = vmul.f32 %v4441_v2, %v1177_v58  ;;  %v1189_v3 = vmul.f32 %v4441_v2, %v1178_v48  ;;  %v5475_v33 = vld [vmem:[%s6892_s1 + $0x118] sm:$0xff]  ;;  %v5488_v27 = vld [vmem:[%s6892_s1 + $0x110] sm:$0xff]  ;;  %v5501_v14 = vld [vmem:[%s6892_s1 + $0x108] sm:$0xff] }
 0x68d   :  { %v1190_v24 = vmul.f32 %v4441_v2, %v1179_v13  ;;  %v1191_v29 = vmul.f32 %v4441_v2, %v1180_v52  ;;  %v1192_v18 = vmul.f32 %v4441_v2, %v1181_v25  ;;  %v5439_v7 = vadd.f32 %v4442_v30, %v1185_v16  ;;  %v5518_v58 = vld [vmem:[%s6892_s1 + $0x100] sm:$0xff]  ;;  %v6946_v48 = vld [vmem:[#allocation6_spill] sm:$0xff] }
 0x68e   :  { %v5431_v5 = vadd.f32 %v4442_v30, %v1186_v34  ;;  %v5433_v8 = vadd.f32 %v4442_v30, %v1187_v51  ;;  %v5435_v11 = vadd.f32 %v4442_v30, %v1188_v15  ;;  %v5437_v0 = vadd.f32 %v4442_v30, %v1189_v3  ;;  %v6947_v25 = vld [vmem:[#allocation7_spill] sm:$0xff]  ;;  %v6949_v15 = vld [vmem:[#allocation9_spill] sm:$0xff] }
 0x68f   :  { %v5441_v45 = vadd.f32 %v4442_v30, %v1190_v24  ;;  %v5445_v44 = vadd.f32 %v4442_v30, %v1191_v29  ;;  %v5447_v54 = vadd.f32 %v4442_v30, %v1192_v18  ;;  %v6950_v24 = vld [vmem:[#allocation13_spill] sm:$0xff]  ;;  %v6951_v18 = vld [vmem:[#allocation10_spill] sm:$0xff] }
 0x690   :  { %v1212_v6 = vrot.slane %v5431_v5, 7  ;;  %v1214_v9 = vrot.slane %v5433_v8, 6  ;;  %v1216_v49 = vrot.slane %v5435_v11, 5  ;;  %v1218_v55 = vrot.slane %v5437_v0, 4 }
 0x691   :  { %v1220_v2 = vrot.slane %v5441_v45, 3  ;;  %v1222_v60 = vrot.slane %v5445_v44, 2  ;;  %v1224_v37 = vrot.slane %v5447_v54, 1 }
 0x692   :  { %v1213_v35 = vsel %vm181_vm0, %v1212_v6, %v5439_v7 }
 0x693   :  { %v1215_v53 = vsel %vm184_vm1, %v1214_v9, %v1213_v35 }
 0x694   :  { %v1217_v4 = vsel %vm187_vm2, %v1216_v49, %v1215_v53  ;;  %v5542_v49 = vld [vmem:[%s6893_s2 + $0x4] ss:$0 sm:$0xff] }
 0x695   :  { %v1219_v31 = vsel %vm190_vm3, %v1218_v55, %v1217_v4  ;;  %v5550_v4 = vld [vmem:[%s6893_s2] ss:$0 sm:$0xff] }
 0x696   :  { %v1221_v21 = vsel %vm193_vm4, %v1220_v2, %v1219_v31  ;;  %v6952_v2 = vld [vmem:[#allocation14_spill] sm:$0xff] }
 0x697   :  { %v1223_v40 = vsel %vm196_vm5, %v1222_v60, %v1221_v21 }
 0x698   :  { %v1225_v28 = vsel %vm199_vm6, %v1224_v37, %v1223_v40  ;;  %v6953_v37 = vld [vmem:[#allocation11_spill] sm:$0xff] }
 0x699   :  { %4330 = vmatmul.msk.f32.vlgmr.msrb.gmra.mxu2 %vm201_vm7, %v1225_v28  ;;  %4331 = vmatmul.msk.f32.vlgmr.msrb.gmra.mxu3 %vm201_vm7, %v1225_v28 }
 0x69a   :  { %4332 = vmatmul.msk.f32.vlgmr.msrb.gmra.mxu0 %vm201_vm7, %v1225_v28  ;;  %4336 = vmatmul.msk.f32.vlgmr.msrb.gmra.mxu1 %vm201_vm7, %v1225_v28 }
 0x69b   :  { %1380 = vmatpush.msrb.mxu2 %v5469_v17  ;;  %1400 = vmatpush.msrb.mxu3 %v5475_v33 }
 0x69c   :  { %1420 = vmatpush.msrb.mxu0 %v5047_v62  ;;  %v5495_v62 = vld [vmem:[%s6892_s1 + $0xe8] sm:$0xff] }
 0x69d   :  { %1381 = vmatpush.msrb.mxu2 %v5482_v43  ;;  %1401 = vmatpush.msrb.mxu3 %v5488_v27 }
 0x69e   :  { %1421 = vmatpush.msrb.mxu0 %v5053_v63  ;;  %v5512_v63 = vld [vmem:[%s6892_s1 + $0xe0] sm:$0xff] }
 0x69f   :  { %1382 = vmatpush.msrb.mxu2 %v5495_v62  ;;  %1402 = vmatpush.msrb.mxu3 %v5501_v14 }
 0x6a0   :  { %1422 = vmatpush.msrb.mxu0 %v5059_v19  ;;  %v6945_v19 = vld [vmem:[#allocation5_spill] sm:$0xff] }
 0x6a1   :  { %4333 = vmatmul.msk.f32.vlgmr.msra.gmra.mxu2 %vm201_vm7, %v1225_v28  ;;  %4334 = vmatmul.msk.f32.vlgmr.msra.gmra.mxu3 %vm201_vm7, %v1225_v28 }
 0x6a2   :  { %4335 = vmatmul.msk.f32.vlgmr.msra.gmra.mxu0 %vm201_vm7, %v1225_v28  ;;  %4340 = vmatmul.msk.f32.vlgmr.msra.gmra.mxu1 %vm201_vm7, %v1225_v28 }
 0x6a3   :  { %1383 = vmatpush.msrb.mxu2 %v5512_v63  ;;  %1403 = vmatpush.msrb.mxu3 %v5518_v58 }
 0x6a4   :  { %1423 = vmatpush.msrb.mxu0 %v5065_v20 }
 0x6a5   :  { %1460 = vmatpush.msra.mxu2 %v5070_v22  ;;  %v6948_v22 = vld [vmem:[#allocation8_spill] sm:$0xff] }
 0x6a7   :  { %1461 = vmatpush.msra.mxu2 %v5079_v23 }
 0x6a9   :  { %1462 = vmatpush.msra.mxu2 %v6945_v19  ;;  %4338 = vmatmul.msk.f32.vlgmr.msrb.gmra.mxu3 %vm201_vm7, %v1225_v28 }
 0x6aa   :  { %4337 = vmatmul.msk.f32.vlgmr.msrb.gmra.mxu2 %vm201_vm7, %v1225_v28  ;;  %4339 = vmatmul.msk.f32.vlgmr.msrb.gmra.mxu0 %vm201_vm7, %v1225_v28 }
 0x6ab   :  { %1463 = vmatpush.msra.mxu2 %v6946_v48  ;;  %v5562_v48 = vld [vmem:[%s6893_s2 + $0x3] ss:$0 sm:$0xff] }
 0x6b2   :  { %4341 = vmatmul.msk.f32.vlgmr.msra.gmra.mxu2 %vm201_vm7, %v1225_v28  ;;  %v6954_v28 = vld [vmem:[#allocation12_spill] sm:$0xff] }
 0x717   :  { %v1285_v13 = vpop.f32.mrf.mxu0  ;;  %v1365_v52 = vpop.f32.mrf.mxu1 }
 0x718   :  { %v1366_v20 = vadd.f32 %v6947_v25, %v1365_v52  ;;  %v1286_v23 = vadd.f32 %v6948_v22, %v1285_v13  ;;  %v6955_v52 = vld [vmem:[#allocation15_spill] sm:$0xff] }
 0x71a   :  { %4346 = vmatpush.xpose.msk.msrb.mxu1 %vm6932_vm8, %v1366_v20 }
 0x71c   :  { %v1245_v16 = vpop.f32.mrf.mxu2  ;;  %v1265_v30 = vpop.f32.mrf.mxu3 }
 0x71d   :  { %4347 = vmatmul.msk.f32.vlgmr.msrb.gmra.mxu1 %vm6932_vm8, %v1286_v23  ;;  %v1266_v6 = vadd.f32 %v6951_v18, %v1265_v30 }
 0x71f   :  { %v1345_v34 = vpop.f32.mrf.mxu0  ;;  %v1445_v51 = vpop.f32.mrf.mxu1 }
 0x720   :  { %v1346_v3 = vadd.f32 %v6949_v15, %v1345_v34  ;;  %v1446_v29 = vadd.f32 %v6950_v24, %v1445_v51 }
 0x722   :  { %4344 = vmatpush.xpose.msk.msra.mxu0 %vm6932_vm8, %v1346_v3  ;;  %1680 = vmatpush.msra.mxu1 %v1446_v29 }
 0x724   :  { %1772 = vmatpush.msrb.mxu1 %v5194_v26  ;;  %v1305_v9 = vpop.f32.mrf.mxu2  ;;  %v1325_v35 = vpop.f32.mrf.mxu3  ;;  %v1246_v26 = vadd.f32 %v5550_v4, %v1245_v16 }
 0x725   :  { %v1326_v53 = vadd.f32 %v5542_v49, %v1325_v35  ;;  %4345 = vmatmul.msk.f32.vlgmr.msra.gmra.mxu0 %vm6932_vm8, %v1266_v6  ;;  %v1306_v13 = vadd.f32 %v5562_v48, %v1305_v9 }
 0x727   :  { %v1425_v55 = vpop.f32.mrf.mxu0  ;;  %4342 = vmatpush.xpose.msk.msra.mxu3 %vm6932_vm8, %v1326_v53 }
 0x728   :  { %v1426_v31 = vadd.f32 %v6952_v2, %v1425_v55 }
 0x72a   :  { %1657 = vmatpush.msrb.mxu0 %v1426_v31  ;;  %4343 = vmatmul.msk.f32.vlgmr.msra.gmra.mxu3 %vm6932_vm8, %v1246_v26 }
 0x72c   :  { %1749 = vmatpush.msra.mxu0 %v5188_v61  ;;  %v1405_v21 = vpop.f32.mrf.mxu3 }
 0x72d   :  { %v1385_v60 = vpop.f32.mrf.mxu2  ;;  %v1406_v19 = vadd.f32 %v6954_v28, %v1405_v21 }
 0x72e   :  { %v1386_v40 = vadd.f32 %v6953_v37, %v1385_v60 }
 0x72f   :  { %1634 = vmatpush.msrb.mxu3 %v1406_v19 }
 0x730   :  { %4348 = vmatpush.xpose.msk.msrb.mxu2 %vm6932_vm8, %v1386_v40 }
 0x731   :  { %1726 = vmatpush.msra.mxu3 %v5182_v47 }
 0x733   :  { %4349 = vmatmul.msk.f32.vlgmr.msrb.gmra.mxu2 %vm6932_vm8, %v1306_v13 }
 0x735   :  { %v1465_v61 = vpop.f32.mrf.mxu2 }
 0x736   :  { %v1466_v25 = vadd.f32 %v6955_v52, %v1465_v61 }
 0x738   :  { %1703 = vmatpush.msra.mxu2 %v1466_v25 }
 0x73a   :  { %1795 = vmatpush.msrb.mxu2 %v5200_v36 }
 0x79a   :  { %v1543_v30 = vpop.f32.mrf.mxu1 }
 0x79b   :  { %v1578_v51 = vsel %vm6932_vm8, %v1543_v30, -inf }
 0x7a2   :  { %v1517_v20 = vpop.f32.mrf.mxu0 }
 0x7a3   :  { %v1575_v22 = vsel %vm6932_vm8, %v1517_v20, -inf }
 0x7a4   :  { %1576 = vmax.xlane.f32.xlu2 %v1575_v22 }
 0x7ad   :  { %v1491_v23 = vpop.f32.mrf.mxu3 }
 0x7ae   :  { %v1572_v16 = vsel %vm6932_vm8, %v1491_v23, -inf }
 0x7af   :  { %1573 = vmax.xlane.f32.xlu0 %v1572_v16 }
 0x7b6   :  { %v1569_v34 = vpop.f32.mrf.mxu2 }
 0x7b7   :  { %v1581_v47 = vsel %vm6932_vm8, %v1569_v34, -inf  ;;  %1579 = vmax.xlane.f32.xlu0 %v1578_v51  ;;  %v5657_v51 = vld [vmem:[%s6892_s1 + $0xc8] sm:$0xff] }
 0x7b8   :  { %1582 = vmax.xlane.f32.xlu1 %v1581_v47  ;;  %v5651_v47 = vld [vmem:[%s6892_s1 + $0xd0] sm:$0xff] }
 0x817   :  { %v1577_v15 = vpop.xlane.xlu2 %1576 }
 0x818   :  { %v1585_v3 = vsub.f32 %v1517_v20, %v1577_v15  ;;  %v5663_v15 = vld [vmem:[%s6892_s1 + $0xc0] sm:$0xff] }
 0x81a   :  { %v1590_v24 = vmul.f32 1.442695, %v1585_v3 }
 0x81c   :  { %4465 = vpow2.f32 %v1590_v24  ;;  %v5670_v24 = vld [vmem:[%s6892_s1 + $0x58] sm:$0xff] }
 0x822   :  { %v4466_v36 = vpop.eup %4465  ;;  %v1574_v29 = vpop.xlane.xlu0 %1573 }
 0x823   :  { %v1584_v18 = vsub.f32 %v1491_v23, %v1574_v29  ;;  %v1599_v6 = vsel %vm6932_vm8, %v4466_v36, 0.0  ;;  %v5677_v29 = vld [vmem:[%s6892_s1 + $0x50] sm:$0xff] }
 0x824   :  { %1600 = vadd.xlane.f32.xlu0 %v1599_v6  ;;  %v5689_v6 = vld [vmem:[%s6892_s1 + $0x48] sm:$0xff] }
 0x825   :  { %v1588_v9 = vmul.f32 1.442695, %v1584_v18  ;;  %v5683_v18 = vld [vmem:[%s6892_s1 + $0x78] sm:$0xff] }
 0x827   :  { %4467 = vpow2.f32 %v1588_v9  ;;  %v5695_v9 = vld [vmem:[%s6892_s1 + $0x70] sm:$0xff] }
 0x82a   :  { %v1580_v53 = vpop.xlane.xlu0 %1579 }
 0x82b   :  { %v1583_v35 = vpop.xlane.xlu1 %1582  ;;  %v1586_v26 = vsub.f32 %v1543_v30, %v1580_v53  ;;  %v5701_v53 = vld [vmem:[%s6892_s1 + $0x40] sm:$0xff] }
 0x82c   :  { %v1587_v55 = vsub.f32 %v1569_v34, %v1583_v35  ;;  %v5645_v34 = vld [vmem:[%s6892_s1 + $0xd8] sm:$0xff] }
 0x82d   :  { %v4468_v2 = vpop.eup %4467  ;;  %v1592_v60 = vmul.f32 1.442695, %v1586_v26  ;;  %v5714_v26 = vld [vmem:[%s6892_s1 + $0x98] sm:$0xff] }
 0x82e   :  { %v1594_v31 = vmul.f32 1.442695, %v1587_v55  ;;  %v1596_v21 = vsel %vm6932_vm8, %v4468_v2, 0.0  ;;  %v5708_v55 = vld [vmem:[%s6892_s1 + $0x68] sm:$0xff] }
 0x82f   :  { %1597 = vadd.xlane.f32.xlu1 %v1596_v21  ;;  %v5738_v21 = vld [vmem:[%s6892_s1 + $0x80] sm:$0xff] }
 0x830   :  { %4469 = vpow2.f32 %v1594_v31  ;;  %v5726_v31 = vld [vmem:[%s6892_s1 + $0x90] sm:$0xff] }
 0x831   :  { %4471 = vpow2.f32 %v1592_v60  ;;  %v5732_v60 = vld [vmem:[%s6892_s1 + $0x88] sm:$0xff] }
 0x836   :  { %v4470_v37 = vpop.eup %4469 }
 0x837   :  { %v4472_v40 = vpop.eup %4471  ;;  %v1605_v28 = vsel %vm6932_vm8, %v4470_v37, 0.0 }
 0x838   :  { %1606 = vadd.xlane.f32.xlu2 %v1605_v28  ;;  %v1602_v19 = vsel %vm6932_vm8, %v4472_v40, 0.0 }
 0x839   :  { %1603 = vadd.xlane.f32.xlu1 %v1602_v19 }
 0x897   :  { %v1601_v13 = vpop.xlane.xlu0 %1600 }
 0x898   :  { %4473 = vrcp.f32 %v1601_v13 }
 0x89e   :  { %v4474_v61 = vpop.eup %4473 }
 0x89f   :  { %v1613_v52 = vmul.f32 %v4474_v61, %v4466_v36 }
 0x8a1   :  { %4351 = vmatmul.msk.f32.vlgmr.msrb.gmra.mxu0 %vm6932_vm8, %v1613_v52 }
 0x8a2   :  { %v1598_v25 = vpop.xlane.xlu1 %1597  ;;  %2025 = vmatpush.msrb.mxu0 %v5321_v59 }
 0x8a3   :  { %4475 = vrcp.f32 %v1598_v25 }
 0x8a4   :  { %2026 = vmatpush.msrb.mxu0 %v5326_v41 }
 0x8a6   :  { %2027 = vmatpush.msrb.mxu0 %v5332_v1 }
 0x8a8   :  { %2028 = vmatpush.msrb.mxu0 %v5338_v10 }
 0x8a9   :  { %v4476_v20 = vpop.eup %4475 }
 0x8aa   :  { %v1612_v22 = vmul.f32 %v4476_v20, %v4468_v2  ;;  %2029 = vmatpush.msrb.mxu0 %v5344_v57  ;;  %v5620_v57 = vld [vmem:[%s6892_s1 + $0x28] sm:$0xff]  ;;  %v5720_v2 = vld [vmem:[%s6892_s1 + $0x60] sm:$0xff] }
 0x8ab   :  { %v1607_v23 = vpop.xlane.xlu2 %1606 }
 0x8ac   :  { %4477 = vrcp.f32 %v1607_v23  ;;  %v1604_v16 = vpop.xlane.xlu1 %1603  ;;  %4350 = vmatmul.msk.f32.vlgmr.msrb.gmra.mxu3 %vm6932_vm8, %v1612_v22  ;;  %2030 = vmatpush.msrb.mxu0 %v5377_v50  ;;  %v5626_v50 = vld [vmem:[%s6892_s1 + $0x8] sm:$0xff] }
 0x8ad   :  { %4479 = vrcp.f32 %v1604_v16  ;;  %2005 = vmatpush.msrb.mxu3 %v5292_v42  ;;  %v5596_v42 = vld [vmem:[%s6892_s1 + $0x38] sm:$0xff]  ;;  %v5748_v16 = vld [vmem:[%s6895_s4] ss:$0 sm:$0xff] }
 0x8ae   :  { %2031 = vmatpush.msrb.mxu0 %v5383_v12  ;;  %v5632_v12 = vld [vmem:[%s6892_s1 + $0x20] sm:$0xff] }
 0x8af   :  { %2006 = vmatpush.msrb.mxu3 %v5297_v56  ;;  %v5602_v56 = vld [vmem:[%s6892_s1 + $0x18] sm:$0xff] }
 0x8b0   :  { %2032 = vmatpush.msrb.mxu0 %v5389_v46  ;;  %v5638_v46 = vld [vmem:[%s6892_s1] sm:$0xff] }
 0x8b1   :  { %2007 = vmatpush.msrb.mxu3 %v5303_v39  ;;  %v5608_v39 = vld [vmem:[%s6892_s1 + $0x30] sm:$0xff] }
 0x8b2   :  { %v4478_v59 = vpop.eup %4477 }
 0x8b3   :  { %v4480_v41 = vpop.eup %4479  ;;  %v1615_v1 = vmul.f32 %v4478_v59, %v4470_v37  ;;  %2008 = vmatpush.msrb.mxu3 %v5309_v32  ;;  %v5614_v32 = vld [vmem:[%s6892_s1 + $0x10] sm:$0xff] }
 0x8b4   :  { %v1614_v10 = vmul.f32 %v4480_v41, %v4472_v40 }
 0x8b5   :  { %4353 = vmatmul.msk.f32.vlgmr.msra.gmra.mxu2 %vm6932_vm8, %v1615_v1 }
 0x8b6   :  { %4352 = vmatmul.msk.f32.vlgmr.msra.gmra.mxu1 %vm6932_vm8, %v1614_v10  ;;  %2246 = vmatpush.msra.mxu2 %v5596_v42 }
 0x8b7   :  { %2226 = vmatpush.msra.mxu1 %v5602_v56 }
 0x8b8   :  { %2247 = vmatpush.msra.mxu2 %v5608_v39 }
 0x8b9   :  { %2227 = vmatpush.msra.mxu1 %v5614_v32 }
 0x8ba   :  { %2248 = vmatpush.msra.mxu2 %v5620_v57 }
 0x8bb   :  { %2228 = vmatpush.msra.mxu1 %v5626_v50 }
 0x8bc   :  { %2249 = vmatpush.msra.mxu2 %v5632_v12 }
 0x8bd   :  { %2229 = vmatpush.msra.mxu1 %v5638_v46 }
 0x91e   :  { %v1659_v30 = vpop.f32.mrf.mxu0 }
 0x91f   :  { %4355 = vmatmul.msk.f32.vlgmr.msra.gmra.mxu0 %vm6932_vm8, %v1659_v30 }
 0x920   :  { %2346 = vmatpush.msra.mxu0 %v5645_v34 }
 0x922   :  { %2347 = vmatpush.msra.mxu0 %v5651_v47 }
 0x924   :  { %2348 = vmatpush.msra.mxu0 %v5657_v51 }
 0x926   :  { %2349 = vmatpush.msra.mxu0 %v5663_v15 }
 0x92f   :  { %v1636_v3 = vpop.f32.mrf.mxu3 }
 0x930   :  { %4354 = vmatmul.msk.f32.vlgmr.msra.gmra.mxu3 %vm6932_vm8, %v1636_v3 }
 0x931   :  { %2266 = vmatpush.msra.mxu3 %v5670_v24 }
 0x933   :  { %v1682_v36 = vpop.f32.mrf.mxu1  ;;  %2267 = vmatpush.msra.mxu3 %v5677_v29 }
 0x934   :  { %4356 = vmatmul.msk.f32.vlgmr.msrb.gmra.mxu1 %vm6932_vm8, %v1682_v36 }
 0x935   :  { %2286 = vmatpush.msrb.mxu1 %v5683_v18  ;;  %2268 = vmatpush.msra.mxu3 %v5689_v6 }
 0x937   :  { %2287 = vmatpush.msrb.mxu1 %v5695_v9  ;;  %2269 = vmatpush.msra.mxu3 %v5701_v53 }
 0x938   :  { %v1705_v35 = vpop.f32.mrf.mxu2 }
 0x939   :  { %4357 = vmatmul.msk.f32.vlgmr.msrb.gmra.mxu2 %vm6932_vm8, %v1705_v35  ;;  %2288 = vmatpush.msrb.mxu1 %v5708_v55 }
 0x93a   :  { %2306 = vmatpush.msrb.mxu2 %v5714_v26 }
 0x93b   :  { %2289 = vmatpush.msrb.mxu1 %v5720_v2 }
 0x93c   :  { %2307 = vmatpush.msrb.mxu2 %v5726_v31 }
 0x93e   :  { %2308 = vmatpush.msrb.mxu2 %v5732_v60 }
 0x940   :  { %2309 = vmatpush.msrb.mxu2 %v5738_v21 }
 0x99c   :  { %v1751_v37 = vpop.f32.mrf.mxu0 }
 0x99d   :  { %v1801_v19 = vsel %vm201_vm7, %v1751_v37, 0.0 }
 0x9b1   :  { %v1774_v13 = vpop.f32.mrf.mxu1 }
 0x9b2   :  { %v1803_v52 = vsel %vm201_vm7, %v1774_v13, 0.0 }
 0x9b3   :  { %v1728_v40 = vpop.f32.mrf.mxu3 }
 0x9b4   :  { %v1800_v28 = vsel %vm201_vm7, %v1728_v40, 0.0 }
 0x9b5   :  { %v1802_v61 = vadd.f32 %v1801_v19, %v1800_v28 }
 0x9b7   :  { %v1804_v20 = vadd.f32 %v1803_v52, %v1802_v61 }
 0x9bc   :  { %v1797_v25 = vpop.f32.mrf.mxu2 }
 0x9bd   :  { %v1805_v22 = vsel %vm201_vm7, %v1797_v25, 0.0 }
 0x9be   :  { %v1806_v23 = vadd.f32 %v1805_v22, %v1804_v20 }
 0x9c0   :  { %v1807_v59 = vadd.f32 %v5748_v16, %v1806_v23 }
 0x9c2   :  { %v1809_v41 = vrot.slane %v1807_v59, 1  ;;  %v1810_v1 = vrot.slane %v1807_v59, 2  ;;  %v1811_v10 = vrot.slane %v1807_v59, 3  ;;  %v1812_v30 = vrot.slane %v1807_v59, 4 }
 0x9c3   :  { %v1813_v3 = vrot.slane %v1807_v59, 5  ;;  %v1814_v36 = vrot.slane %v1807_v59, 6  ;;  %v1815_v35 = vrot.slane %v1807_v59, 7  ;;  %v1824_v13 = vadd.f32 %v1807_v59, %v5439_v7 }
 0x9c4   :  { %v5752_v37 = vadd.f32 %v1809_v41, %v5431_v5  ;;  %v5755_v40 = vadd.f32 %v1810_v1, %v5433_v8  ;;  %v5758_v28 = vadd.f32 %v1811_v10, %v5435_v11  ;;  %v5761_v19 = vadd.f32 %v1812_v30, %v5437_v0  ;;  %v5791_v30 = vld [vmem:[%s6891_s0] sm:$0x3] }
 0x9c5   :  { %v5765_v61 = vadd.f32 %v1813_v3, %v5441_v45  ;;  %v5770_v5 = vadd.f32 %v1814_v36, %v5445_v44  ;;  %v5773_v8 = vadd.f32 %v1815_v35, %v5447_v54  ;;  %v2198_v3 = vrot.slane %v5791_v30, 1  ;;  %v5797_v36 = vld [vmem:[%s6891_s0 + $0x4] sm:$0x3] }
 0x9c6   :  { %v1840_v52 = vrot.slane %v5752_v37, 7  ;;  %v1842_v25 = vrot.slane %v5755_v40, 6  ;;  %v1844_v0 = vrot.slane %v5758_v28, 5  ;;  %v1846_v7 = vrot.slane %v5761_v19, 4 }
 0x9c7   :  { %v1848_v22 = vrot.slane %v5765_v61, 3  ;;  %v1850_v44 = vrot.slane %v5770_v5, 2  ;;  %v1852_v54 = vrot.slane %v5773_v8, 1  ;;  %v2200_v35 = vrot.slane %v5797_v36, 7 }
 0x9c8   :  { %v1841_v11 = vsel %vm181_vm0, %v1840_v52, %v1824_v13  ;;  %v5803_v52 = vld [vmem:[%s6891_s0 + $0x6] sm:$0x3] }
 0x9c9   :  { %v1843_v20 = vsel %vm184_vm1, %v1842_v25, %v1841_v11  ;;  %v2202_v25 = vrot.slane %v5803_v52, 6  ;;  %v5809_v11 = vld [vmem:[%s6891_s0 + $0x8] sm:$0x3] }
 0x9ca   :  { %v1845_v45 = vsel %vm187_vm2, %v1844_v0, %v1843_v20  ;;  %v2204_v0 = vrot.slane %v5809_v11, 5  ;;  %v5815_v20 = vld [vmem:[%s6891_s0 + $0x2] sm:$0x3] }
 0x9cb   :  { %v1847_v23 = vsel %vm190_vm3, %v1846_v7, %v1845_v45  ;;  %v2199_v7 = vsel %vm181_vm0, %v5815_v20, %v2198_v3  ;;  %v5822_v45 = vld [vmem:[%s6891_s0 + $0xa] sm:$0x3] }
 0x9cc   :  { %v1849_v59 = vsel %vm193_vm4, %v1848_v22, %v1847_v23  ;;  %v2206_v22 = vrot.slane %v5822_v45, 4  ;;  %v2201_v23 = vsel %vm184_vm1, %v2200_v35, %v2199_v7 }
 0x9cd   :  { %v1851_v41 = vsel %vm196_vm5, %v1850_v44, %v1849_v59  ;;  %v5829_v44 = vld [vmem:[%s6891_s0 + $0xc] sm:$0x3] }
 0x9ce   :  { %v1853_v1 = vsel %vm199_vm6, %v1852_v54, %v1851_v41  ;;  %v2208_v59 = vrot.slane %v5829_v44, 3  ;;  %v2203_v54 = vsel %vm187_vm2, %v2202_v25, %v2201_v23  ;;  %v5836_v41 = vld [vmem:[%s6891_s0 + $0xe] sm:$0x3] }
 0x9cf   :  { %v1855_v10 = vsel %vm201_vm7, %v1853_v1, 0.0  ;;  %v2210_v1 = vrot.slane %v5836_v41, 2 }
 0x9d0   :  { %1856 = vadd.xlane.f32.xlu2 %v1855_v10  ;;  %v2205_v10 = vsel %vm190_vm3, %v2204_v0, %v2203_v54 }
 0x9d1   :  { %v2207_v3 = vsel %vm193_vm4, %v2206_v22, %v2205_v10 }
 0x9d2   :  { %v2209_v35 = vsel %vm196_vm5, %v2208_v59, %v2207_v3 }
 0x9d3   :  { %v5843_v7 = vsel %vm199_vm6, %v2210_v1, %v2209_v35 }
 0x9d4   :  { %4361 = vmatmul.msk.f32.vlgmr.msra.gmra.mxu2 %vm201_vm7, %v5843_v7  ;;  %4360 = vmatmul.msk.f32.vlgmr.msra.gmra.mxu1 %vm201_vm7, %v5843_v7 }
 0x9d5   :  { %2366 = vmatpush.msra.mxu1 %v5469_v17  ;;  %2386 = vmatpush.msra.mxu2 %v5475_v33 }
 0x9d7   :  { %2367 = vmatpush.msra.mxu1 %v5482_v43  ;;  %2387 = vmatpush.msra.mxu2 %v5488_v27 }
 0x9d9   :  { %2368 = vmatpush.msra.mxu1 %v5495_v62  ;;  %2388 = vmatpush.msra.mxu2 %v5501_v14 }
 0x9db   :  { %2369 = vmatpush.msra.mxu1 %v5512_v63  ;;  %2389 = vmatpush.msra.mxu2 %v5518_v58  ;;  %v4577_v58 = vld [vmem:[%s6892_s1 + $0x178] sm:$0xff] }
 0x9dc   :  { %4364 = vmatmul.msk.f32.vlgmr.msrb.gmra.mxu2 %vm201_vm7, %v5843_v7  ;;  %4363 = vmatmul.msk.f32.vlgmr.msrb.gmra.mxu1 %vm201_vm7, %v5843_v7 }
 0x9dd   :  { %2446 = vmatpush.msrb.mxu1 %v4577_v58 }
 0x9e4   :  { %4367 = vmatmul.msk.f32.vlgmr.msra.gmra.mxu1 %vm201_vm7, %v5843_v7  ;;  %4368 = vmatmul.msk.f32.vlgmr.msra.gmra.mxu2 %vm201_vm7, %v5843_v7 }
 0xa43   :  { %v1857_v25 = vpop.xlane.xlu2 %1856 }
 0xa44   :  { %v1858_v0 = vmul.f32 %v1857_v25, %v5246_v38 }
 0xa46   :  { %v1860_v22 = vrot.slane %v1858_v0, 1  ;;  %v1861_v23 = vrot.slane %v1858_v0, 2  ;;  %v1862_v59 = vrot.slane %v1858_v0, 3  ;;  %v1863_v54 = vrot.slane %v1858_v0, 4 }
 0xa47   :  { %v1864_v17 = vrot.slane %v1858_v0, 5  ;;  %v1865_v33 = vrot.slane %v1858_v0, 6  ;;  %v1866_v43 = vrot.slane %v1858_v0, 7  ;;  %v5858_v1 = vsub.f32 %v1824_v13, %v1858_v0  ;;  %v4579_v0 = vld [vmem:[%s6892_s1 + $0x168] sm:$0xff] }
 0xa48   :  { %v5865_v27 = vsub.f32 %v5752_v37, %v1860_v22  ;;  %v5868_v62 = vsub.f32 %v5755_v40, %v1861_v23  ;;  %v5871_v14 = vsub.f32 %v5758_v28, %v1862_v59  ;;  %v5874_v63 = vsub.f32 %v5761_v19, %v1863_v54 }
 0xa49   :  { %v5880_v13 = vsub.f32 %v5765_v61, %v1864_v17  ;;  %v5883_v37 = vsub.f32 %v5770_v5, %v1865_v33  ;;  %v5886_v40 = vsub.f32 %v5773_v8, %v1866_v43  ;;  %v4578_v61 = vld [vmem:[%s6892_s1 + $0x170] sm:$0xff]  ;;  %v1883_v8 = vmul.f32 %v5858_v1, %v5858_v1  ;;  %v4580_v17 = vld [vmem:[%s6892_s1 + $0x160] sm:$0xff] }
 0xa4a   :  { %v1884_v28 = vmul.f32 %v5865_v27, %v5865_v27  ;;  %v1885_v19 = vmul.f32 %v5868_v62, %v5868_v62  ;;  %v1886_v10 = vmul.f32 %v5871_v14, %v5871_v14  ;;  %2447 = vmatpush.msrb.mxu1 %v4578_v61  ;;  %v1887_v5 = vmul.f32 %v5874_v63, %v5874_v63 }
 0xa4b   :  { %v1888_v3 = vmul.f32 %v5880_v13, %v5880_v13  ;;  %v1889_v22 = vmul.f32 %v5883_v37, %v5883_v37  ;;  %v1890_v23 = vmul.f32 %v5886_v40, %v5886_v40 }
 0xa4c   :  { %v1899_v35 = vrot.slane %v1884_v28, 7  ;;  %v1901_v25 = vrot.slane %v1885_v19, 6  ;;  %2448 = vmatpush.msrb.mxu1 %v4579_v0  ;;  %v1903_v54 = vrot.slane %v1886_v10, 5  ;;  %v1905_v43 = vrot.slane %v1887_v5, 4 }
 0xa4d   :  { %v1907_v28 = vrot.slane %v1888_v3, 3  ;;  %v1909_v10 = vrot.slane %v1889_v22, 2 }
 0xa4e   :  { %v1900_v59 = vsel %vm181_vm0, %v1899_v35, %v1883_v8  ;;  %2449 = vmatpush.msrb.mxu1 %v4580_v17  ;;  %v1911_v8 = vrot.slane %v1890_v23, 1 }
 0xa4f   :  { %v1902_v33 = vsel %vm184_vm1, %v1901_v25, %v1900_v59  ;;  %4371 = vmatmul.msk.f32.vlgmr.msrb.gmra.mxu1 %vm201_vm7, %v5843_v7 }
 0xa50   :  { %v1904_v58 = vsel %vm187_vm2, %v1903_v54, %v1902_v33 }
 0xa51   :  { %v1906_v19 = vsel %vm190_vm3, %v1905_v43, %v1904_v58 }
 0xa52   :  { %v1908_v61 = vsel %vm193_vm4, %v1907_v28, %v1906_v19 }
 0xa53   :  { %v1910_v35 = vsel %vm196_vm5, %v1909_v10, %v1908_v61 }
 0xa54   :  { %v1912_v25 = vsel %vm199_vm6, %v1911_v8, %v1910_v35 }
 0xa55   :  { %v1914_v5 = vsel %vm201_vm7, %v1912_v25, 0.0 }
 0xa56   :  { %1915 = vadd.xlane.f32.xlu0 %v1914_v5 }
 0xac9   :  { %v1916_v0 = vpop.xlane.xlu0 %1915 }
 0xaca   :  { %v1917_v59 = vmul.f32 %v1916_v0, %v5246_v38  ;;  %v5929_v0 = vpop.f32.mrf.mxu2 }
 0xacc   :  { %v1918_v3 = vadd.f32 1e-05, %v1917_v59  ;;  %v2231_v59 = vpop.f32.mrf.mxu1 }
 0xace   :  { %4481 = vrsqrt.f32 %v1918_v3  ;;  %vm1925_vm11 = vweird.f32 %v1918_v3 }
 0xad4   :  { %v4482_v54 = vpop.eup %4481 }
 0xad5   :  { %v1920_v22 = vmul.f32 %v4482_v54, %v1918_v3  ;;  %vm1926_vm10 = vweird.f32 %v4482_v54 }
 0xad6   :  { %vm1927_vm12 = vmor %vm1925_vm11, %vm1926_vm10 }
 0xad7   :  { %v1921_v17 = vmul.f32 %v4482_v54, %v1920_v22 }
 0xad9   :  { %v1922_v33 = vmul.f32 0.5, %v1921_v17 }
 0xadb   :  { %v1923_v23 = vsub.f32 1.5, %v1922_v33 }
 0xadd   :  { %v1924_v43 = vmul.f32 %v4482_v54, %v1923_v23 }
 0xadf   :  { %v1928_v58 = vsel %vm1927_vm12, %v4482_v54, %v1924_v43  ;;  %v5941_v43 = vld [vmem:[%s6896_s5] ss:$0 sm:$0xff] }
 0xae0   :  { %v1930_v28 = vrot.slane %v1928_v58, 1  ;;  %v1931_v19 = vrot.slane %v1928_v58, 2  ;;  %v1932_v10 = vrot.slane %v1928_v58, 3  ;;  %v1933_v61 = vrot.slane %v1928_v58, 4 }
 0xae1   :  { %v1945_v8 = vmul.f32 %v1928_v58, %v5858_v1  ;;  %v1934_v35 = vrot.slane %v1928_v58, 5  ;;  %v1935_v25 = vrot.slane %v1928_v58, 6  ;;  %v1936_v5 = vrot.slane %v1928_v58, 7 }
 0xae2   :  { %v1946_v22 = vmul.f32 %v1930_v28, %v5865_v27  ;;  %v1947_v17 = vmul.f32 %v1931_v19, %v5868_v62  ;;  %v1948_v3 = vmul.f32 %v1932_v10, %v5871_v14  ;;  %v1949_v54 = vmul.f32 %v1933_v61, %v5874_v63  ;;  %v5954_v28 = vld [vmem:[%s6897_s6] ss:$0 sm:$0xff] }
 0xae3   :  { %v1950_v33 = vmul.f32 %v1934_v35, %v5880_v13  ;;  %v1951_v23 = vmul.f32 %v1935_v25, %v5883_v37  ;;  %v1952_v1 = vmul.f32 %v1936_v5, %v5886_v40  ;;  %v1953_v58 = vmul.f32 %v5941_v43, %v1945_v8 }
 0xae4   :  { %v1954_v27 = vmul.f32 %v5941_v43, %v1946_v22  ;;  %v1955_v62 = vmul.f32 %v5941_v43, %v1947_v17  ;;  %v1956_v14 = vmul.f32 %v5941_v43, %v1948_v3  ;;  %v1957_v63 = vmul.f32 %v5941_v43, %v1949_v54  ;;  %v2311_v3 = vpop.f32.mrf.mxu2  ;;  %v2291_v54 = vpop.f32.mrf.mxu1 }
 0xae5   :  { %v1958_v13 = vmul.f32 %v5941_v43, %v1950_v33  ;;  %v1959_v37 = vmul.f32 %v5941_v43, %v1951_v23  ;;  %v1960_v40 = vmul.f32 %v5941_v43, %v1952_v1  ;;  %v5969_v35 = vadd.f32 %v5954_v28, %v1953_v58 }
 0xae6   :  { %v5957_v19 = vadd.f32 %v5954_v28, %v1954_v27  ;;  %v5960_v10 = vadd.f32 %v5954_v28, %v1955_v62  ;;  %v5963_v61 = vadd.f32 %v5954_v28, %v1956_v14  ;;  %v5966_v8 = vadd.f32 %v5954_v28, %v1957_v63 }
 0xae7   :  { %6960 = vst [vmem:[#allocation9_spill] sm:$0xff] %v5969_v35  ;;  %v5972_v25 = vadd.f32 %v5954_v28, %v1958_v13  ;;  %v5977_v17 = vadd.f32 %v5954_v28, %v1959_v37  ;;  %v5980_v33 = vadd.f32 %v5954_v28, %v1960_v40  ;;  %v2312_v58 = vadd.f32 %v5542_v49, %v2311_v3  ;;  %v6003_v3 = vld [vmem:[%s6892_s1 + $0xb8] sm:$0xff] }
 0xae8   :  { %6956 = vst [vmem:[#allocation5_spill] sm:$0xff] %v5957_v19  ;;  %v1977_v5 = vrot.slane %v5957_v19, 7  ;;  %v1979_v22 = vrot.slane %v5960_v10, 6  ;;  %v1981_v1 = vrot.slane %v5963_v61, 5  ;;  %v1983_v62 = vrot.slane %v5966_v8, 4 }
 0xae9   :  { %6957 = vst [vmem:[#allocation6_spill] sm:$0xff] %v5960_v10  ;;  %v2232_v14 = vadd.f32 %v5550_v4, %v2231_v59  ;;  %v1985_v13 = vrot.slane %v5972_v25, 3  ;;  %4372 = vmatpush.xpose.msk.msrb.mxu2 %vm6932_vm8, %v2312_v58  ;;  %v1987_v40 = vrot.slane %v5977_v17, 2  ;;  %v1989_v49 = vrot.slane %v5980_v33, 1 }
 0xaea   :  { %6958 = vst [vmem:[#allocation7_spill] sm:$0xff] %v5963_v61  ;;  %v1978_v23 = vsel %vm181_vm0, %v1977_v5, %v5969_v35  ;;  %v2292_v58 = vadd.f32 %v5562_v48, %v2291_v54  ;;  %v6027_v48 = vld [vmem:[%s6892_s1 + $0xa0] sm:$0xff]  ;;  %v6035_v54 = vld [vmem:[%s6892_s1 + $0x138] sm:$0xff] }
 0xaeb   :  { %6959 = vst [vmem:[#allocation8_spill] sm:$0xff] %v5966_v8  ;;  %v1980_v27 = vsel %vm184_vm1, %v1979_v22, %v1978_v23  ;;  %v4584_v23 = vld [vmem:[%s6893_s2 + $0x7] ss:$0 sm:$0xff]  ;;  %v6141_v35 = vld [vmem:[%s6893_s2 + $0x6] ss:$0 sm:$0xff] }
 0xaec   :  { %6961 = vst [vmem:[#allocation13_spill] sm:$0xff] %v5972_v25  ;;  %v1982_v63 = vsel %vm187_vm2, %v1981_v1, %v1980_v27  ;;  %4373 = vmatmul.msk.f32.vlgmr.msrb.gmra.mxu2 %vm6932_vm8, %v2232_v14  ;;  %v2371_v59 = vpop.f32.mrf.mxu1  ;;  %v6013_v27 = vld [vmem:[%s6892_s1 + $0xb0] sm:$0xff] }
 0xaed   :  { %6962 = vst [vmem:[#allocation10_spill] sm:$0xff] %v5977_v17  ;;  %v1984_v37 = vsel %vm190_vm3, %v1983_v62, %v1982_v63  ;;  %v2372_v1 = vadd.f32 %v4584_v23, %v2371_v59  ;;  %v6020_v62 = vld [vmem:[%s6892_s1 + $0xa8] sm:$0xff]  ;;  %v6041_v14 = vld [vmem:[%s6892_s1 + $0x130] sm:$0xff]  ;;  %v4594_v59 = vld [vmem:[%s6894_s3] sm:$0xff] }
 0xaee   :  { %6963 = vst [vmem:[#allocation14_spill] sm:$0xff] %v5980_v33  ;;  %v1986_v5 = vsel %vm193_vm4, %v1985_v13, %v1984_v37  ;;  %v6047_v63 = vld [vmem:[%s6892_s1 + $0x128] sm:$0xff]  ;;  %v6053_v13 = vld [vmem:[%s6892_s1 + $0x120] sm:$0xff]  ;;  %v2391_v37 = vpop.f32.mrf.mxu2  ;;  %v4595_v23 = vld [vmem:[%s6894_s3 + $0x18] sm:$0xff] }
 0xaef   :  { %v1988_v22 = vsel %vm196_vm5, %v1987_v40, %v1986_v5  ;;  %4378 = vmatpush.xpose.msk.msra.mxu1 %vm6932_vm8, %v2372_v1  ;;  %v4592_v5 = vld [vmem:[%s6893_s2 + $0x8] ss:$0 sm:$0xff]  ;;  %v6116_v17 = vld [vmem:[%s6893_s2 + $0x1] ss:$0 sm:$0xff]  ;;  %6969 = vst [vmem:[#allocation18_spill] sm:$0xff] %v6141_v35 }
 0xaf0   :  { %v1990_v4 = vsel %vm199_vm6, %v1989_v49, %v1988_v22  ;;  %v2392_v49 = vadd.f32 %v4592_v5, %v2391_v37  ;;  %v4593_v22 = vld [vmem:[%s6893_s2 + $0xb] ss:$0 sm:$0xff]  ;;  %6965 = vst [vmem:[#allocation12_spill] sm:$0xff] %v6116_v17  ;;  %v2252_v25 = vadd.f32 %v6116_v17, %v5929_v0  ;;  %v6161_v17 = vld [vmem:[%s6894_s3 + $0x10] sm:$0xff] }
 0xaf1   :  { %4358 = vmatmul.msk.f32.vlgmr.msrb.gmra.mxu3 %vm201_vm7, %v1990_v4  ;;  %v6133_v0 = vld [vmem:[%s6894_s3 + $0x8] sm:$0xff]  ;;  %6972 = vst [vmem:[#allocation21_spill] sm:$0xff] %v6161_v17 }
 0xaf2   :  { %2326 = vmatpush.msrb.mxu3 %v6003_v3  ;;  %4379 = vmatmul.msk.f32.vlgmr.msra.gmra.mxu1 %vm6932_vm8, %v2292_v58  ;;  %6967 = vst [vmem:[#allocation16_spill] sm:$0xff] %v6133_v0 }
 0xaf3   :  { %2620 = vmatpush.msra.mxu2 %v2392_v49 }
 0xaf4   :  { %2327 = vmatpush.msrb.mxu3 %v6013_v27  ;;  %v2451_v40 = vpop.f32.mrf.mxu1 }
 0xaf5   :  { %v2452_v4 = vadd.f32 %v4593_v22, %v2451_v40  ;;  %2712 = vmatpush.msrb.mxu2 %v4594_v59  ;;  %v6076_v40 = vld [vmem:[%s6899_s8] ss:$0 sm:$0xff]  ;;  %v6084_v59 = vld [vmem:[%s6892_s1 + $0x158] sm:$0xff] }
 0xaf6   :  { %2328 = vmatpush.msrb.mxu3 %v6020_v62 }
 0xaf7   :  { %2689 = vmatpush.msrb.mxu1 %v2452_v4 }
 0xaf8   :  { %2329 = vmatpush.msrb.mxu3 %v6027_v48 }
 0xaf9   :  { %4362 = vmatmul.msk.f32.vlgmr.msra.gmra.mxu3 %vm201_vm7, %v5843_v7  ;;  %2781 = vmatpush.msra.mxu1 %v4595_v23 }
 0xafa   :  { %2406 = vmatpush.msra.mxu3 %v6035_v54 }
 0xafc   :  { %2407 = vmatpush.msra.mxu3 %v6041_v14 }
 0xafe   :  { %2408 = vmatpush.msra.mxu3 %v6047_v63 }
 0xb00   :  { %2409 = vmatpush.msra.mxu3 %v6053_v13 }
 0xb01   :  { %4365 = vmatmul.msk.f32.vlgmr.msrb.gmra.mxu3 %vm201_vm7, %v5843_v7 }
 0xb09   :  { %4369 = vmatmul.msk.f32.vlgmr.msra.gmra.mxu3 %vm201_vm7, %v5843_v7 }
 0xb6f   :  { %v2477_v1 = vpop.f32.mrf.mxu2  ;;  %v2555_v49 = vpop.f32.mrf.mxu1 }
 0xb70   :  { %v2558_v58 = vsel %vm6932_vm8, %v2477_v1, -inf  ;;  %v2567_v4 = vsel %vm6932_vm8, %v2555_v49, -inf }
 0xb71   :  { %2559 = vmax.xlane.f32.xlu1 %v2558_v58  ;;  %v6090_v58 = vld [vmem:[%s6892_s1 + $0x150] sm:$0xff] }
 0xb74   :  { %v2010_v37 = vpop.f32.mrf.mxu3 }
 0xb75   :  { %v2011_v5 = vadd.f32 %v6076_v40, %v2010_v37  ;;  %v6096_v37 = vld [vmem:[%s6892_s1 + $0x148] sm:$0xff] }
 0xb77   :  { %v2013_v22 = vmax.f32 %v2011_v5, 0.0  ;;  %v6102_v5 = vld [vmem:[%s6892_s1 + $0x140] sm:$0xff] }
 0xb79   :  { %4359 = vmatmul.msk.f32.vlgmr.msrb.gmra.mxu0 %vm1013_vm13, %v2013_v22  ;;  %2568 = vmax.xlane.f32.xlu1 %v2567_v4  ;;  %v6110_v4 = vld [vmem:[%s6893_s2 + $0x5] ss:$0 sm:$0xff] }
 0xb7a   :  { %2426 = vmatpush.msrb.mxu0 %v6084_v59  ;;  %6964 = vst [vmem:[#allocation11_spill] sm:$0xff] %v6110_v4 }
 0xb7c   :  { %v2271_v23 = vpop.f32.mrf.mxu3  ;;  %2427 = vmatpush.msrb.mxu0 %v6090_v58 }
 0xb7e   :  { %2428 = vmatpush.msrb.mxu0 %v6096_v37 }
 0xb80   :  { %2429 = vmatpush.msrb.mxu0 %v6102_v5 }
 0xb81   :  { %4366 = vmatmul.msk.f32.vlgmr.msra.gmra.mxu0 %vm201_vm7, %v5843_v7 }
 0xb84   :  { %v2331_v22 = vpop.f32.mrf.mxu3 }
 0xb85   :  { %v2332_v33 = vadd.f32 %v6110_v4, %v2331_v22  ;;  %v6127_v22 = vld [vmem:[%s6893_s2 + $0x9] ss:$0 sm:$0xff] }
 0xb86   :  { %6966 = vst [vmem:[#allocation15_spill] sm:$0xff] %v6127_v22 }
 0xb87   :  { %4374 = vmatpush.xpose.msk.msrb.mxu3 %vm6932_vm8, %v2332_v33 }
 0xb89   :  { %4370 = vmatmul.msk.f32.vlgmr.msrb.gmra.mxu0 %vm201_vm7, %v5843_v7 }
 0xb8a   :  { %4375 = vmatmul.msk.f32.vlgmr.msrb.gmra.mxu3 %vm6932_vm8, %v2252_v25 }
 0xb8c   :  { %v2411_v8 = vpop.f32.mrf.mxu3 }
 0xb8d   :  { %v2412_v61 = vadd.f32 %v6127_v22, %v2411_v8  ;;  %v6155_v22 = vld [vmem:[%s6893_s2 + $0xa] ss:$0 sm:$0xff] }
 0xb8e   :  { %6971 = vst [vmem:[#allocation20_spill] sm:$0xff] %v6155_v22 }
 0xb8f   :  { %2643 = vmatpush.msra.mxu3 %v2412_v61  ;;  %v6148_v61 = vld [vmem:[%s6893_s2 + $0x2] ss:$0 sm:$0xff] }
 0xb90   :  { %6970 = vst [vmem:[#allocation19_spill] sm:$0xff] %v6148_v61  ;;  %v2272_v8 = vadd.f32 %v6148_v61, %v2271_v23 }
 0xb91   :  { %2735 = vmatpush.msrb.mxu3 %v6133_v0 }
 0xbe4   :  { %v2560_v25 = vpop.xlane.xlu1 %2559 }
 0xbe5   :  { %v2570_v19 = vsub.f32 %v2477_v1, %v2560_v25 }
 0xbe7   :  { %v2574_v0 = vmul.f32 1.442695, %v2570_v19 }
 0xbe9   :  { %4483 = vpow2.f32 %v2574_v0 }
 0xbf6   :  { %v6136_v33 = vpop.f32.mrf.mxu0 }
 0xbf7   :  { %6968 = vst [vmem:[#allocation17_spill] sm:$0xff] %v6136_v33 }
 0xbfe   :  { %v2351_v7 = vpop.f32.mrf.mxu0 }
 0xbff   :  { %v2352_v10 = vadd.f32 %v6141_v35, %v2351_v7 }
 0xc01   :  { %4376 = vmatpush.xpose.msk.msra.mxu0 %vm6932_vm8, %v2352_v10  ;;  %v2569_v10 = vpop.xlane.xlu1 %2568 }
 0xc02   :  { %v2573_v1 = vsub.f32 %v2555_v49, %v2569_v10 }
 0xc04   :  { %4377 = vmatmul.msk.f32.vlgmr.msra.gmra.mxu0 %vm6932_vm8, %v2272_v8  ;;  %v2580_v25 = vmul.f32 1.442695, %v2573_v1  ;;  %v4484_v8 = vpop.eup %4483 }
 0xc06   :  { %v2431_v33 = vpop.f32.mrf.mxu0  ;;  %4485 = vpow2.f32 %v2580_v25 }
 0xc07   :  { %v2432_v7 = vadd.f32 %v6155_v22, %v2431_v33  ;;  %v2582_v33 = vsel %vm6932_vm8, %v4484_v8, 0.0 }
 0xc09   :  { %2666 = vmatpush.msrb.mxu0 %v2432_v7 }
 0xc0b   :  { %2758 = vmatpush.msra.mxu0 %v6161_v17 }
 0xc0c   :  { %v4486_v7 = vpop.eup %4485 }
 0xc0d   :  { %v2503_v23 = vpop.f32.mrf.mxu3  ;;  %v2591_v22 = vsel %vm6932_vm8, %v4486_v7, 0.0 }
 0xc0e   :  { %v2561_v19 = vsel %vm6932_vm8, %v2503_v23, -inf }
 0xc0f   :  { %2562 = vmax.xlane.f32.xlu2 %v2561_v19 }
 0xc17   :  { %2583 = vadd.xlane.f32.xlu2 %v2582_v33 }
 0xc1f   :  { %2592 = vadd.xlane.f32.xlu2 %v2591_v22  ;;  %v6173_v22 = vld [vmem:[%s6898_s7 + $0x18] sm:$0xff] }
 0xc81   :  { %v2529_v4 = vpop.f32.mrf.mxu0 }
 0xc82   :  { %v2563_v61 = vpop.xlane.xlu2 %2562  ;;  %v2564_v17 = vsel %vm6932_vm8, %v2529_v4, -inf }
 0xc83   :  { %v2571_v0 = vsub.f32 %v2503_v23, %v2563_v61  ;;  %2565 = vmax.xlane.f32.xlu0 %v2564_v17  ;;  %v6179_v17 = vld [vmem:[%s6898_s7 + $0x10] sm:$0xff] }
 0xc85   :  { %v2576_v49 = vmul.f32 1.442695, %v2571_v0 }
 0xc87   :  { %4487 = vpow2.f32 %v2576_v49 }
 0xc8a   :  { %v2584_v10 = vpop.xlane.xlu2 %2583 }
 0xc8b   :  { %4489 = vrcp.f32 %v2584_v10 }
 0xc8d   :  { %v4488_v1 = vpop.eup %4487 }
 0xc8e   :  { %v2585_v19 = vsel %vm6932_vm8, %v4488_v1, 0.0 }
 0xc8f   :  { %2586 = vadd.xlane.f32.xlu0 %v2585_v19 }
 0xc91   :  { %v4490_v25 = vpop.eup %4489 }
 0xc92   :  { %v2598_v33 = vmul.f32 %v4490_v25, %v4484_v8  ;;  %v2593_v35 = vpop.xlane.xlu2 %2592  ;;  %v6191_v8 = vld [vmem:[%s6898_s7] sm:$0xff] }
 0xc93   :  { %4491 = vrcp.f32 %v2593_v35  ;;  %v6185_v35 = vld [vmem:[%s6898_s7 + $0x8] sm:$0xff] }
 0xc94   :  { %4380 = vmatmul.msk.f32.vlgmr.msra.gmra.mxu2 %vm6932_vm8, %v2598_v33 }
 0xc95   :  { %3014 = vmatpush.msra.mxu2 %v6173_v22 }
 0xc97   :  { %3015 = vmatpush.msra.mxu2 %v6179_v17 }
 0xc99   :  { %v4492_v61 = vpop.eup %4491  ;;  %3016 = vmatpush.msra.mxu2 %v6185_v35 }
 0xc9a   :  { %v2601_v23 = vmul.f32 %v4492_v61, %v4486_v7 }
 0xc9b   :  { %3017 = vmatpush.msra.mxu2 %v6191_v8 }
 0xc9c   :  { %4383 = vmatmul.msk.f32.vlgmr.msrb.gmra.mxu1 %vm6932_vm8, %v2601_v23  ;;  %v6234_v23 = vld [vmem:[%s6900_s9 + $0x10] sm:$0xff] }
 0xc9d   :  { %3284 = vmatpush.msrb.mxu1 %v5596_v42  ;;  %v6204_v42 = vld [vmem:[%s6900_s9 + $0x38] sm:$0xff] }
 0xc9f   :  { %3285 = vmatpush.msrb.mxu1 %v5608_v39  ;;  %v6210_v39 = vld [vmem:[%s6900_s9 + $0x30] sm:$0xff] }
 0xca1   :  { %3286 = vmatpush.msrb.mxu1 %v5620_v57  ;;  %v6216_v57 = vld [vmem:[%s6900_s9 + $0x28] sm:$0xff] }
 0xca3   :  { %3287 = vmatpush.msrb.mxu1 %v5632_v12  ;;  %v6222_v12 = vld [vmem:[%s6900_s9 + $0x20] sm:$0xff] }
 0xcf6   :  { %v2566_v0 = vpop.xlane.xlu0 %2565 }
 0xcf7   :  { %v2572_v49 = vsub.f32 %v2529_v4, %v2566_v0  ;;  %v6228_v4 = vld [vmem:[%s6900_s9 + $0x18] sm:$0xff] }
 0xcf9   :  { %v2578_v7 = vmul.f32 1.442695, %v2572_v49  ;;  %v6241_v49 = vld [vmem:[%s6900_s9 + $0x8] sm:$0xff] }
 0xcfb   :  { %4493 = vpow2.f32 %v2578_v7  ;;  %v6249_v7 = vld [vmem:[%s6900_s9] sm:$0xff] }
 0xd01   :  { %v4494_v10 = vpop.eup %4493 }
 0xd02   :  { %v2587_v19 = vpop.xlane.xlu0 %2586  ;;  %v2588_v25 = vsel %vm6932_vm8, %v4494_v10, 0.0 }
 0xd03   :  { %4495 = vrcp.f32 %v2587_v19  ;;  %2589 = vadd.xlane.f32.xlu1 %v2588_v25 }
 0xd09   :  { %v4496_v33 = vpop.eup %4495 }
 0xd0a   :  { %v2599_v61 = vmul.f32 %v4496_v33, %v4488_v1 }
 0xd0c   :  { %4381 = vmatmul.msk.f32.vlgmr.msra.gmra.mxu3 %vm6932_vm8, %v2599_v61 }
 0xd0d   :  { %3034 = vmatpush.msra.mxu3 %v6204_v42 }
 0xd0f   :  { %3035 = vmatpush.msra.mxu3 %v6210_v39 }
 0xd11   :  { %3036 = vmatpush.msra.mxu3 %v6216_v57 }
 0xd13   :  { %3037 = vmatpush.msra.mxu3 %v6222_v12 }
 0xd15   :  { %3038 = vmatpush.msra.mxu3 %v6228_v4 }
 0xd17   :  { %v2622_v1 = vpop.f32.mrf.mxu2  ;;  %3039 = vmatpush.msra.mxu3 %v6234_v23 }
 0xd18   :  { %4384 = vmatmul.msk.f32.vlgmr.msrb.gmra.mxu2 %vm6932_vm8, %v2622_v1 }
 0xd19   :  { %v2691_v0 = vpop.f32.mrf.mxu1  ;;  %3040 = vmatpush.msra.mxu3 %v6241_v49  ;;  %3304 = vmatpush.msrb.mxu2 %v5670_v24 }
 0xd1a   :  { %4387 = vmatmul.msk.f32.vlgmr.msra.gmra.mxu1 %vm6932_vm8, %v2691_v0 }
 0xd1b   :  { %3041 = vmatpush.msra.mxu3 %v6249_v7  ;;  %3305 = vmatpush.msrb.mxu2 %v5677_v29 }
 0xd1c   :  { %3344 = vmatpush.msra.mxu1 %v5714_v26 }
 0xd1d   :  { %3306 = vmatpush.msrb.mxu2 %v5689_v6 }
 0xd1e   :  { %3345 = vmatpush.msra.mxu1 %v5726_v31 }
 0xd1f   :  { %3307 = vmatpush.msrb.mxu2 %v5701_v53 }
 0xd20   :  { %3346 = vmatpush.msra.mxu1 %v5732_v60 }
 0xd22   :  { %3347 = vmatpush.msra.mxu1 %v5738_v21 }
 0xd76   :  { %v2590_v24 = vpop.xlane.xlu1 %2589 }
 0xd77   :  { %4497 = vrcp.f32 %v2590_v24 }
 0xd7d   :  { %v4498_v19 = vpop.eup %4497 }
 0xd7e   :  { %v2600_v25 = vmul.f32 %v4498_v19, %v4494_v10 }
 0xd80   :  { %4382 = vmatmul.msk.f32.vlgmr.msrb.gmra.mxu0 %vm6932_vm8, %v2600_v25 }
 0xd81   :  { %3264 = vmatpush.msrb.mxu0 %v5602_v56 }
 0xd83   :  { %3265 = vmatpush.msrb.mxu0 %v5614_v32 }
 0xd85   :  { %3266 = vmatpush.msrb.mxu0 %v5626_v50 }
 0xd87   :  { %3267 = vmatpush.msrb.mxu0 %v5638_v46 }
 0xd8f   :  { %v2645_v29 = vpop.f32.mrf.mxu3 }
 0xd90   :  { %4385 = vmatmul.msk.f32.vlgmr.msrb.gmra.mxu3 %vm6932_vm8, %v2645_v29 }
 0xd91   :  { %3384 = vmatpush.msrb.mxu3 %v5645_v34 }
 0xd93   :  { %3385 = vmatpush.msrb.mxu3 %v5651_v47 }
 0xd95   :  { %3386 = vmatpush.msrb.mxu3 %v5657_v51 }
 0xd97   :  { %3387 = vmatpush.msrb.mxu3 %v5663_v15  ;;  %v2783_v34 = vpop.f32.mrf.mxu1 }
 0xd9b   :  { %v2714_v32 = vpop.f32.mrf.mxu2 }
 0xd9c   :  { %v2786_v46 = vsel %vm201_vm7, %v2714_v32, 0.0 }
 0xdfd   :  { %v2668_v6 = vpop.f32.mrf.mxu0 }
 0xdfe   :  { %4386 = vmatmul.msk.f32.vlgmr.msra.gmra.mxu0 %vm6932_vm8, %v2668_v6 }
 0xdff   :  { %3324 = vmatpush.msra.mxu0 %v5683_v18  ;;  %v2791_v18 = vsel %vm201_vm7, %v2783_v34, 0.0 }
 0xe01   :  { %3325 = vmatpush.msra.mxu0 %v5695_v9 }
 0xe03   :  { %3326 = vmatpush.msra.mxu0 %v5708_v55 }
 0xe05   :  { %3327 = vmatpush.msra.mxu0 %v5720_v2 }
 0xe13   :  { %v2737_v56 = vpop.f32.mrf.mxu3 }
 0xe14   :  { %v2787_v50 = vsel %vm201_vm7, %v2737_v56, 0.0 }
 0xe15   :  { %v2788_v47 = vadd.f32 %v2787_v50, %v2786_v46 }
 0xe7b   :  { %v2760_v51 = vpop.f32.mrf.mxu0 }
 0xe7c   :  { %v2789_v15 = vsel %vm201_vm7, %v2760_v51, 0.0 }
 0xe7d   :  { %v2790_v53 = vadd.f32 %v2789_v15, %v2788_v47 }
 0xe7f   :  { %v2792_v26 = vadd.f32 %v2791_v18, %v2790_v53 }
 0xe81   :  { %v2793_v9 = vadd.f32 %v5748_v16, %v2792_v26 }
 0xe83   :  { %v2801_v55 = vrot.slane %v2793_v9, 6  ;;  %v2795_v31 = vrot.slane %v2793_v9, 7  ;;  %v2796_v2 = vrot.slane %v2793_v9, 1  ;;  %v2797_v60 = vrot.slane %v2793_v9, 2 }
 0xe84   :  { %v2798_v21 = vrot.slane %v2793_v9, 3  ;;  %v2799_v10 = vrot.slane %v2793_v9, 4  ;;  %v2800_v33 = vrot.slane %v2793_v9, 5  ;;  %v2811_v61 = vadd.f32 %v5815_v20, %v2793_v9 }
 0xe85   :  { %v2817_v1 = vadd.f32 %v5836_v41, %v2801_v55  ;;  %v2810_v0 = vadd.f32 %v5791_v30, %v2795_v31  ;;  %v2812_v24 = vadd.f32 %v5797_v36, %v2796_v2  ;;  %v2813_v19 = vadd.f32 %v5803_v52, %v2797_v60 }
 0xe86   :  { %v2814_v16 = vadd.f32 %v5809_v11, %v2798_v21  ;;  %v2815_v25 = vadd.f32 %v5822_v45, %v2799_v10  ;;  %v2826_v29 = vrot.slane %v2811_v61, 7  ;;  %v2816_v56 = vadd.f32 %v5829_v44, %v2800_v33 }
 0xe87   :  { %v2838_v6 = vrot.slane %v2817_v1, 1  ;;  %v2828_v32 = vrot.slane %v2812_v24, 6  ;;  %v2830_v50 = vrot.slane %v2813_v19, 5 }
 0xe88   :  { %v2827_v20 = vsel %vm184_vm1, %v2826_v29, %v2810_v0  ;;  %v2832_v36 = vrot.slane %v2814_v16, 4  ;;  %v2834_v46 = vrot.slane %v2815_v25, 3  ;;  %v2836_v45 = vrot.slane %v2816_v56, 2 }
 0xe89   :  { %v2846_v41 = vsel %vm2845_vm14, %v2838_v6, 0.0  ;;  %v2829_v30 = vsel %vm187_vm2, %v2828_v32, %v2827_v20 }
 0xe8a   :  { %2847 = vadd.xlane.f32.xlu1 %v2846_v41  ;;  %v2831_v52 = vsel %vm190_vm3, %v2830_v50, %v2829_v30 }
 0xe8b   :  { %v2833_v11 = vsel %vm193_vm4, %v2832_v36, %v2831_v52 }
 0xe8c   :  { %v2835_v34 = vsel %vm196_vm5, %v2834_v46, %v2833_v11 }
 0xe8d   :  { %v2837_v44 = vsel %vm199_vm6, %v2836_v45, %v2835_v34 }
 0xe8e   :  { %v2842_v47 = vsel %vm6933_vm15, %v2837_v44, 0.0 }
 0xe8f   :  { %2843 = vadd.xlane.f32.xlu0 %v2842_v47 }
 0xefd   :  { %v2848_v51 = vpop.xlane.xlu1 %2847 }
 0xefe   :  { %v2850_v15 = vmul.f32 %v2848_v51, %v5246_v38 }
 0xf00   :  { %v2859_v53 = vrot.slane %v2850_v15, 7 }
 0xf02   :  { %v6296_v18 = vsub.f32 %v2817_v1, %v2859_v53  ;;  %v2844_v26 = vpop.xlane.xlu0 %2843 }
 0xf03   :  { %v2849_v9 = vmul.f32 %v2844_v26, %v5246_v38 }
 0xf04   :  { %v2883_v55 = vmul.f32 %v6296_v18, %v6296_v18 }
 0xf05   :  { %v2853_v31 = vrot.slane %v2849_v9, 1  ;;  %v2854_v2 = vrot.slane %v2849_v9, 2  ;;  %v2855_v60 = vrot.slane %v2849_v9, 3  ;;  %v2856_v21 = vrot.slane %v2849_v9, 4 }
 0xf06   :  { %v2904_v10 = vrot.slane %v2883_v55, 1  ;;  %v2857_v33 = vrot.slane %v2849_v9, 5  ;;  %v2858_v29 = vrot.slane %v2849_v9, 6  ;;  %v6301_v6 = vsub.f32 %v2810_v0, %v2849_v9 }
 0xf07   :  { %v6303_v32 = vsub.f32 %v2811_v61, %v2853_v31  ;;  %v6305_v50 = vsub.f32 %v2812_v24, %v2854_v2  ;;  %v6307_v1 = vsub.f32 %v2813_v19, %v2855_v60  ;;  %v6309_v20 = vsub.f32 %v2814_v16, %v2856_v21 }
 0xf08   :  { %v2910_v41 = vsel %vm2845_vm14, %v2904_v10, 0.0  ;;  %v6312_v30 = vsub.f32 %v2815_v25, %v2857_v33  ;;  %v6314_v36 = vsub.f32 %v2816_v56, %v2858_v29  ;;  %v2876_v19 = vmul.f32 %v6301_v6, %v6301_v6 }
 0xf09   :  { %2911 = vadd.xlane.f32.xlu0 %v2910_v41  ;;  %v2877_v52 = vmul.f32 %v6303_v32, %v6303_v32  ;;  %v2878_v61 = vmul.f32 %v6305_v50, %v6305_v50  ;;  %v2879_v0 = vmul.f32 %v6307_v1, %v6307_v1  ;;  %v2880_v24 = vmul.f32 %v6309_v20, %v6309_v20 }
 0xf0a   :  { %v2881_v16 = vmul.f32 %v6312_v30, %v6312_v30  ;;  %v2882_v46 = vmul.f32 %v6314_v36, %v6314_v36 }
 0xf0b   :  { %v2892_v25 = vrot.slane %v2877_v52, 7  ;;  %v2894_v56 = vrot.slane %v2878_v61, 6  ;;  %v2896_v45 = vrot.slane %v2879_v0, 5  ;;  %v2898_v44 = vrot.slane %v2880_v24, 4 }
 0xf0c   :  { %v2900_v51 = vrot.slane %v2881_v16, 3  ;;  %v2902_v53 = vrot.slane %v2882_v46, 2 }
 0xf0d   :  { %v2893_v11 = vsel %vm184_vm1, %v2892_v25, %v2876_v19 }
 0xf0e   :  { %v2895_v34 = vsel %vm187_vm2, %v2894_v56, %v2893_v11 }
 0xf0f   :  { %v2897_v47 = vsel %vm190_vm3, %v2896_v45, %v2895_v34 }
 0xf10   :  { %v2899_v15 = vsel %vm193_vm4, %v2898_v44, %v2897_v47 }
 0xf11   :  { %v2901_v26 = vsel %vm196_vm5, %v2900_v51, %v2899_v15 }
 0xf12   :  { %v2903_v9 = vsel %vm199_vm6, %v2902_v53, %v2901_v26 }
 0xf13   :  { %v2907_v55 = vsel %vm6933_vm15, %v2903_v9, 0.0 }
 0xf14   :  { %2908 = vadd.xlane.f32.xlu2 %v2907_v55 }
 0xf7c   :  { %v2912_v31 = vpop.xlane.xlu0 %2911 }
 0xf7d   :  { %v2914_v2 = vmul.f32 %v2912_v31, %v5246_v38 }
 0xf7f   :  { %v2916_v60 = vadd.f32 1e-05, %v2914_v2 }
 0xf81   :  { %4499 = vrsqrt.f32 %v2916_v60  ;;  %vm2933_vm10 = vweird.f32 %v2916_v60 }
 0xf87   :  { %v4500_v21 = vpop.eup %4499  ;;  %v2909_v10 = vpop.xlane.xlu2 %2908 }
 0xf88   :  { %v2928_v33 = vmul.f32 %v4500_v21, %v2916_v60  ;;  %v2913_v29 = vmul.f32 %v2909_v10, %v5246_v38  ;;  %vm2934_vm9 = vweird.f32 %v4500_v21 }
 0xf89   :  { %vm2935_vm11 = vmor %vm2933_vm10, %vm2934_vm9 }
 0xf8a   :  { %v2929_v41 = vmul.f32 %v4500_v21, %v2928_v33  ;;  %v2915_v52 = vadd.f32 1e-05, %v2913_v29 }
 0xf8c   :  { %v2930_v61 = vmul.f32 0.5, %v2929_v41  ;;  %4501 = vrsqrt.f32 %v2915_v52  ;;  %vm2923_vm8 = vweird.f32 %v2915_v52 }
 0xf8e   :  { %v2931_v0 = vsub.f32 1.5, %v2930_v61 }
 0xf90   :  { %v2932_v16 = vmul.f32 %v4500_v21, %v2931_v0 }
 0xf92   :  { %v4502_v24 = vpop.eup %4501  ;;  %v2936_v46 = vsel %vm2935_vm11, %v4500_v21, %v2932_v16 }
 0xf93   :  { %v2918_v19 = vmul.f32 %v4502_v24, %v2915_v52  ;;  %vm2924_vm12 = vweird.f32 %v4502_v24  ;;  %v2945_v45 = vrot.slane %v2936_v46, 7 }
 0xf94   :  { %vm2925_vm15 = vmor %vm2923_vm8, %vm2924_vm12  ;;  %vm6973_vm8 = vcmask 261121  }
 0xf95   :  { %v2919_v25 = vmul.f32 %v4502_v24, %v2918_v19  ;;  %v2961_v26 = vmul.f32 %v2945_v45, %v6296_v18 }
 0xf97   :  { %v2920_v56 = vmul.f32 0.5, %v2919_v25 }
 0xf99   :  { %v2921_v11 = vsub.f32 1.5, %v2920_v56 }
 0xf9b   :  { %v2922_v34 = vmul.f32 %v4502_v24, %v2921_v11 }
 0xf9d   :  { %v2926_v44 = vsel %vm2925_vm15, %v4502_v24, %v2922_v34  ;;  %vm6974_vm15 = vmmov %vm6973_vm8 }
 0xf9e   :  { %v2939_v47 = vrot.slane %v2926_v44, 1  ;;  %v2940_v51 = vrot.slane %v2926_v44, 2  ;;  %v2941_v15 = vrot.slane %v2926_v44, 3  ;;  %v2942_v53 = vrot.slane %v2926_v44, 4 }
 0xf9f   :  { %v2943_v9 = vrot.slane %v2926_v44, 5  ;;  %v2954_v55 = vmul.f32 %v2926_v44, %v6301_v6  ;;  %v2944_v31 = vrot.slane %v2926_v44, 6 }
 0xfa0   :  { %v2955_v2 = vmul.f32 %v2939_v47, %v6303_v32  ;;  %v2956_v60 = vmul.f32 %v2940_v51, %v6305_v50  ;;  %v2957_v21 = vmul.f32 %v2941_v15, %v6307_v1  ;;  %v2958_v10 = vmul.f32 %v2942_v53, %v6309_v20 }
 0xfa1   :  { %v2962_v33 = vmul.f32 %v5941_v43, %v2954_v55  ;;  %v2959_v29 = vmul.f32 %v2943_v9, %v6312_v30  ;;  %v2960_v41 = vmul.f32 %v2944_v31, %v6314_v36  ;;  %v2969_v50 = vmul.f32 %v5941_v43, %v2961_v26 }
 0xfa2   :  { %v2963_v18 = vmul.f32 %v5941_v43, %v2955_v2  ;;  %v2964_v52 = vmul.f32 %v5941_v43, %v2956_v60  ;;  %v2965_v6 = vmul.f32 %v5941_v43, %v2957_v21  ;;  %v2966_v32 = vmul.f32 %v5941_v43, %v2958_v10 }
 0xfa3   :  { %v2970_v1 = vadd.f32 %v5954_v28, %v2962_v33  ;;  %v2967_v20 = vmul.f32 %v5941_v43, %v2959_v29  ;;  %v2968_v61 = vmul.f32 %v5941_v43, %v2960_v41  ;;  %v2977_v11 = vadd.f32 %v5954_v28, %v2969_v50 }
 0xfa4   :  { %v2971_v30 = vadd.f32 %v5954_v28, %v2963_v18  ;;  %v2972_v36 = vadd.f32 %v5954_v28, %v2964_v52  ;;  %v2973_v0 = vadd.f32 %v5954_v28, %v2965_v6  ;;  %v2974_v24 = vadd.f32 %v5954_v28, %v2966_v32 }
 0xfa5   :  { %v2975_v19 = vadd.f32 %v5954_v28, %v2967_v20  ;;  %v2986_v16 = vrot.slane %v2970_v1, 1  ;;  %v2976_v25 = vadd.f32 %v5954_v28, %v2968_v61  ;;  %v2998_v26 = vrot.slane %v2977_v11, 2 }
 0xfa6   :  { %v2988_v56 = vrot.slane %v2972_v36, 7  ;;  %v2990_v46 = vrot.slane %v2973_v0, 6  ;;  %v2992_v34 = vrot.slane %v2974_v24, 5 }
 0xfa7   :  { %v2987_v45 = vsel %vm181_vm0, %v2971_v30, %v2986_v16  ;;  %v2994_v47 = vrot.slane %v2975_v19, 4  ;;  %v2996_v15 = vrot.slane %v2976_v25, 3 }
 0xfa8   :  { %v2989_v43 = vsel %vm184_vm1, %v2988_v56, %v2987_v45 }
 0xfa9   :  { %v2991_v44 = vsel %vm187_vm2, %v2990_v46, %v2989_v43 }
 0xfaa   :  { %v2993_v51 = vsel %vm190_vm3, %v2992_v34, %v2991_v44 }
 0xfab   :  { %v2995_v53 = vsel %vm193_vm4, %v2994_v47, %v2993_v51 }
 0xfac   :  { %v2997_v9 = vsel %vm196_vm5, %v2996_v15, %v2995_v53 }
 0xfad   :  { %v2999_v55 = vsel %vm199_vm6, %v2998_v26, %v2997_v9 }
 0xfae   :  { %4388 = vmatmul.msk.f32.vlgmr.msra.gmra.mxu2 %vm201_vm7, %v2999_v55 }
 0xfaf   :  { %3364 = vmatpush.msra.mxu2 %v6003_v3 }
 0xfb1   :  { %3365 = vmatpush.msra.mxu2 %v6013_v27  ;;  %v6384_v27 = vld [vmem:[%s6901_s10] ss:$0 sm:$0xff] }
 0xfb3   :  { %3366 = vmatpush.msra.mxu2 %v6020_v62 }
 0xfb5   :  { %3367 = vmatpush.msra.mxu2 %v6027_v48 }
0x1031   :  { %v3019_v28 = vpop.f32.mrf.mxu2 }
0x1032   :  { %v3020_v31 = vadd.f32 %v6076_v40, %v3019_v28 }
0x1034   :  { %v3022_v2 = vmax.f32 %v3020_v31, 0.0 }
0x1036   :  { %4389 = vmatmul.msk.f32.vlgmr.msra.gmra.mxu3 %vm1013_vm13, %v3022_v2 }
0x1037   :  { %3464 = vmatpush.msra.mxu3 %v6084_v59 }
0x1039   :  { %3465 = vmatpush.msra.mxu3 %v6090_v58 }
0x103b   :  { %3466 = vmatpush.msra.mxu3 %v6096_v37 }
0x103d   :  { %3467 = vmatpush.msra.mxu3 %v6102_v5 }
0x10b9   :  { %v3043_v3 = vpop.f32.mrf.mxu3 }
0x10ba   :  { %v3044_v62 = vadd.f32 %v6384_v27, %v3043_v3 }
0x10bc   :  { %v3053_v48 = vrot.slane %v3044_v62, 6  ;;  %v3047_v40 = vrot.slane %v3044_v62, 7  ;;  %v3048_v60 = vrot.slane %v3044_v62, 1  ;;  %v3049_v21 = vrot.slane %v3044_v62, 2 }
0x10bd   :  { %v3050_v10 = vrot.slane %v3044_v62, 3  ;;  %v3051_v59 = vrot.slane %v3044_v62, 4  ;;  %v3052_v33 = vrot.slane %v3044_v62, 5  ;;  %v3063_v58 = vadd.f32 %v3044_v62, %v2971_v30 }
0x10be   :  { %v3069_v29 = vadd.f32 %v3053_v48, %v2977_v11  ;;  %v3062_v37 = vadd.f32 %v3047_v40, %v2970_v1  ;;  %v3064_v41 = vadd.f32 %v3048_v60, %v2972_v36  ;;  %v3065_v5 = vadd.f32 %v3049_v21, %v2973_v0 }
0x10bf   :  { %v3066_v18 = vadd.f32 %v3050_v10, %v2974_v24  ;;  %v3067_v52 = vadd.f32 %v3051_v59, %v2975_v19  ;;  %v3078_v6 = vrot.slane %v3063_v58, 7  ;;  %v3068_v50 = vadd.f32 %v3052_v33, %v2976_v25 }
0x10c0   :  { %v3090_v32 = vrot.slane %v3069_v29, 1  ;;  %v3080_v20 = vrot.slane %v3064_v41, 6  ;;  %v3082_v61 = vrot.slane %v3065_v5, 5 }
0x10c1   :  { %v3079_v16 = vsel %vm184_vm1, %v3078_v6, %v3062_v37  ;;  %v3084_v45 = vrot.slane %v3066_v18, 4  ;;  %v3086_v1 = vrot.slane %v3067_v52, 3  ;;  %v3088_v0 = vrot.slane %v3068_v50, 2 }
0x10c2   :  { %v3096_v56 = vsel %vm2845_vm14, %v3090_v32, 0.0  ;;  %v3081_v46 = vsel %vm187_vm2, %v3080_v20, %v3079_v16 }
0x10c3   :  { %3097 = vadd.xlane.f32.xlu2 %v3096_v56  ;;  %v3083_v30 = vsel %vm190_vm3, %v3082_v61, %v3081_v46 }
0x10c4   :  { %v3085_v36 = vsel %vm193_vm4, %v3084_v45, %v3083_v30 }
0x10c5   :  { %v3087_v24 = vsel %vm196_vm5, %v3086_v1, %v3085_v36 }
0x10c6   :  { %v3089_v19 = vsel %vm199_vm6, %v3088_v0, %v3087_v24 }
0x10c7   :  { %v3093_v25 = vsel %vm6973_vm8, %v3089_v19, 0.0 }
0x10c8   :  { %3094 = vadd.xlane.f32.xlu1 %v3093_v25 }
0x1136   :  { %v3098_v11 = vpop.xlane.xlu2 %3097 }
0x1137   :  { %v3100_v43 = vmul.f32 %v3098_v11, %v5246_v38 }
0x1139   :  { %v3109_v34 = vrot.slane %v3100_v43, 7 }
0x113b   :  { %v6396_v44 = vsub.f32 %v3069_v29, %v3109_v34  ;;  %v3095_v47 = vpop.xlane.xlu1 %3094 }
0x113c   :  { %v3099_v51 = vmul.f32 %v3095_v47, %v5246_v38 }
0x113d   :  { %v3133_v15 = vmul.f32 %v6396_v44, %v6396_v44 }
0x113e   :  { %v3103_v53 = vrot.slane %v3099_v51, 1  ;;  %v3104_v26 = vrot.slane %v3099_v51, 2  ;;  %v3105_v9 = vrot.slane %v3099_v51, 3  ;;  %v3106_v55 = vrot.slane %v3099_v51, 4 }
0x113f   :  { %v3154_v28 = vrot.slane %v3133_v15, 1  ;;  %v3107_v31 = vrot.slane %v3099_v51, 5  ;;  %v3108_v2 = vrot.slane %v3099_v51, 6  ;;  %v6401_v3 = vsub.f32 %v3062_v37, %v3099_v51 }
0x1140   :  { %v6403_v62 = vsub.f32 %v3063_v58, %v3103_v53  ;;  %v6405_v48 = vsub.f32 %v3064_v41, %v3104_v26  ;;  %v6407_v40 = vsub.f32 %v3065_v5, %v3105_v9  ;;  %v6409_v60 = vsub.f32 %v3066_v18, %v3106_v55 }
0x1141   :  { %v3160_v21 = vsel %vm2845_vm14, %v3154_v28, 0.0  ;;  %v6412_v10 = vsub.f32 %v3067_v52, %v3107_v31  ;;  %v6414_v59 = vsub.f32 %v3068_v50, %v3108_v2  ;;  %v3126_v41 = vmul.f32 %v6401_v3, %v6401_v3 }
0x1142   :  { %3161 = vadd.xlane.f32.xlu1 %v3160_v21  ;;  %v3127_v33 = vmul.f32 %v6403_v62, %v6403_v62  ;;  %v3128_v58 = vmul.f32 %v6405_v48, %v6405_v48  ;;  %v3129_v29 = vmul.f32 %v6407_v40, %v6407_v40  ;;  %v3130_v37 = vmul.f32 %v6409_v60, %v6409_v60 }
0x1143   :  { %v3131_v5 = vmul.f32 %v6412_v10, %v6412_v10  ;;  %v3132_v6 = vmul.f32 %v6414_v59, %v6414_v59 }
0x1144   :  { %v3142_v18 = vrot.slane %v3127_v33, 7  ;;  %v3144_v52 = vrot.slane %v3128_v58, 6  ;;  %v3146_v50 = vrot.slane %v3129_v29, 5  ;;  %v3148_v61 = vrot.slane %v3130_v37, 4 }
0x1145   :  { %v3150_v56 = vrot.slane %v3131_v5, 3  ;;  %v3152_v45 = vrot.slane %v3132_v6, 2 }
0x1146   :  { %v3143_v32 = vsel %vm184_vm1, %v3142_v18, %v3126_v41 }
0x1147   :  { %v3145_v20 = vsel %vm187_vm2, %v3144_v52, %v3143_v32 }
0x1148   :  { %v3147_v16 = vsel %vm190_vm3, %v3146_v50, %v3145_v20 }
0x1149   :  { %v3149_v46 = vsel %vm193_vm4, %v3148_v61, %v3147_v16 }
0x114a   :  { %v3151_v30 = vsel %vm196_vm5, %v3150_v56, %v3149_v46 }
0x114b   :  { %v3153_v1 = vsel %vm199_vm6, %v3152_v45, %v3151_v30 }
0x114c   :  { %v3157_v36 = vsel %vm6974_vm15, %v3153_v1, 0.0 }
0x114d   :  { %3158 = vadd.xlane.f32.xlu0 %v3157_v36 }
0x11b5   :  { %v3162_v0 = vpop.xlane.xlu1 %3161 }
0x11b6   :  { %v3164_v24 = vmul.f32 %v3162_v0, %v5246_v38 }
0x11b8   :  { %v3166_v19 = vadd.f32 1e-05, %v3164_v24 }
0x11ba   :  { %4503 = vrsqrt.f32 %v3166_v19  ;;  %vm3183_vm10 = vweird.f32 %v3166_v19 }
0x11c0   :  { %v4504_v25 = vpop.eup %4503  ;;  %v3159_v11 = vpop.xlane.xlu0 %3158 }
0x11c1   :  { %v3178_v43 = vmul.f32 %v4504_v25, %v3166_v19  ;;  %v3163_v34 = vmul.f32 %v3159_v11, %v5246_v38  ;;  %vm3184_vm9 = vweird.f32 %v4504_v25 }
0x11c2   :  { %vm3185_vm11 = vmor %vm3183_vm10, %vm3184_vm9  ;;  %vm6976_vm9 = vcmask 64512  }
0x11c3   :  { %v3179_v47 = vmul.f32 %v4504_v25, %v3178_v43  ;;  %v3165_v51 = vadd.f32 1e-05, %v3163_v34  ;;  %vm6978_vm10 = vmmov %vm6976_vm9 }
0x11c5   :  { %v3180_v15 = vmul.f32 0.5, %v3179_v47  ;;  %4505 = vrsqrt.f32 %v3165_v51  ;;  %vm3173_vm8 = vweird.f32 %v3165_v51 }
0x11c7   :  { %v3181_v53 = vsub.f32 1.5, %v3180_v15 }
0x11c9   :  { %v3182_v55 = vmul.f32 %v4504_v25, %v3181_v53 }
0x11cb   :  { %v4506_v26 = vpop.eup %4505  ;;  %v3186_v2 = vsel %vm3185_vm11, %v4504_v25, %v3182_v55  ;;  %vm6979_vm11 = vmmov %vm6976_vm9 }
0x11cc   :  { %v3168_v9 = vmul.f32 %v4506_v26, %v3165_v51  ;;  %vm3174_vm12 = vweird.f32 %v4506_v26  ;;  %v3195_v33 = vrot.slane %v3186_v2, 7 }
0x11cd   :  { %vm3175_vm15 = vmor %vm3173_vm8, %vm3174_vm12 }
0x11ce   :  { %v3169_v28 = vmul.f32 %v4506_v26, %v3168_v9  ;;  %v3211_v52 = vmul.f32 %v3195_v33, %v6396_v44  ;;  %v4622_v44 = vld [vmem:[%s6902_s11] ss:$0 sm:$0xff]  ;;  %vm6980_vm12 = vmmov %vm6976_vm9 }
0x11cf   :  { %vm6983_vm8 = vmmov %vm6976_vm9 }
0x11d0   :  { %v3170_v31 = vmul.f32 0.5, %v3169_v28 }
0x11d2   :  { %v3171_v21 = vsub.f32 1.5, %v3170_v31 }
0x11d4   :  { %v3172_v58 = vmul.f32 %v4506_v26, %v3171_v21 }
0x11d6   :  { %v3176_v29 = vsel %vm3175_vm15, %v4506_v26, %v3172_v58  ;;  %vm6985_vm15 = vmmov %vm6983_vm8 }
0x11d7   :  { %v3189_v37 = vrot.slane %v3176_v29, 1  ;;  %v3190_v41 = vrot.slane %v3176_v29, 2  ;;  %v3191_v5 = vrot.slane %v3176_v29, 3  ;;  %v3192_v18 = vrot.slane %v3176_v29, 4 }
0x11d8   :  { %v3193_v6 = vrot.slane %v3176_v29, 5  ;;  %v3194_v32 = vrot.slane %v3176_v29, 6  ;;  %v3204_v50 = vmul.f32 %v3176_v29, %v6401_v3 }
0x11d9   :  { %v3205_v20 = vmul.f32 %v3189_v37, %v6403_v62  ;;  %v3206_v61 = vmul.f32 %v3190_v41, %v6405_v48  ;;  %v3207_v16 = vmul.f32 %v3191_v5, %v6407_v40  ;;  %v3208_v56 = vmul.f32 %v3192_v18, %v6409_v60  ;;  %v4623_v40 = vld [vmem:[%s6903_s12] ss:$0 sm:$0xff]  ;;  %v4624_v37 = vld [vmem:[%s6892_s1 + $0xf8] sm:$0xff]  ;;  %v4626_v5 = vld [vmem:[%s6892_s1 + $0xf0] sm:$0xff] }
0x11da   :  { %v3209_v46 = vmul.f32 %v3193_v6, %v6412_v10  ;;  %v3210_v45 = vmul.f32 %v3194_v32, %v6414_v59  ;;  %v3212_v30 = vmul.f32 %v4622_v44, %v3204_v50  ;;  %v3219_v62 = vmul.f32 %v4622_v44, %v3211_v52  ;;  %v4625_v41 = vld [vmem:[%s6892_s1 + $0x118] sm:$0xff]  ;;  %v4627_v18 = vld [vmem:[%s6892_s1 + $0x110] sm:$0xff]  ;;  %v4628_v52 = vld [vmem:[%s6892_s1 + $0xe8] sm:$0xff] }
0x11db   :  { %v3213_v1 = vmul.f32 %v4622_v44, %v3205_v20  ;;  %v3214_v36 = vmul.f32 %v4622_v44, %v3206_v61  ;;  %v3215_v3 = vmul.f32 %v4622_v44, %v3207_v16  ;;  %v3216_v0 = vmul.f32 %v4622_v44, %v3208_v56  ;;  %v4631_v6 = vld [vmem:[%s6892_s1 + $0x100] sm:$0xff]  ;;  %v4633_v32 = vld [vmem:[%s6892_s1 + $0x170] sm:$0xff]  ;;  %v4634_v50 = vld [vmem:[%s6892_s1 + $0x168] sm:$0xff] }
0x11dc   :  { %v3217_v24 = vmul.f32 %v4622_v44, %v3209_v46  ;;  %v3218_v48 = vmul.f32 %v4622_v44, %v3210_v45  ;;  %v6453_v60 = vadd.f32 %v4623_v40, %v3212_v30  ;;  %v6470_v15 = vadd.f32 %v4623_v40, %v3219_v62  ;;  %v6975_v46 = vld [vmem:[#allocation18_spill] sm:$0xff]  ;;  %v4637_v62 = vld [vmem:[%s6893_s2] ss:$0 sm:$0xff] }
0x11dd   :  { %v6455_v10 = vadd.f32 %v4623_v40, %v3213_v1  ;;  %v6457_v59 = vadd.f32 %v4623_v40, %v3214_v36  ;;  %v6459_v19 = vadd.f32 %v4623_v40, %v3215_v3  ;;  %v6461_v25 = vadd.f32 %v4623_v40, %v3216_v0  ;;  %v4636_v1 = vld [vmem:[%s6893_s2 + $0x4] ss:$0 sm:$0xff] }
0x11de   :  { %v6463_v11 = vadd.f32 %v4623_v40, %v3217_v24  ;;  %v3236_v43 = vrot.slane %v6453_v60, 1  ;;  %v6466_v34 = vadd.f32 %v4623_v40, %v3218_v48  ;;  %v3248_v21 = vrot.slane %v6470_v15, 2  ;;  %v6977_v3 = vld [vmem:[#allocation19_spill] sm:$0xff] }
0x11df   :  { %v3238_v47 = vrot.slane %v6457_v59, 7  ;;  %v3240_v51 = vrot.slane %v6459_v19, 6  ;;  %v3242_v9 = vrot.slane %v6461_v25, 5 }
0x11e0   :  { %v3237_v53 = vsel %vm181_vm0, %v6455_v10, %v3236_v43  ;;  %v3244_v28 = vrot.slane %v6463_v11, 4  ;;  %v3246_v2 = vrot.slane %v6466_v34, 3  ;;  %v6981_v43 = vld [vmem:[#allocation11_spill] sm:$0xff] }
0x11e1   :  { %v3239_v26 = vsel %vm184_vm1, %v3238_v47, %v3237_v53 }
0x11e2   :  { %v3241_v55 = vsel %vm187_vm2, %v3240_v51, %v3239_v26  ;;  %v6982_v51 = vld [vmem:[#allocation20_spill] sm:$0xff] }
0x11e3   :  { %v3243_v31 = vsel %vm190_vm3, %v3242_v9, %v3241_v55  ;;  %v4638_v55 = vld [vmem:[%s6893_s2 + $0x7] ss:$0 sm:$0xff] }
0x11e4   :  { %v3245_v33 = vsel %vm193_vm4, %v3244_v28, %v3243_v31  ;;  %v4639_v31 = vld [vmem:[%s6893_s2 + $0x8] ss:$0 sm:$0xff] }
0x11e5   :  { %v3247_v58 = vsel %vm196_vm5, %v3246_v2, %v3245_v33 }
0x11e6   :  { %v3249_v29 = vsel %vm199_vm6, %v3248_v21, %v3247_v58  ;;  %v6984_v21 = vld [vmem:[#allocation12_spill] sm:$0xff]  ;;  %v4640_v58 = vld [vmem:[%s6893_s2 + $0x3] ss:$0 sm:$0xff] }
0x11e7   :  { %4390 = vmatmul.msk.f32.vlgmr.msrb.gmra.mxu0 %vm201_vm7, %v3249_v29  ;;  %4391 = vmatmul.msk.f32.vlgmr.msrb.gmra.mxu1 %vm201_vm7, %v3249_v29 }
0x11e8   :  { %4392 = vmatmul.msk.f32.vlgmr.msrb.gmra.mxu2 %vm201_vm7, %v3249_v29  ;;  %4396 = vmatmul.msk.f32.vlgmr.msrb.gmra.mxu3 %vm201_vm7, %v3249_v29 }
0x11e9   :  { %3404 = vmatpush.msrb.mxu0 %v4624_v37  ;;  %3424 = vmatpush.msrb.mxu1 %v4625_v41  ;;  %v4641_v37 = vld [vmem:[%s6894_s3] sm:$0xff]  ;;  %v6986_v41 = vld [vmem:[#allocation21_spill] sm:$0xff] }
0x11ea   :  { %3444 = vmatpush.msrb.mxu2 %v6035_v54  ;;  %v4629_v54 = vld [vmem:[%s6892_s1 + $0x108] sm:$0xff] }
0x11eb   :  { %3405 = vmatpush.msrb.mxu0 %v4626_v5  ;;  %3425 = vmatpush.msrb.mxu1 %v4627_v18  ;;  %v6989_v18 = vld [vmem:[#allocation15_spill] sm:$0xff] }
0x11ec   :  { %3445 = vmatpush.msrb.mxu2 %v6041_v14  ;;  %v4630_v14 = vld [vmem:[%s6892_s1 + $0xe0] sm:$0xff] }
0x11ed   :  { %3406 = vmatpush.msrb.mxu0 %v4628_v52  ;;  %3426 = vmatpush.msrb.mxu1 %v4629_v54 }
0x11ee   :  { %3446 = vmatpush.msrb.mxu2 %v6047_v63  ;;  %v4632_v63 = vld [vmem:[%s6892_s1 + $0x178] sm:$0xff] }
0x11ef   :  { %4393 = vmatmul.msk.f32.vlgmr.msra.gmra.mxu0 %vm201_vm7, %v3249_v29  ;;  %4394 = vmatmul.msk.f32.vlgmr.msra.gmra.mxu1 %vm201_vm7, %v3249_v29 }
0x11f0   :  { %4395 = vmatmul.msk.f32.vlgmr.msra.gmra.mxu2 %vm201_vm7, %v3249_v29  ;;  %4400 = vmatmul.msk.f32.vlgmr.msra.gmra.mxu3 %vm201_vm7, %v3249_v29 }
0x11f1   :  { %3407 = vmatpush.msrb.mxu0 %v4630_v14  ;;  %3427 = vmatpush.msrb.mxu1 %v4631_v6  ;;  %v4642_v14 = vld [vmem:[%s6893_s2 + $0xb] ss:$0 sm:$0xff] }
0x11f2   :  { %3447 = vmatpush.msrb.mxu2 %v6053_v13  ;;  %v4635_v13 = vld [vmem:[%s6892_s1 + $0x160] sm:$0xff] }
0x11f3   :  { %3484 = vmatpush.msra.mxu0 %v4632_v63  ;;  %v6990_v63 = vld [vmem:[#allocation16_spill] sm:$0xff] }
0x11f5   :  { %3485 = vmatpush.msra.mxu0 %v4633_v32  ;;  %v4643_v32 = vld [vmem:[%s6894_s3 + $0x18] sm:$0xff] }
0x11f7   :  { %3486 = vmatpush.msra.mxu0 %v4634_v50  ;;  %4398 = vmatmul.msk.f32.vlgmr.msrb.gmra.mxu1 %vm201_vm7, %v3249_v29 }
0x11f8   :  { %4397 = vmatmul.msk.f32.vlgmr.msrb.gmra.mxu0 %vm201_vm7, %v3249_v29  ;;  %4399 = vmatmul.msk.f32.vlgmr.msrb.gmra.mxu2 %vm201_vm7, %v3249_v29 }
0x11f9   :  { %3487 = vmatpush.msra.mxu0 %v4635_v13 }
0x1200   :  { %4401 = vmatmul.msk.f32.vlgmr.msra.gmra.mxu0 %vm201_vm7, %v3249_v29 }
0x1264   :  { %v3269_v20 = vpop.f32.mrf.mxu0  ;;  %v3289_v61 = vpop.f32.mrf.mxu1 }
0x1265   :  { %v3270_v24 = vadd.f32 %v4637_v62, %v3269_v20  ;;  %v3290_v33 = vadd.f32 %v6984_v21, %v3289_v61 }
0x126b   :  { %v3309_v16 = vpop.f32.mrf.mxu2  ;;  %v3389_v56 = vpop.f32.mrf.mxu3 }
0x126c   :  { %v3390_v45 = vadd.f32 %v6975_v46, %v3389_v56  ;;  %v3329_v44 = vpop.f32.mrf.mxu0  ;;  %v3349_v30 = vpop.f32.mrf.mxu1  ;;  %v3310_v0 = vadd.f32 %v6977_v3, %v3309_v16 }
0x126d   :  { %v3350_v36 = vadd.f32 %v4636_v1, %v3349_v30  ;;  %v3330_v29 = vadd.f32 %v4640_v58, %v3329_v44 }
0x126e   :  { %4406 = vmatpush.xpose.msk.msrb.mxu3 %vm6976_vm9, %v3390_v45  ;;  %vm6987_vm9 = vmmov %vm6983_vm8 }
0x126f   :  { %4402 = vmatpush.xpose.msk.msra.mxu1 %vm6978_vm10, %v3350_v36  ;;  %vm6988_vm10 = vmmov %vm6983_vm8 }
0x1271   :  { %4407 = vmatmul.msk.f32.vlgmr.msrb.gmra.mxu3 %vm6979_vm11, %v3310_v0  ;;  %vm6991_vm11 = vmmov %vm6983_vm8 }
0x1272   :  { %4403 = vmatmul.msk.f32.vlgmr.msra.gmra.mxu1 %vm6980_vm12, %v3270_v24  ;;  %vm6992_vm12 = vmmov %vm6983_vm8 }
0x1273   :  { %v3369_v48 = vpop.f32.mrf.mxu2  ;;  %v3469_v40 = vpop.f32.mrf.mxu3 }
0x1274   :  { %v3370_v47 = vadd.f32 %v6981_v43, %v3369_v48  ;;  %v3470_v53 = vadd.f32 %v6982_v51, %v3469_v40  ;;  %v3429_v9 = vpop.f32.mrf.mxu1 }
0x1275   :  { %v3409_v26 = vpop.f32.mrf.mxu0  ;;  %v3430_v2 = vadd.f32 %v4639_v31, %v3429_v9 }
0x1276   :  { %v3410_v28 = vadd.f32 %v4638_v55, %v3409_v26  ;;  %4404 = vmatpush.xpose.msk.msra.mxu2 %vm6983_vm8, %v3370_v47  ;;  %3704 = vmatpush.msra.mxu3 %v3470_v53 }
0x1277   :  { %3658 = vmatpush.msrb.mxu1 %v3430_v2 }
0x1278   :  { %4408 = vmatpush.xpose.msk.msrb.mxu0 %vm6985_vm15, %v3410_v28  ;;  %3796 = vmatpush.msrb.mxu3 %v6986_v41  ;;  %vm6993_vm15 = vmmov %vm6983_vm8 }
0x1279   :  { %3750 = vmatpush.msra.mxu1 %v4641_v37  ;;  %4405 = vmatmul.msk.f32.vlgmr.msra.gmra.mxu2 %vm6987_vm9, %v3290_v33  ;;  %vm6994_vm9 = vmmov %vm6983_vm8 }
0x127b   :  { %4409 = vmatmul.msk.f32.vlgmr.msrb.gmra.mxu0 %vm6988_vm10, %v3330_v29  ;;  %v3449_v5 = vpop.f32.mrf.mxu2  ;;  %vm6995_vm10 = vmmov %vm6983_vm8 }
0x127c   :  { %v3450_v52 = vadd.f32 %v6989_v18, %v3449_v5 }
0x127d   :  { %v3489_v54 = vpop.f32.mrf.mxu0 }
0x127e   :  { %v3490_v6 = vadd.f32 %v4642_v14, %v3489_v54  ;;  %3681 = vmatpush.msrb.mxu2 %v3450_v52 }
0x1280   :  { %3727 = vmatpush.msra.mxu0 %v3490_v6  ;;  %3773 = vmatpush.msra.mxu2 %v6990_v63 }
0x1282   :  { %3819 = vmatpush.msrb.mxu0 %v4643_v32 }
0x12ef   :  { %v3515_v50 = vpop.f32.mrf.mxu1 }
0x12f0   :  { %v3596_v13 = vsel %vm6991_vm11, %v3515_v50, -inf  ;;  %vm6996_vm11 = vmmov %vm6983_vm8 }
0x12f1   :  { %3597 = vmax.xlane.f32.xlu1 %v3596_v13  ;;  %v7007_v13 = vld [vmem:[#allocation9_spill] sm:$0xff] }
0x12f4   :  { %v3567_v20 = vpop.f32.mrf.mxu3 }
0x12f5   :  { %v3602_v61 = vsel %vm6992_vm12, %v3567_v20, -inf  ;;  %vm6997_vm12 = vmmov %vm6983_vm8 }
0x12f6   :  { %3603 = vmax.xlane.f32.xlu0 %v3602_v61 }
0x12f8   :  { %v3593_v46 = vpop.f32.mrf.mxu0 }
0x12f9   :  { %v3605_v45 = vsel %vm6993_vm15, %v3593_v46, -inf  ;;  %vm6998_vm15 = vmmov %vm6983_vm8 }
0x12fc   :  { %v3541_v16 = vpop.f32.mrf.mxu2 }
0x12fd   :  { %v3599_v56 = vsel %vm6983_vm8, %v3541_v16, -inf }
0x12fe   :  { %3600 = vmax.xlane.f32.xlu2 %v3599_v56 }
0x1306   :  { %3606 = vmax.xlane.f32.xlu2 %v3605_v45 }
0x1364   :  { %v3598_v44 = vpop.xlane.xlu1 %3597 }
0x1365   :  { %v3608_v30 = vsub.f32 %v3515_v50, %v3598_v44 }
0x1367   :  { %v3612_v1 = vmul.f32 1.442695, %v3608_v30 }
0x1369   :  { %4507 = vpow2.f32 %v3612_v1  ;;  %v3604_v36 = vpop.xlane.xlu0 %3603 }
0x136a   :  { %v3610_v3 = vsub.f32 %v3567_v20, %v3604_v36 }
0x136c   :  { %v3616_v0 = vmul.f32 1.442695, %v3610_v3 }
0x136e   :  { %4509 = vpow2.f32 %v3616_v0 }
0x136f   :  { %v4508_v62 = vpop.eup %4507 }
0x1370   :  { %v3620_v24 = vsel %vm6994_vm9, %v4508_v62, 0.0  ;;  %vm6999_vm9 = vmmov %vm6983_vm8 }
0x1371   :  { %v3601_v48 = vpop.xlane.xlu2 %3600  ;;  %3621 = vadd.xlane.f32.xlu2 %v3620_v24 }
0x1372   :  { %v3609_v40 = vsub.f32 %v3541_v16, %v3601_v48 }
0x1374   :  { %v4510_v43 = vpop.eup %4509  ;;  %v3614_v47 = vmul.f32 1.442695, %v3609_v40 }
0x1375   :  { %v3626_v51 = vsel %vm6995_vm10, %v4510_v43, 0.0  ;;  %vm7000_vm10 = vmmov %vm6983_vm8 }
0x1376   :  { %4511 = vpow2.f32 %v3614_v47  ;;  %3627 = vadd.xlane.f32.xlu1 %v3626_v51 }
0x1379   :  { %v3607_v53 = vpop.xlane.xlu2 %3606 }
0x137a   :  { %v3611_v26 = vsub.f32 %v3593_v46, %v3607_v53  ;;  %v7008_v46 = vld [vmem:[#allocation7_spill] sm:$0xff] }
0x137c   :  { %v4512_v9 = vpop.eup %4511  ;;  %v3618_v55 = vmul.f32 1.442695, %v3611_v26 }
0x137d   :  { %v3623_v28 = vsel %vm6996_vm11, %v4512_v9, 0.0  ;;  %vm7001_vm11 = vmmov %vm6983_vm8 }
0x137e   :  { %4513 = vpow2.f32 %v3618_v55  ;;  %3624 = vadd.xlane.f32.xlu0 %v3623_v28  ;;  %v4644_v28 = vld [vmem:[%s6895_s4] ss:$0 sm:$0xff] }
0x1384   :  { %v4514_v31 = vpop.eup %4513 }
0x1385   :  { %v3629_v2 = vsel %vm6997_vm12, %v4514_v31, 0.0  ;;  %vm7002_vm12 = vmmov %vm6983_vm8 }
0x1386   :  { %3630 = vadd.xlane.f32.xlu0 %v3629_v2 }
0x13e4   :  { %v3622_v21 = vpop.xlane.xlu2 %3621 }
0x13e5   :  { %4515 = vrcp.f32 %v3622_v21  ;;  %v7010_v21 = vld [vmem:[#allocation13_spill] sm:$0xff] }
0x13e9   :  { %v3628_v33 = vpop.xlane.xlu1 %3627 }
0x13ea   :  { %4517 = vrcp.f32 %v3628_v33 }
0x13eb   :  { %v4516_v58 = vpop.eup %4515 }
0x13ec   :  { %v3636_v29 = vmul.f32 %v4516_v58, %v4508_v62  ;;  %v7009_v62 = vld [vmem:[#allocation8_spill] sm:$0xff]  ;;  %v7011_v58 = vld [vmem:[#allocation10_spill] sm:$0xff] }
0x13ee   :  { %4410 = vmatmul.msk.f32.vlgmr.msrb.gmra.mxu1 %vm6983_vm8, %v3636_v29 }
0x13ef   :  { %4050 = vmatpush.msrb.mxu1 %v6173_v22 }
0x13f0   :  { %v4518_v37 = vpop.eup %4517 }
0x13f1   :  { %v3638_v41 = vmul.f32 %v4518_v37, %v4510_v43  ;;  %v3625_v5 = vpop.xlane.xlu0 %3624  ;;  %4051 = vmatpush.msrb.mxu1 %v6179_v17 }
0x13f2   :  { %4519 = vrcp.f32 %v3625_v5 }
0x13f3   :  { %4412 = vmatmul.msk.f32.vlgmr.msra.gmra.mxu3 %vm6998_vm15, %v3638_v41  ;;  %4052 = vmatpush.msrb.mxu1 %v6185_v35  ;;  %vm7003_vm15 = vmmov %vm6983_vm8 }
0x13f5   :  { %4053 = vmatpush.msrb.mxu1 %v6191_v8 }
0x13f8   :  { %v4520_v18 = vpop.eup %4519 }
0x13f9   :  { %v3637_v52 = vmul.f32 %v4520_v18, %v4512_v9  ;;  %v3631_v54 = vpop.xlane.xlu0 %3630 }
0x13fa   :  { %4521 = vrcp.f32 %v3631_v54 }
0x13fb   :  { %4411 = vmatmul.msk.f32.vlgmr.msrb.gmra.mxu2 %vm6999_vm9, %v3637_v52  ;;  %vm7013_vm9 = vcmask 261121  }
0x13fc   :  { %4070 = vmatpush.msrb.mxu2 %v6204_v42 }
0x13fe   :  { %4071 = vmatpush.msrb.mxu2 %v6210_v39 }
0x1400   :  { %v4522_v22 = vpop.eup %4521  ;;  %4072 = vmatpush.msrb.mxu2 %v6216_v57  ;;  %v7004_v57 = vld [vmem:[#allocation17_spill] sm:$0xff] }
0x1401   :  { %v3639_v17 = vmul.f32 %v4522_v22, %v4514_v31 }
0x1402   :  { %4073 = vmatpush.msrb.mxu2 %v6222_v12  ;;  %v2035_v12 = vadd.f32 %v6384_v27, %v7004_v57 }
0x1403   :  { %4413 = vmatmul.msk.f32.vlgmr.msra.gmra.mxu0 %vm7000_vm10, %v3639_v17  ;;  %vm7014_vm10 = vmmov %vm7013_vm9 }
0x1404   :  { %4074 = vmatpush.msrb.mxu2 %v6228_v4  ;;  %v2038_v4 = vrot.slane %v2035_v12, 1  ;;  %v2040_v63 = vrot.slane %v2035_v12, 3  ;;  %v6614_v20 = vadd.f32 %v2035_v12, %v7007_v13  ;;  %v2041_v61 = vrot.slane %v2035_v12, 4 }
0x1405   :  { %v2042_v51 = vrot.slane %v2035_v12, 5  ;;  %v2043_v53 = vrot.slane %v2035_v12, 6  ;;  %v2044_v2 = vrot.slane %v2035_v12, 7 }
0x1406   :  { %4075 = vmatpush.msrb.mxu2 %v6234_v23  ;;  %v2039_v23 = vrot.slane %v2035_v12, 2  ;;  %v6618_v45 = vadd.f32 %v2040_v63, %v7008_v46  ;;  %v6626_v24 = vadd.f32 %v2041_v61, %v7009_v62 }
0x1407   :  { %v6637_v33 = vadd.f32 %v2042_v51, %v7010_v21  ;;  %v6640_v29 = vadd.f32 %v2043_v53, %v7011_v58 }
0x1408   :  { %4076 = vmatpush.msrb.mxu2 %v6241_v49  ;;  %v7005_v49 = vld [vmem:[#allocation5_spill] sm:$0xff]  ;;  %v2073_v43 = vrot.slane %v6618_v45, 5  ;;  %v2075_v55 = vrot.slane %v6626_v24, 4 }
0x1409   :  { %v6607_v14 = vadd.f32 %v2038_v4, %v7005_v49  ;;  %v2077_v49 = vrot.slane %v6637_v33, 3  ;;  %v2079_v13 = vrot.slane %v6640_v29, 2 }
0x140a   :  { %4077 = vmatpush.msrb.mxu2 %v6249_v7  ;;  %v7006_v7 = vld [vmem:[#allocation6_spill] sm:$0xff] }
0x140b   :  { %v6610_v6 = vadd.f32 %v2039_v23, %v7006_v7  ;;  %v2069_v32 = vrot.slane %v6607_v14, 7 }
0x140d   :  { %v2071_v16 = vrot.slane %v6610_v6, 6  ;;  %v2070_v44 = vsel %vm181_vm0, %v2069_v32, %v6614_v20 }
0x140f   :  { %v2072_v48 = vsel %vm184_vm1, %v2071_v16, %v2070_v44 }
0x1410   :  { %v2074_v9 = vsel %vm187_vm2, %v2073_v43, %v2072_v48 }
0x1411   :  { %v2076_v37 = vsel %vm190_vm3, %v2075_v55, %v2074_v9 }
0x146b   :  { %v3660_v35 = vpop.f32.mrf.mxu1 }
0x146c   :  { %4414 = vmatmul.msk.f32.vlgmr.msra.gmra.mxu1 %vm7001_vm11, %v3660_v35 }
0x1476   :  { %v3706_v8 = vpop.f32.mrf.mxu3 }
0x1477   :  { %4416 = vmatmul.msk.f32.vlgmr.msrb.gmra.mxu3 %vm7002_vm12, %v3706_v8 }
0x147e   :  { %v3683_v42 = vpop.f32.mrf.mxu2 }
0x147f   :  { %4415 = vmatmul.msk.f32.vlgmr.msra.gmra.mxu2 %vm6983_vm8, %v3683_v42 }
0x1480   :  { %v3729_v39 = vpop.f32.mrf.mxu0 }
0x1481   :  { %4417 = vmatmul.msk.f32.vlgmr.msrb.gmra.mxu0 %vm7003_vm15, %v3729_v39 }
0x14e9   :  { %v3752_v50 = vpop.f32.mrf.mxu1 }
0x14ea   :  { %v3824_v30 = vsel %vm201_vm7, %v3752_v50, 0.0  ;;  %v7012_v50 = vld [vmem:[#allocation14_spill] sm:$0xff] }
0x14fa   :  { %v3798_v56 = vpop.f32.mrf.mxu3 }
0x14fb   :  { %v3827_v0 = vsel %vm201_vm7, %v3798_v56, 0.0 }
0x14fe   :  { %v3821_v36 = vpop.f32.mrf.mxu0 }
0x14ff   :  { %v3829_v47 = vsel %vm201_vm7, %v3821_v36, 0.0 }
0x1502   :  { %v3775_v27 = vpop.f32.mrf.mxu2 }
0x1503   :  { %v3825_v1 = vsel %vm201_vm7, %v3775_v27, 0.0 }
0x1504   :  { %v3826_v3 = vadd.f32 %v3825_v1, %v3824_v30 }
0x1506   :  { %v3828_v40 = vadd.f32 %v3827_v0, %v3826_v3 }
0x1508   :  { %v3830_v26 = vadd.f32 %v3829_v47, %v3828_v40 }
0x150a   :  { %v3831_v31 = vadd.f32 %v4644_v28, %v3830_v26 }
0x150c   :  { %v3839_v41 = vrot.slane %v3831_v31, 6  ;;  %v3833_v5 = vrot.slane %v3831_v31, 7  ;;  %v3834_v18 = vrot.slane %v3831_v31, 1  ;;  %v3835_v52 = vrot.slane %v3831_v31, 2 }
0x150d   :  { %v3836_v54 = vrot.slane %v3831_v31, 3  ;;  %v3837_v22 = vrot.slane %v3831_v31, 4  ;;  %v3838_v17 = vrot.slane %v3831_v31, 5  ;;  %v3849_v35 = vadd.f32 %v3831_v31, %v6455_v10 }
0x150e   :  { %v3855_v8 = vadd.f32 %v3839_v41, %v6470_v15  ;;  %v3848_v42 = vadd.f32 %v3833_v5, %v6453_v60  ;;  %v3850_v39 = vadd.f32 %v3834_v18, %v6457_v59  ;;  %v3851_v57 = vadd.f32 %v3835_v52, %v6459_v19 }
0x150f   :  { %v3852_v12 = vadd.f32 %v3836_v54, %v6461_v25  ;;  %v3853_v4 = vadd.f32 %v3837_v22, %v6463_v11  ;;  %v3864_v23 = vrot.slane %v3849_v35, 7  ;;  %v3854_v63 = vadd.f32 %v3838_v17, %v6466_v34 }
0x1510   :  { %v3876_v7 = vrot.slane %v3855_v8, 1  ;;  %v3866_v32 = vrot.slane %v3850_v39, 6  ;;  %v3868_v10 = vrot.slane %v3851_v57, 5  ;;  %v6654_v60 = vadd.f32 %v2044_v2, %v7012_v50 }
0x1511   :  { %v3865_v15 = vsel %vm184_vm1, %v3864_v23, %v3848_v42  ;;  %v2078_v59 = vsel %vm193_vm4, %v2077_v49, %v2076_v37  ;;  %v3870_v11 = vrot.slane %v3852_v12, 4  ;;  %v3872_v34 = vrot.slane %v3853_v4, 3 }
0x1512   :  { %v3882_v19 = vsel %vm2845_vm14, %v3876_v7, 0.0  ;;  %v3867_v25 = vsel %vm187_vm2, %v3866_v32, %v3865_v15  ;;  %v3874_v56 = vrot.slane %v3854_v63, 2  ;;  %v2080_v27 = vsel %vm196_vm5, %v2079_v13, %v2078_v59 }
0x1513   :  { %3883 = vadd.xlane.f32.xlu2 %v3882_v19  ;;  %v3869_v61 = vsel %vm190_vm3, %v3868_v10, %v3867_v25  ;;  %v2081_v44 = vrot.slane %v6654_v60, 1 }
0x1514   :  { %v3871_v16 = vsel %vm193_vm4, %v3870_v11, %v3869_v61 }
0x1515   :  { %v3873_v46 = vsel %vm196_vm5, %v3872_v34, %v3871_v16  ;;  %v2082_v36 = vsel %vm199_vm6, %v2081_v44, %v2080_v27 }
0x1516   :  { %v3875_v30 = vsel %vm199_vm6, %v3874_v56, %v3873_v46  ;;  %v2084_v3 = vsel %vm201_vm7, %v2082_v36, 0.0 }
0x1517   :  { %v3879_v1 = vsel %vm7013_vm9, %v3875_v30, 0.0 }
0x1518   :  { %3880 = vadd.xlane.f32.xlu1 %v3879_v1 }
0x151b   :  { %2085 = vadd.xlane.f32.xlu2 %v2084_v3 }
0x1586   :  { %v3884_v0 = vpop.xlane.xlu2 %3883 }
0x1587   :  { %v3886_v62 = vmul.f32 %v3884_v0, %v5246_v38 }
0x1589   :  { %v3895_v48 = vrot.slane %v3886_v62, 7 }
0x158b   :  { %v6670_v40 = vsub.f32 %v3855_v8, %v3895_v48  ;;  %v3881_v43 = vpop.xlane.xlu1 %3880 }
0x158c   :  { %v3885_v47 = vmul.f32 %v3881_v43, %v5246_v38 }
0x158d   :  { %v3919_v51 = vmul.f32 %v6670_v40, %v6670_v40 }
0x158e   :  { %v2086_v53 = vpop.xlane.xlu2 %2085  ;;  %v3889_v26 = vrot.slane %v3885_v47, 1  ;;  %v3890_v9 = vrot.slane %v3885_v47, 2  ;;  %v3891_v55 = vrot.slane %v3885_v47, 3  ;;  %v3892_v28 = vrot.slane %v3885_v47, 4 }
0x158f   :  { %v2087_v31 = vmul.f32 %v2086_v53, %v5246_v38  ;;  %v3940_v2 = vrot.slane %v3919_v51, 1  ;;  %v3893_v21 = vrot.slane %v3885_v47, 5  ;;  %v3894_v58 = vrot.slane %v3885_v47, 6 }
0x1590   :  { %v6676_v37 = vsub.f32 %v3848_v42, %v3885_v47  ;;  %v6678_v41 = vsub.f32 %v3849_v35, %v3889_v26  ;;  %v6680_v5 = vsub.f32 %v3850_v39, %v3890_v9  ;;  %v6682_v18 = vsub.f32 %v3851_v57, %v3891_v55 }
0x1591   :  { %v3946_v52 = vsel %vm2845_vm14, %v3940_v2, 0.0  ;;  %v6685_v54 = vsub.f32 %v3852_v12, %v3892_v28  ;;  %v6687_v22 = vsub.f32 %v3853_v4, %v3893_v21  ;;  %v6689_v17 = vsub.f32 %v3854_v63, %v3894_v58 }
0x1592   :  { %3947 = vadd.xlane.f32.xlu1 %v3946_v52  ;;  %v3913_v8 = vmul.f32 %v6678_v41, %v6678_v41  ;;  %v3914_v35 = vmul.f32 %v6680_v5, %v6680_v5  ;;  %v3915_v42 = vmul.f32 %v6682_v18, %v6682_v18  ;;  %v3912_v39 = vmul.f32 %v6676_v37, %v6676_v37 }
0x1593   :  { %v3916_v57 = vmul.f32 %v6685_v54, %v6685_v54  ;;  %v3917_v12 = vmul.f32 %v6687_v22, %v6687_v22  ;;  %v2089_v4 = vrot.slane %v2087_v31, 1  ;;  %v3918_v23 = vmul.f32 %v6689_v17, %v6689_v17 }
0x1594   :  { %v3928_v49 = vrot.slane %v3913_v8, 7  ;;  %v3930_v7 = vrot.slane %v3914_v35, 6  ;;  %v2090_v63 = vrot.slane %v2087_v31, 2  ;;  %v3932_v32 = vrot.slane %v3915_v42, 5 }
0x1595   :  { %v3934_v10 = vrot.slane %v3916_v57, 4  ;;  %v3936_v15 = vrot.slane %v3917_v12, 3  ;;  %v2091_v50 = vrot.slane %v2087_v31, 3  ;;  %v2092_v19 = vrot.slane %v2087_v31, 4 }
0x1596   :  { %v3929_v59 = vsel %vm184_vm1, %v3928_v49, %v3912_v39  ;;  %v2093_v25 = vrot.slane %v2087_v31, 5  ;;  %v2094_v11 = vrot.slane %v2087_v31, 6  ;;  %v2095_v61 = vrot.slane %v2087_v31, 7 }
0x1597   :  { %v3931_v13 = vsel %vm187_vm2, %v3930_v7, %v3929_v59  ;;  %v6708_v34 = vsub.f32 %v6614_v20, %v2087_v31  ;;  %v6711_v16 = vsub.f32 %v6607_v14, %v2089_v4  ;;  %v6715_v27 = vsub.f32 %v6610_v6, %v2090_v63 }
0x1598   :  { %v3933_v56 = vsel %vm190_vm3, %v3932_v32, %v3931_v13  ;;  %v6718_v46 = vsub.f32 %v6618_v45, %v2091_v50  ;;  %v6721_v44 = vsub.f32 %v6626_v24, %v2092_v19  ;;  %v3938_v1 = vrot.slane %v3918_v23, 2 }
0x1599   :  { %v3935_v30 = vsel %vm193_vm4, %v3934_v10, %v3933_v56  ;;  %v6725_v20 = vsub.f32 %v6637_v33, %v2093_v25  ;;  %v6728_v14 = vsub.f32 %v6640_v29, %v2094_v11  ;;  %v6732_v6 = vsub.f32 %v6654_v60, %v2095_v61 }
0x159a   :  { %v3937_v36 = vsel %vm196_vm5, %v3936_v15, %v3935_v30  ;;  %v2113_v45 = vmul.f32 %v6711_v16, %v6711_v16  ;;  %v2114_v24 = vmul.f32 %v6715_v27, %v6715_v27  ;;  %v2115_v33 = vmul.f32 %v6718_v46, %v6718_v46 }
0x159b   :  { %v3939_v3 = vsel %vm199_vm6, %v3938_v1, %v3937_v36  ;;  %v2116_v29 = vmul.f32 %v6721_v44, %v6721_v44  ;;  %v2112_v60 = vmul.f32 %v6708_v34, %v6708_v34  ;;  %v2117_v62 = vmul.f32 %v6725_v20, %v6725_v20 }
0x159c   :  { %v3943_v0 = vsel %vm7014_vm10, %v3939_v3, 0.0  ;;  %v2128_v48 = vrot.slane %v2113_v45, 7  ;;  %v2118_v43 = vmul.f32 %v6728_v14, %v6728_v14  ;;  %v2130_v47 = vrot.slane %v2114_v24, 6 }
0x159d   :  { %3944 = vadd.xlane.f32.xlu0 %v3943_v0  ;;  %v2119_v51 = vmul.f32 %v6732_v6, %v6732_v6  ;;  %v2132_v26 = vrot.slane %v2115_v33, 5  ;;  %v2134_v55 = vrot.slane %v2116_v29, 4  ;;  %v2136_v31 = vrot.slane %v2117_v62, 3 }
0x159e   :  { %v2129_v53 = vsel %vm181_vm0, %v2128_v48, %v2112_v60  ;;  %v2138_v21 = vrot.slane %v2118_v43, 2 }
0x159f   :  { %v2131_v9 = vsel %vm184_vm1, %v2130_v47, %v2129_v53  ;;  %v2140_v52 = vrot.slane %v2119_v51, 1  ;;  %v4645_v47 = vld [vmem:[%s6896_s5] ss:$0 sm:$0xff] }
0x15a0   :  { %v2133_v28 = vsel %vm187_vm2, %v2132_v26, %v2131_v9 }
0x15a1   :  { %v2135_v2 = vsel %vm190_vm3, %v2134_v55, %v2133_v28 }
0x15a2   :  { %v2137_v58 = vsel %vm193_vm4, %v2136_v31, %v2135_v2 }
0x15a3   :  { %v2139_v8 = vsel %vm196_vm5, %v2138_v21, %v2137_v58 }
0x15a4   :  { %v2141_v35 = vsel %vm199_vm6, %v2140_v52, %v2139_v8 }
0x15a5   :  { %v2143_v42 = vsel %vm201_vm7, %v2141_v35, 0.0 }
0x15a6   :  { %2144 = vadd.xlane.f32.xlu2 %v2143_v42 }
0x1605   :  { %v3948_v39 = vpop.xlane.xlu1 %3947 }
0x1606   :  { %v3950_v57 = vmul.f32 %v3948_v39, %v5246_v38 }
0x1608   :  { %v3952_v12 = vadd.f32 1e-05, %v3950_v57 }
0x160a   :  { %4523 = vrsqrt.f32 %v3952_v12  ;;  %vm3969_vm8 = vweird.f32 %v3952_v12 }
0x1610   :  { %v4524_v4 = vpop.eup %4523  ;;  %v3945_v23 = vpop.xlane.xlu0 %3944 }
0x1611   :  { %v3949_v49 = vmul.f32 %v3945_v23, %v5246_v38  ;;  %v3964_v7 = vmul.f32 %v4524_v4, %v3952_v12  ;;  %vm3970_vm11 = vweird.f32 %v4524_v4 }
0x1612   :  { %vm6762_vm15 = vmor %vm3969_vm8, %vm3970_vm11 }
0x1613   :  { %v3951_v63 = vadd.f32 1e-05, %v3949_v49  ;;  %v3965_v32 = vmul.f32 %v4524_v4, %v3964_v7 }
0x1615   :  { %4525 = vrsqrt.f32 %v3951_v63  ;;  %v3966_v10 = vmul.f32 0.5, %v3965_v32  ;;  %vm3959_vm9 = vweird.f32 %v3951_v63 }
0x1617   :  { %v3967_v59 = vsub.f32 1.5, %v3966_v10 }
0x1619   :  { %v3968_v11 = vmul.f32 %v4524_v4, %v3967_v59 }
0x161b   :  { %v4526_v15 = vpop.eup %4525  ;;  %v3972_v30 = vsel %vm6762_vm15, %v4524_v4, %v3968_v11 }
0x161c   :  { %v3954_v50 = vmul.f32 %v4526_v15, %v3951_v63  ;;  %vm3960_vm12 = vweird.f32 %v4526_v15  ;;  %v3981_v43 = vrot.slane %v3972_v30, 7 }
0x161d   :  { %vm3961_vm10 = vmor %vm3959_vm9, %vm3960_vm12 }
0x161e   :  { %v3955_v19 = vmul.f32 %v4526_v15, %v3954_v50  ;;  %v3997_v28 = vmul.f32 %v3981_v43, %v6670_v40 }
0x1620   :  { %v3956_v25 = vmul.f32 0.5, %v3955_v19  ;;  %v4005_v35 = vmul.f32 %v4645_v47, %v3997_v28 }
0x1622   :  { %v3957_v13 = vsub.f32 1.5, %v3956_v25  ;;  %v4647_v25 = vld [vmem:[%s6899_s8] ss:$0 sm:$0xff] }
0x1624   :  { %v3958_v56 = vmul.f32 %v4526_v15, %v3957_v13 }
0x1626   :  { %v3962_v1 = vsel %vm3961_vm10, %v4526_v15, %v3958_v56  ;;  %v4648_v56 = vld [vmem:[%s6901_s10] ss:$0 sm:$0xff] }
0x1627   :  { %v3975_v36 = vrot.slane %v3962_v1, 1  ;;  %v3976_v45 = vrot.slane %v3962_v1, 2  ;;  %v3977_v24 = vrot.slane %v3962_v1, 3  ;;  %v3978_v3 = vrot.slane %v3962_v1, 4 }
0x1628   :  { %v3979_v33 = vrot.slane %v3962_v1, 5  ;;  %v3990_v29 = vmul.f32 %v3962_v1, %v6676_v37  ;;  %v3980_v0 = vrot.slane %v3962_v1, 6 }
0x1629   :  { %v3991_v60 = vmul.f32 %v3975_v36, %v6678_v41  ;;  %v3992_v62 = vmul.f32 %v3976_v45, %v6680_v5  ;;  %v3993_v48 = vmul.f32 %v3977_v24, %v6682_v18  ;;  %v3994_v53 = vmul.f32 %v3978_v3, %v6685_v54  ;;  %v4646_v41 = vld [vmem:[%s6897_s6] ss:$0 sm:$0xff] }
0x162a   :  { %v3998_v51 = vmul.f32 %v4645_v47, %v3990_v29  ;;  %v3995_v55 = vmul.f32 %v3979_v33, %v6687_v22  ;;  %v3996_v18 = vmul.f32 %v3980_v0, %v6689_v17  ;;  %v4013_v23 = vadd.f32 %v4646_v41, %v4005_v35 }
0x162b   :  { %v3999_v26 = vmul.f32 %v4645_v47, %v3991_v60  ;;  %v4000_v9 = vmul.f32 %v4645_v47, %v3992_v62  ;;  %v4001_v37 = vmul.f32 %v4645_v47, %v3993_v48  ;;  %v4002_v2 = vmul.f32 %v4645_v47, %v3994_v53 }
0x162c   :  { %v4006_v5 = vadd.f32 %v4646_v41, %v3998_v51  ;;  %v4003_v52 = vmul.f32 %v4645_v47, %v3995_v55  ;;  %v4004_v8 = vmul.f32 %v4645_v47, %v3996_v18  ;;  %v4034_v15 = vrot.slane %v4013_v23, 2 }
0x162d   :  { %v4008_v31 = vadd.f32 %v4646_v41, %v4000_v9  ;;  %v4007_v21 = vadd.f32 %v4646_v41, %v3999_v26  ;;  %v4009_v54 = vadd.f32 %v4646_v41, %v4001_v37  ;;  %v4010_v22 = vadd.f32 %v4646_v41, %v4002_v2 }
0x162e   :  { %v4022_v58 = vrot.slane %v4006_v5, 1  ;;  %v4011_v57 = vadd.f32 %v4646_v41, %v4003_v52  ;;  %v4012_v4 = vadd.f32 %v4646_v41, %v4004_v8 }
0x162f   :  { %v4024_v42 = vrot.slane %v4008_v31, 7  ;;  %v4026_v12 = vrot.slane %v4009_v54, 6  ;;  %v4028_v49 = vrot.slane %v4010_v22, 5 }
0x1630   :  { %v4023_v39 = vsel %vm181_vm0, %v4007_v21, %v4022_v58  ;;  %v4030_v7 = vrot.slane %v4011_v57, 4  ;;  %v4032_v32 = vrot.slane %v4012_v4, 3  ;;  %vm7017_vm0 = vcmask 261121  }
0x1631   :  { %v4025_v17 = vsel %vm184_vm1, %v4024_v42, %v4023_v39 }
0x1632   :  { %v4027_v40 = vsel %vm187_vm2, %v4026_v12, %v4025_v17 }
0x1633   :  { %v4029_v63 = vsel %vm190_vm3, %v4028_v49, %v4027_v40 }
0x1634   :  { %v4031_v10 = vsel %vm193_vm4, %v4030_v7, %v4029_v63 }
0x1635   :  { %v4033_v50 = vsel %vm196_vm5, %v4032_v32, %v4031_v10 }
0x1636   :  { %v4035_v59 = vsel %vm199_vm6, %v4034_v15, %v4033_v50 }
0x1637   :  { %4418 = vmatmul.msk.f32.vlgmr.msrb.gmra.mxu1 %vm201_vm7, %v4035_v59  ;;  %vm7018_vm7 = vmmov %vm7017_vm0 }
0x16b4   :  { %v4055_v19 = vpop.f32.mrf.mxu1 }
0x16b5   :  { %v4056_v11 = vadd.f32 %v4647_v25, %v4055_v19 }
0x16b7   :  { %v4058_v13 = vmax.f32 %v4056_v11, 0.0 }
0x16b9   :  { %4419 = vmatmul.msk.f32.vlgmr.msrb.gmra.mxu2 %vm1013_vm13, %v4058_v13  ;;  %vm4264_vm13 = vcmask 1040384  }
0x173c   :  { %v4079_v61 = vpop.f32.mrf.mxu2 }
0x173d   :  { %v4080_v30 = vadd.f32 %v4648_v56, %v4079_v61 }
0x173f   :  { %v4089_v1 = vrot.slane %v4080_v30, 6  ;;  %v4083_v36 = vrot.slane %v4080_v30, 7  ;;  %v4084_v45 = vrot.slane %v4080_v30, 1  ;;  %v4085_v24 = vrot.slane %v4080_v30, 2 }
0x1740   :  { %v4086_v3 = vrot.slane %v4080_v30, 3  ;;  %v4087_v33 = vrot.slane %v4080_v30, 4  ;;  %v4088_v29 = vrot.slane %v4080_v30, 5  ;;  %v4099_v0 = vadd.f32 %v4080_v30, %v4007_v21 }
0x1741   :  { %v4105_v60 = vadd.f32 %v4089_v1, %v4013_v23  ;;  %v4098_v62 = vadd.f32 %v4083_v36, %v4006_v5  ;;  %v4100_v48 = vadd.f32 %v4084_v45, %v4008_v31  ;;  %v4101_v43 = vadd.f32 %v4085_v24, %v4009_v54 }
0x1742   :  { %v4102_v47 = vadd.f32 %v4086_v3, %v4010_v22  ;;  %v4103_v51 = vadd.f32 %v4087_v33, %v4011_v57  ;;  %v4114_v53 = vrot.slane %v4099_v0, 7  ;;  %v4104_v9 = vadd.f32 %v4088_v29, %v4012_v4 }
0x1743   :  { %v4126_v26 = vrot.slane %v4105_v60, 1  ;;  %v4116_v55 = vrot.slane %v4100_v48, 6  ;;  %v4118_v37 = vrot.slane %v4101_v43, 5 }
0x1744   :  { %v4115_v41 = vsel %vm184_vm1, %v4114_v53, %v4098_v62  ;;  %v4120_v2 = vrot.slane %v4102_v47, 4  ;;  %v4122_v5 = vrot.slane %v4103_v51, 3  ;;  %v4124_v58 = vrot.slane %v4104_v9, 2 }
0x1745   :  { %v4132_v18 = vsel %vm2845_vm14, %v4126_v26, 0.0  ;;  %v4117_v28 = vsel %vm187_vm2, %v4116_v55, %v4115_v41  ;;  %v2145_v55 = vpop.xlane.xlu2 %2144 }
0x1746   :  { %4133 = vadd.xlane.f32.xlu1 %v4132_v18  ;;  %v4119_v21 = vsel %vm190_vm3, %v4118_v37, %v4117_v28  ;;  %v2146_v37 = vmul.f32 %v2145_v55, %v5246_v38 }
0x1747   :  { %v4121_v31 = vsel %vm193_vm4, %v4120_v2, %v4119_v21 }
0x1748   :  { %v4123_v52 = vsel %vm196_vm5, %v4122_v5, %v4121_v31  ;;  %v2147_v41 = vadd.f32 1e-05, %v2146_v37 }
0x1749   :  { %v4125_v54 = vsel %vm199_vm6, %v4124_v58, %v4123_v52 }
0x174a   :  { %v4129_v8 = vsel %vm7017_vm0, %v4125_v54, 0.0  ;;  %4527 = vrsqrt.f32 %v2147_v41 }
0x174b   :  { %4130 = vadd.xlane.f32.xlu0 %v4129_v8 }
0x1750   :  { %v4528_v18 = vpop.eup %4527 }
0x1751   :  { %v2149_v28 = vmul.f32 %v4528_v18, %v2147_v41 }
0x1753   :  { %v2150_v2 = vmul.f32 %v4528_v18, %v2149_v28 }
0x1755   :  { %v2151_v5 = vmul.f32 0.5, %v2150_v2 }
0x1757   :  { %v2152_v52 = vsub.f32 1.5, %v2151_v5 }
0x1759   :  { %v2153_v54 = vmul.f32 %v4528_v18, %v2152_v52 }
0x17b9   :  { %v4134_v35 = vpop.xlane.xlu1 %4133 }
0x17ba   :  { %v4136_v42 = vmul.f32 %v4134_v35, %v5246_v38 }
0x17bc   :  { %v4145_v22 = vrot.slane %v4136_v42, 7 }
0x17be   :  { %v6806_v39 = vsub.f32 %v4105_v60, %v4145_v22  ;;  %v4131_v57 = vpop.xlane.xlu0 %4130 }
0x17bf   :  { %v4135_v12 = vmul.f32 %v4131_v57, %v5246_v38 }
0x17c0   :  { %v4169_v4 = vmul.f32 %v6806_v39, %v6806_v39 }
0x17c1   :  { %v4139_v23 = vrot.slane %v4135_v12, 1  ;;  %v4140_v17 = vrot.slane %v4135_v12, 2  ;;  %v4141_v49 = vrot.slane %v4135_v12, 3  ;;  %v4142_v40 = vrot.slane %v4135_v12, 4 }
0x17c2   :  { %v4190_v7 = vrot.slane %v4169_v4, 1  ;;  %v4143_v63 = vrot.slane %v4135_v12, 5  ;;  %v4144_v32 = vrot.slane %v4135_v12, 6  ;;  %v6811_v10 = vsub.f32 %v4098_v62, %v4135_v12 }
0x17c3   :  { %v6813_v15 = vsub.f32 %v4099_v0, %v4139_v23  ;;  %v6815_v50 = vsub.f32 %v4100_v48, %v4140_v17  ;;  %v6817_v59 = vsub.f32 %v4101_v43, %v4141_v49  ;;  %v6819_v19 = vsub.f32 %v4102_v47, %v4142_v40 }
0x17c4   :  { %v4196_v25 = vsel %vm2845_vm14, %v4190_v7, 0.0  ;;  %v6822_v11 = vsub.f32 %v4103_v51, %v4143_v63  ;;  %v6824_v13 = vsub.f32 %v4104_v9, %v4144_v32  ;;  %v4162_v36 = vmul.f32 %v6811_v10, %v6811_v10 }
0x17c5   :  { %4197 = vadd.xlane.f32.xlu1 %v4196_v25  ;;  %v4163_v61 = vmul.f32 %v6813_v15, %v6813_v15  ;;  %v4164_v56 = vmul.f32 %v6815_v50, %v6815_v50  ;;  %v4165_v30 = vmul.f32 %v6817_v59, %v6817_v59  ;;  %v4166_v1 = vmul.f32 %v6819_v19, %v6819_v19 }
0x17c6   :  { %v4167_v45 = vmul.f32 %v6822_v11, %v6822_v11  ;;  %v4168_v33 = vmul.f32 %v6824_v13, %v6824_v13  ;;  %vm4273_vm14 = vcmask 254976  }
0x17c7   :  { %v4178_v24 = vrot.slane %v4163_v61, 7  ;;  %v4180_v3 = vrot.slane %v4164_v56, 6  ;;  %v4182_v0 = vrot.slane %v4165_v30, 5  ;;  %v4184_v62 = vrot.slane %v4166_v1, 4 }
0x17c8   :  { %v4186_v43 = vrot.slane %v4167_v45, 3  ;;  %v4188_v51 = vrot.slane %v4168_v33, 2 }
0x17c9   :  { %v4179_v29 = vsel %vm184_vm1, %v4178_v24, %v4162_v36  ;;  %vm2155_vm1 = vweird.f32 %v4528_v18 }
0x17ca   :  { %v4181_v60 = vsel %vm187_vm2, %v4180_v3, %v4179_v29  ;;  %vm2154_vm2 = vweird.f32 %v2147_v41  ;;  %v4649_v3 = vld [vmem:[%s6902_s11] ss:$0 sm:$0xff] }
0x17cb   :  { %v4183_v48 = vsel %vm190_vm3, %v4182_v0, %v4181_v60  ;;  %vm2156_vm3 = vmor %vm2154_vm2, %vm2155_vm1 }
0x17cc   :  { %v4185_v47 = vsel %vm193_vm4, %v4184_v62, %v4183_v48  ;;  %v2157_v57 = vsel %vm2156_vm3, %v4528_v18, %v2153_v54 }
0x17cd   :  { %v4187_v53 = vsel %vm196_vm5, %v4186_v43, %v4185_v47  ;;  %v2165_v23 = vrot.slane %v2157_v57, 7  ;;  %v2159_v32 = vrot.slane %v2157_v57, 1  ;;  %v2160_v25 = vrot.slane %v2157_v57, 2 }
0x17ce   :  { %v4189_v26 = vsel %vm199_vm6, %v4188_v51, %v4187_v53  ;;  %v2161_v61 = vrot.slane %v2157_v57, 3  ;;  %v2162_v30 = vrot.slane %v2157_v57, 4  ;;  %v2164_v45 = vrot.slane %v2157_v57, 6 }
0x17cf   :  { %v4193_v9 = vsel %vm7018_vm7, %v4189_v26, 0.0  ;;  %v2181_v40 = vmul.f32 %v2165_v23, %v6732_v6  ;;  %v2174_v24 = vmul.f32 %v2157_v57, %v6708_v34  ;;  %v2175_v0 = vmul.f32 %v2159_v32, %v6711_v16 }
0x17d0   :  { %4194 = vadd.xlane.f32.xlu0 %v4193_v9  ;;  %v2176_v60 = vmul.f32 %v2160_v25, %v6715_v27  ;;  %v2177_v62 = vmul.f32 %v2161_v61, %v6718_v46  ;;  %v2178_v48 = vmul.f32 %v2162_v30, %v6721_v44  ;;  %v2180_v51 = vmul.f32 %v2164_v45, %v6728_v14 }
0x17d1   :  { %v2189_v6 = vmul.f32 %v4649_v3, %v2181_v40  ;;  %v2182_v53 = vmul.f32 %v4649_v3, %v2174_v24  ;;  %v2183_v46 = vmul.f32 %v4649_v3, %v2175_v0 }
0x17d2   :  { %v2185_v55 = vmul.f32 %v4649_v3, %v2177_v62  ;;  %v2186_v37 = vmul.f32 %v4649_v3, %v2178_v48  ;;  %v2188_v41 = vmul.f32 %v4649_v3, %v2180_v51 }
0x1838   :  { %v4198_v21 = vpop.xlane.xlu1 %4197 }
0x1839   :  { %v4200_v31 = vmul.f32 %v4198_v21, %v5246_v38 }
0x183b   :  { %v4202_v58 = vadd.f32 1e-05, %v4200_v31 }
0x183d   :  { %4529 = vrsqrt.f32 %v4202_v58  ;;  %vm4219_vm5 = vweird.f32 %v4202_v58 }
0x1843   :  { %v4530_v8 = vpop.eup %4529  ;;  %v4195_v35 = vpop.xlane.xlu0 %4194 }
0x1844   :  { %v4214_v42 = vmul.f32 %v4530_v8, %v4202_v58  ;;  %v4199_v22 = vmul.f32 %v4195_v35, %v5246_v38  ;;  %vm4220_vm4 = vweird.f32 %v4530_v8  ;;  %v2163_v38 = vrot.slane %v2157_v57, 5 }
0x1845   :  { %vm4221_vm6 = vmor %vm4219_vm5, %vm4220_vm4 }
0x1846   :  { %v4215_v12 = vmul.f32 %v4530_v8, %v4214_v42  ;;  %v4201_v4 = vadd.f32 1e-05, %v4199_v22  ;;  %v2179_v43 = vmul.f32 %v2163_v38, %v6725_v20  ;;  %v2184_v20 = vmul.f32 %v4649_v3, %v2176_v60 }
0x1848   :  { %v4216_v17 = vmul.f32 0.5, %v4215_v12  ;;  %4531 = vrsqrt.f32 %v4201_v4  ;;  %vm4209_vm12 = vweird.f32 %v4201_v4  ;;  %v2187_v14 = vmul.f32 %v4649_v3, %v2179_v43 }
0x184a   :  { %v4217_v49 = vsub.f32 1.5, %v4216_v17 }
0x184c   :  { %v4218_v7 = vmul.f32 %v4530_v8, %v4217_v49 }
0x184e   :  { %v4532_v63 = vpop.eup %4531  ;;  %v4222_v56 = vsel %vm4221_vm6, %v4530_v8, %v4218_v7 }
0x184f   :  { %v4231_v1 = vrot.slane %v4222_v56, 7  ;;  %v4204_v36 = vmul.f32 %v4532_v63, %v4201_v4  ;;  %vm4210_vm11 = vweird.f32 %v4532_v63 }
0x1850   :  { %vm4211_vm8 = vmor %vm4209_vm12, %vm4210_vm11 }
0x1851   :  { %v4247_v33 = vmul.f32 %v4231_v1, %v6806_v39  ;;  %v4205_v29 = vmul.f32 %v4532_v63, %v4204_v36  ;;  %v4650_v39 = vld [vmem:[%s6903_s12] ss:$0 sm:$0xff]  ;;  %s4678_s12 = smov [#allocation2]  }
0x1852   :  { %v2197_v26 = vadd.f32 %v4650_v39, %v2189_v6  ;;  %v2190_v18 = vadd.f32 %v4650_v39, %v2182_v53  ;;  %v2191_v58 = vadd.f32 %v4650_v39, %v2183_v46  ;;  %v2192_v12 = vadd.f32 %v4650_v39, %v2184_v20  ;;  %s4286_s28 = sshll.u32 %s4678_s12, 4  ;;  %s4287_s28 = int_to_ptr.vmem [resolvable:$true] %s4286_s28 }
0x1853   :  { %v4255_v47 = vmul.f32 %v4649_v3, %v4247_v33  ;;  %v4206_v34 = vmul.f32 0.5, %v4205_v29  ;;  %v2193_v32 = vadd.f32 %v4650_v39, %v2185_v55  ;;  %v2194_v30 = vadd.f32 %v4650_v39, %v2186_v37 }
0x1854   :  { %v2195_v1 = vadd.f32 %v4650_v39, %v2187_v14  ;;  %v2196_v24 = vadd.f32 %v4650_v39, %v2188_v41 }
0x1855   :  { %v4263_v16 = vadd.f32 %v4650_v39, %v4255_v47  ;;  %v4207_v27 = vsub.f32 1.5, %v4206_v34 }
0x1857   :  { %v4272_v44 = vsel %vm4264_vm13, %v2197_v26, %v4263_v16  ;;  %v4208_v9 = vmul.f32 %v4532_v63, %v4207_v27 }
0x1858   :  { %4281 = vst.msk [vmem:[#allocation2 + $0xe] sm:$0x3] %vm4273_vm14, %v4272_v44 }
0x1859   :  { %v4212_v28 = vsel %vm4211_vm8, %v4532_v63, %v4208_v9 }
0x185a   :  { %v4225_v2 = vrot.slane %v4212_v28, 1  ;;  %v4226_v21 = vrot.slane %v4212_v28, 2  ;;  %v4227_v5 = vrot.slane %v4212_v28, 3  ;;  %v4228_v31 = vrot.slane %v4212_v28, 4 }
0x185b   :  { %v4229_v52 = vrot.slane %v4212_v28, 5  ;;  %v4230_v54 = vrot.slane %v4212_v28, 6  ;;  %v4240_v8 = vmul.f32 %v4212_v28, %v6811_v10 }
0x185c   :  { %v4241_v35 = vmul.f32 %v4225_v2, %v6813_v15  ;;  %v4242_v42 = vmul.f32 %v4226_v21, %v6815_v50  ;;  %v4243_v22 = vmul.f32 %v4227_v5, %v6817_v59  ;;  %v4244_v57 = vmul.f32 %v4228_v31, %v6819_v19 }
0x185d   :  { %v4245_v4 = vmul.f32 %v4229_v52, %v6822_v11  ;;  %v4246_v23 = vmul.f32 %v4230_v54, %v6824_v13  ;;  %v4248_v17 = vmul.f32 %v4649_v3, %v4240_v8 }
0x185e   :  { %v4249_v49 = vmul.f32 %v4649_v3, %v4241_v35  ;;  %v4250_v40 = vmul.f32 %v4649_v3, %v4242_v42  ;;  %v4251_v7 = vmul.f32 %v4649_v3, %v4243_v22  ;;  %v4252_v63 = vmul.f32 %v4649_v3, %v4244_v57 }
0x185f   :  { %v4253_v10 = vmul.f32 %v4649_v3, %v4245_v4  ;;  %v4254_v25 = vmul.f32 %v4649_v3, %v4246_v23  ;;  %v4256_v15 = vadd.f32 %v4650_v39, %v4248_v17 }
0x1860   :  { %v4257_v61 = vadd.f32 %v4650_v39, %v4249_v49  ;;  %v4258_v50 = vadd.f32 %v4650_v39, %v4250_v40  ;;  %v4259_v56 = vadd.f32 %v4650_v39, %v4251_v7  ;;  %v4260_v59 = vadd.f32 %v4650_v39, %v4252_v63 }
0x1861   :  { %v4261_v19 = vadd.f32 %v4650_v39, %v4253_v10  ;;  %v4262_v38 = vadd.f32 %v4650_v39, %v4254_v25  ;;  %v4265_v11 = vsel %vm4264_vm13, %v2190_v18, %v4256_v15 }
0x1862   :  { %v4266_v13 = vsel %vm4264_vm13, %v2191_v58, %v4257_v61  ;;  %v4267_v36 = vsel %vm4264_vm13, %v2192_v12, %v4258_v50  ;;  %v4268_v45 = vsel %vm4264_vm13, %v2193_v32, %v4259_v56  ;;  %4274 = vst.msk [vmem:[#allocation2] sm:$0x3] %vm4273_vm14, %v4265_v11  ;;  %v4269_v3 = vsel %vm4264_vm13, %v2194_v30, %v4260_v59 }
0x1863   :  { %4275 = vst.msk [vmem:[#allocation2 + $0x2] sm:$0x3] %vm4273_vm14, %v4266_v13  ;;  %v4270_v6 = vsel %vm4264_vm13, %v2195_v1, %v4261_v19  ;;  %v4271_v33 = vsel %vm4264_vm13, %v2196_v24, %v4262_v38 }
0x1864   :  { %4276 = vst.msk [vmem:[#allocation2 + $0x4] sm:$0x3] %vm4273_vm14, %v4267_v36 }
0x1865   :  { %4277 = vst.msk [vmem:[#allocation2 + $0x6] sm:$0x3] %vm4273_vm14, %v4268_v45 }
0x1866   :  { %4278 = vst.msk [vmem:[#allocation2 + $0x8] sm:$0x3] %vm4273_vm14, %v4269_v3 }
0x1867   :  { %4279 = vst.msk [vmem:[#allocation2 + $0xa] sm:$0x3] %vm4273_vm14, %v4270_v6 }
0x1868   :  { %4280 = vst.msk [vmem:[#allocation2 + $0xc] sm:$0x3] %vm4273_vm14, %v4271_v33 }
0x1869   :  { %4294 = dma.vmem_to_hbm [thread:$0]  %s4287_s28, 256, %s4289_s30, [#allocation3], %s4679_s13, %s4679_s13, %s4680_s14  }
0x186a   :  { %4675 = dma.done.wait [#allocation3], 256  }
0x186b   :  { %4676 = vsyncadd [#allocation3], 4294967040 }
0x186c   :  { %4299 = vsyncpa [#allocation3], 1 }

</bundles_post_ra>
